<compile_context>
chip_gen: v7x
topology: tpu7x:2x2x1
jax: 0.10.0
libtpu: 0.0.40
codegen_flags: <defaults>
</compile_context>

<pallas_src>
import functools

import jax
import jax.numpy as jnp
from jax.experimental import pallas as pl
from jax.experimental.pallas import tpu as pltpu


def attention2d_kernel(x_ref, g_ref, wqkv_ref, wout_ref, bout_ref, o_ref,
                       qkv_scratch, *, heads, dim_head):
    C = x_ref.shape[1]
    N = x_ref.shape[2]
    TQ = o_ref.shape[2]
    H = heads * dim_head
    qi = pl.program_id(1)

    @pl.when(qi == 0)
    def _fill_qkv_cache():
        # RMSNorm (channel-wise, f32 stats, EUP rsqrt) + full-N qkv projection,
        # computed once per batch and cached in VMEM scratch for all query tiles.
        x = x_ref[0].astype(jnp.float32)                             # (C, N)
        ss = jnp.sum(x * x, axis=0, keepdims=True)                   # (1, N)
        inv = jax.lax.rsqrt(jnp.maximum(ss, jnp.float32(1e-24)))     # == 1/max(||x||, 1e-12)
        gscale = g_ref[...] * jnp.sqrt(jnp.float32(C))               # (C, 1)
        xn = (x * inv * gscale).astype(jnp.bfloat16)                 # (C, N)
        # 1x1 conv as (3H, C) @ (C, N) matmul.  K = C may be tiny (MXU under-filled)
        # but output stays lane-dense; done once per batch now.
        qkv = jnp.dot(wqkv_ref[...], xn, preferred_element_type=jnp.float32)   # (3H, N)
        scale = jnp.float32(dim_head) ** -0.5
        qkv_scratch[0] = (qkv[0:H] * scale).astype(jnp.bfloat16).reshape(heads, dim_head, N)
        qkv_scratch[1] = qkv[H:2 * H].astype(jnp.bfloat16).reshape(heads, dim_head, N)
        qkv_scratch[2] = qkv[2 * H:3 * H].astype(jnp.bfloat16).reshape(heads, dim_head, N)

    start = pl.multiple_of(qi * TQ, TQ)
    qh = qkv_scratch[0, :, :, pl.ds(start, TQ)]                      # (heads, dim_head, TQ), pre-scaled
    kh = qkv_scratch[1]                                              # (heads, dim_head, N)
    vh = qkv_scratch[2]                                              # (heads, dim_head, N)

    # All heads in one batched dot_general (no per-head loop / transpose / concat).
    sim = jnp.einsum('hdq,hdk->hqk', qh, kh,
                     preferred_element_type=jnp.float32)             # (heads, TQ, N) f32
    m = jnp.max(sim, axis=-1, keepdims=True)
    p = jnp.exp(sim - m)                                             # f32 softmax numerator
    inv_l = pl.reciprocal(jnp.sum(p, axis=-1, keepdims=True), approx=True)   # (heads, TQ, 1)

    # Deferred normalization: contract un-normalized p (<=1, bf16-safe) with v,
    # then scale the small (heads, dim_head, TQ) output — ~N/dim_head fewer VPU muls.
    o = jnp.einsum('hdk,hqk->hdq', vh, p.astype(jnp.bfloat16),
                   preferred_element_type=jnp.float32)               # (heads, dim_head, TQ)
    o = (o * jnp.swapaxes(inv_l, 1, 2)).reshape(H, TQ).astype(jnp.bfloat16)

    y = jnp.dot(wout_ref[...], o, preferred_element_type=jnp.float32) + bout_ref[...]
    o_ref[0] = y.astype(o_ref.dtype)                                 # (C, TQ), lane-dense store


def _vmem_capacity_bytes():
    try:
        cap = getattr(pltpu.get_tpu_info(), "vmem_capacity_bytes", None)
        if cap:
            return int(cap)
    except Exception:
        pass
    return 128 * 1024 * 1024


def attention2d(x, g, w_qkv, w_out, b_out, *, heads=4, dim_head=32, q_tile=None):
    """x: (B, C, H, W) NCHW like the PyTorch module; returns (B, C, H, W)."""
    B, C, Hs, Ws = x.shape
    N = Hs * Ws
    hidden = heads * dim_head

    small_vmem = _vmem_capacity_bytes() <= 64 * 1024 * 1024          # e.g. v7x: 64 MiB / TC
    if q_tile is None:
        q_tile = 128 if small_vmem else 256
    tq = min(q_tile, N)
    assert N % tq == 0, "spatial size must be divisible by the query tile"

    # Channel-major layout: spatial axis N stays on the lane dim, so every load/store
    # is lane-dense even for tiny C; wrapper does reshapes only (no HBM transposes).
    xs = x.reshape(B, C, N).astype(jnp.bfloat16)                     # bf16 halves HBM read
    g2 = g.reshape(C, 1).astype(jnp.float32)
    b2 = b_out.reshape(C, 1).astype(jnp.float32)
    wqkv2 = w_qkv.reshape(3 * hidden, C).astype(jnp.bfloat16)        # 1x1 conv weight
    wout2 = w_out.reshape(C, hidden).astype(jnp.bfloat16)

    kernel = functools.partial(attention2d_kernel, heads=heads, dim_head=dim_head)
    out = pl.pallas_call(
        kernel,
        out_shape=jax.ShapeDtypeStruct((B, C, N), x.dtype),
        grid_spec=pltpu.PrefetchScalarGridSpec(
            num_scalar_prefetch=0,
            grid=(B, N // tq),
            in_specs=[
                pl.BlockSpec((1, C, N), lambda b, q: (b, 0, 0)),     # x — resident per batch
                pl.BlockSpec((C, 1), lambda b, q: (0, 0)),           # RMSNorm g
                pl.BlockSpec((3 * hidden, C), lambda b, q: (0, 0)),  # W_qkv (3H, C)
                pl.BlockSpec((C, hidden), lambda b, q: (0, 0)),      # W_out (C, hidden)
                pl.BlockSpec((C, 1), lambda b, q: (0, 0)),           # bias
            ],
            out_specs=pl.BlockSpec((1, C, tq), lambda b, q: (b, 0, q)),
            scratch_shapes=[pltpu.VMEM((3, heads, dim_head, N), jnp.bfloat16)],
        ),
        compiler_params=pltpu.CompilerParams(
            # q axis must be "arbitrary" so the per-batch qkv cache (filled at q==0)
            # stays valid for the following q tiles on the same core.
            dimension_semantics=("parallel", "arbitrary"),
            vmem_limit_bytes=(40 if small_vmem else 80) * 1024 * 1024,
        ),
    )(xs, g2, wqkv2, wout2, b2)
    return out.reshape(B, C, Hs, Ws)


def attention2d_reference(x, g, w_qkv, w_out, b_out, *, heads=4, dim_head=32):
    """Pure-JAX reference matching the PyTorch module semantics."""
    B, C, Hs, Ws = x.shape
    N = Hs * Ws
    hidden = heads * dim_head
    nrm = jnp.sqrt(jnp.sum(x * x, axis=1, keepdims=True))
    xn = x / jnp.maximum(nrm, 1e-12) * g.reshape(1, C, 1, 1) * jnp.sqrt(jnp.float32(C))
    qkv = jnp.einsum('oc,bchw->bohw', w_qkv.reshape(3 * hidden, C), xn,
                     precision='highest')
    q, k, v = jnp.split(qkv, 3, axis=1)

    def to_heads(t):   # 'b (h c) x y -> b h (x y) c'
        return t.reshape(B, heads, dim_head, N).transpose(0, 1, 3, 2)

    q, k, v = map(to_heads, (q, k, v))
    sim = jnp.einsum('bhnd,bhmd->bhnm', q, k, precision='highest') * dim_head ** -0.5
    attn = jax.nn.softmax(sim, axis=-1)
    o = jnp.einsum('bhnm,bhmd->bhnd', attn, v, precision='highest')
    o = o.transpose(0, 1, 3, 2).reshape(B, hidden, Hs, Ws)   # 'b h (x y) d -> b (h d) x y'
    return jnp.einsum('oc,bchw->bohw', w_out.reshape(C, hidden), o,
                      precision='highest') + b_out.reshape(1, C, 1, 1)


if __name__ == "__main__":
    B, C, Hs, Ws = 2, 4, 16, 16
    heads, dim_head = 4, 32
    hidden = heads * dim_head

    key = jax.random.PRNGKey(0)
    kx, kq, ko, kb = jax.random.split(key, 4)

    x = jax.random.normal(kx, (B, C, Hs, Ws), dtype=jnp.float32)
    # Deterministic parameter init consistent with the module's shapes:
    g = jnp.ones((C,), dtype=jnp.float32)                                    # RMSNorm.g init = ones
    w_qkv = 0.1 * jax.random.normal(kq, (3 * hidden, C, 1, 1), jnp.float32)  # Conv2d(dim, 3*hidden, 1, bias=False)
    w_out = 0.1 * jax.random.normal(ko, (C, hidden, 1, 1), jnp.float32)      # Conv2d(hidden, dim, 1)
    b_out = 0.1 * jax.random.normal(kb, (C,), jnp.float32)

    y = attention2d(x, g, w_qkv, w_out, b_out, heads=heads, dim_head=dim_head)
    jax.block_until_ready(y)

    y_ref = attention2d_reference(x, g, w_qkv, w_out, b_out, heads=heads, dim_head=dim_head)
    assert y.shape == (B, C, Hs, Ws)
    assert jnp.allclose(y, y_ref, atol=1e-2, rtol=1e-2), "mismatch vs reference"

    print("KERNEL_OK")
</pallas_src>

<mosaic_0001>
module attributes {stable_mosaic.version = 11 : i64} {
  func.func @attention2d_kernel(%arg0: i32, %arg1: i32, %arg2: memref<1x4x256xbf16, #tpu.memory_space<vmem>>, %arg3: memref<4x1xf32, #tpu.memory_space<vmem>>, %arg4: memref<384x4xbf16, #tpu.memory_space<vmem>>, %arg5: memref<4x128xbf16, #tpu.memory_space<vmem>>, %arg6: memref<4x1xf32, #tpu.memory_space<vmem>>, %arg7: memref<1x4x256xf32, #tpu.memory_space<vmem>>, %arg8: memref<3x4x32x256xbf16, #tpu.memory_space<vmem>>) attributes {dimension_semantics = [#tpu.dimension_semantics<parallel>, #tpu.dimension_semantics<arbitrary>], iteration_bounds = array<i64: 2, 1>, scalar_prefetch = 0 : i64, scratch_operands = 1 : i64, tpu.core_type = #tpu.core_type<tc>, window_params = [{transform_indices = @transform_0, window_bounds = array<i64: 1, 4, 256>}, {pipeline_mode = #tpu.pipeline_mode<synchronous>, transform_indices = @transform_1, window_bounds = array<i64: 4, 1>}, {pipeline_mode = #tpu.pipeline_mode<synchronous>, transform_indices = @transform_2, window_bounds = array<i64: 384, 4>}, {pipeline_mode = #tpu.pipeline_mode<synchronous>, transform_indices = @transform_3, window_bounds = array<i64: 4, 128>}, {pipeline_mode = #tpu.pipeline_mode<synchronous>, transform_indices = @transform_4, window_bounds = array<i64: 4, 1>}, {transform_indices = @transform_5, window_bounds = array<i64: 1, 4, 256>}]} {
    %c0_i32 = arith.constant 0 : i32
    %0 = arith.cmpi eq, %arg1, %c0_i32 : i32
    %1 = arith.extui %0 : i1 to i32
    %c0_i32_0 = arith.constant 0 : i32
    %2 = arith.cmpi ne, %1, %c0_i32_0 : i32
    scf.if %2 {
      %c0_20 = arith.constant 0 : index
      %c0_21 = arith.constant 0 : index
      %c0_22 = arith.constant 0 : index
      %36 = vector.load %arg2[%c0_20, %c0_21, %c0_22] : memref<1x4x256xbf16, #tpu.memory_space<vmem>>, vector<1x4x256xbf16>
      %37 = vector.shape_cast %36 : vector<1x4x256xbf16> to vector<4x256xbf16>
      %38 = arith.extf %37 : vector<4x256xbf16> to vector<4x256xf32>
      %39 = arith.mulf %38, %38 : vector<4x256xf32>
      %cst_23 = arith.constant dense<0.000000e+00> : vector<256xf32>
      %40 = vector.multi_reduction <add>, %39, %cst_23 [0] : vector<4x256xf32> to vector<256xf32>
      %41 = vector.shape_cast %40 : vector<256xf32> to vector<1x256xf32>
      %cst_24 = arith.constant 1.000000e-24 : f32
      %42 = vector.broadcast %cst_24 : f32 to vector<1x256xf32>
      %43 = arith.maximumf %41, %42 : vector<1x256xf32>
      %44 = math.rsqrt %43 : vector<1x256xf32>
      %c0_25 = arith.constant 0 : index
      %c0_26 = arith.constant 0 : index
      %45 = vector.load %arg3[%c0_25, %c0_26] : memref<4x1xf32, #tpu.memory_space<vmem>>, vector<4x1xf32>
      %cst_27 = arith.constant 4.000000e+00 : f32
      %46 = math.sqrt %cst_27 : f32
      %47 = vector.broadcast %46 : f32 to vector<4x1xf32>
      %48 = arith.mulf %45, %47 : vector<4x1xf32>
      %49 = vector.broadcast %44 : vector<1x256xf32> to vector<4x256xf32>
      %50 = arith.mulf %38, %49 : vector<4x256xf32>
      %51 = vector.broadcast %48 : vector<4x1xf32> to vector<4x256xf32>
      %52 = arith.mulf %50, %51 : vector<4x256xf32>
      %53 = arith.truncf %52 : vector<4x256xf32> to vector<4x256xbf16>
      %c0_28 = arith.constant 0 : index
      %c0_29 = arith.constant 0 : index
      %54 = vector.load %arg4[%c0_28, %c0_29] : memref<384x4xbf16, #tpu.memory_space<vmem>>, vector<384x4xbf16>
      %cst_30 = arith.constant dense<0.000000e+00> : vector<384x256xf32>
      %55 = tpu.matmul %54, %53, %cst_30 {dimension_numbers = #tpu.dot_dimension_numbers<[1], [0], [0], [1], [0, 0, 1, 1], [], []>} : vector<384x4xbf16>, vector<4x256xbf16>, vector<384x256xf32> -> vector<384x256xf32>
      %cst_31 = arith.constant 3.200000e+01 : f32
      %cst_32 = arith.constant -5.000000e-01 : f32
      %56 = math.powf %cst_31, %cst_32 : f32
      %57 = vector.extract_strided_slice %55 {offsets = [0, 0], sizes = [128, 256], strides = [1, 1]} : vector<384x256xf32> to vector<128x256xf32>
      %58 = vector.broadcast %56 : f32 to vector<128x256xf32>
      %59 = arith.mulf %57, %58 : vector<128x256xf32>
      %60 = arith.truncf %59 : vector<128x256xf32> to vector<128x256xbf16>
      %61 = vector.shape_cast %60 : vector<128x256xbf16> to vector<4x32x256xbf16>
      %c0_33 = arith.constant 0 : index
      %c0_34 = arith.constant 0 : index
      %c0_35 = arith.constant 0 : index
      %c0_36 = arith.constant 0 : index
      %62 = vector.load %arg8[%c0_33, %c0_34, %c0_35, %c0_36] : memref<3x4x32x256xbf16, #tpu.memory_space<vmem>>, vector<1x4x32x256xbf16>
      %63 = vector.shape_cast %62 : vector<1x4x32x256xbf16> to vector<4x32x256xbf16>
      %64 = vector.shape_cast %61 : vector<4x32x256xbf16> to vector<1x4x32x256xbf16>
      tpu.vector_store %arg8[%c0_33, %c0_34, %c0_35, %c0_36], %64 {strides = array<i32>} : memref<3x4x32x256xbf16, #tpu.memory_space<vmem>>, vector<1x4x32x256xbf16>,
      %65 = vector.extract_strided_slice %55 {offsets = [128, 0], sizes = [128, 256], strides = [1, 1]} : vector<384x256xf32> to vector<128x256xf32>
      %66 = arith.truncf %65 : vector<128x256xf32> to vector<128x256xbf16>
      %67 = vector.shape_cast %66 : vector<128x256xbf16> to vector<4x32x256xbf16>
      %c1_37 = arith.constant 1 : index
      %c0_38 = arith.constant 0 : index
      %c0_39 = arith.constant 0 : index
      %c0_40 = arith.constant 0 : index
      %68 = vector.load %arg8[%c1_37, %c0_38, %c0_39, %c0_40] : memref<3x4x32x256xbf16, #tpu.memory_space<vmem>>, vector<1x4x32x256xbf16>
      %69 = vector.shape_cast %68 : vector<1x4x32x256xbf16> to vector<4x32x256xbf16>
      %70 = vector.shape_cast %67 : vector<4x32x256xbf16> to vector<1x4x32x256xbf16>
      tpu.vector_store %arg8[%c1_37, %c0_38, %c0_39, %c0_40], %70 {strides = array<i32>} : memref<3x4x32x256xbf16, #tpu.memory_space<vmem>>, vector<1x4x32x256xbf16>,
      %71 = vector.extract_strided_slice %55 {offsets = [256, 0], sizes = [128, 256], strides = [1, 1]} : vector<384x256xf32> to vector<128x256xf32>
      %72 = arith.truncf %71 : vector<128x256xf32> to vector<128x256xbf16>
      %73 = vector.shape_cast %72 : vector<128x256xbf16> to vector<4x32x256xbf16>
      %c2_41 = arith.constant 2 : index
      %c0_42 = arith.constant 0 : index
      %c0_43 = arith.constant 0 : index
      %c0_44 = arith.constant 0 : index
      %74 = vector.load %arg8[%c2_41, %c0_42, %c0_43, %c0_44] : memref<3x4x32x256xbf16, #tpu.memory_space<vmem>>, vector<1x4x32x256xbf16>
      %75 = vector.shape_cast %74 : vector<1x4x32x256xbf16> to vector<4x32x256xbf16>
      %76 = vector.shape_cast %73 : vector<4x32x256xbf16> to vector<1x4x32x256xbf16>
      tpu.vector_store %arg8[%c2_41, %c0_42, %c0_43, %c0_44], %76 {strides = array<i32>} : memref<3x4x32x256xbf16, #tpu.memory_space<vmem>>, vector<1x4x32x256xbf16>,
    } else {
    }
    %c256_i32 = arith.constant 256 : i32
    %3 = arith.muli %arg1, %c256_i32 : i32
    %4 = tpu.assume_multiple %3, 256 : i32
    %c0 = arith.constant 0 : index
    %c0_1 = arith.constant 0 : index
    %c0_2 = arith.constant 0 : index
    %5 = arith.index_cast %4 : i32 to index
    %6 = vector.load %arg8[%c0, %c0_1, %c0_2, %5] : memref<3x4x32x256xbf16, #tpu.memory_space<vmem>>, vector<1x4x32x256xbf16>
    %7 = vector.shape_cast %6 : vector<1x4x32x256xbf16> to vector<4x32x256xbf16>
    %c1 = arith.constant 1 : index
    %c0_3 = arith.constant 0 : index
    %c0_4 = arith.constant 0 : index
    %c0_5 = arith.constant 0 : index
    %8 = vector.load %arg8[%c1, %c0_3, %c0_4, %c0_5] : memref<3x4x32x256xbf16, #tpu.memory_space<vmem>>, vector<1x4x32x256xbf16>
    %9 = vector.shape_cast %8 : vector<1x4x32x256xbf16> to vector<4x32x256xbf16>
    %c2 = arith.constant 2 : index
    %c0_6 = arith.constant 0 : index
    %c0_7 = arith.constant 0 : index
    %c0_8 = arith.constant 0 : index
    %10 = vector.load %arg8[%c2, %c0_6, %c0_7, %c0_8] : memref<3x4x32x256xbf16, #tpu.memory_space<vmem>>, vector<1x4x32x256xbf16>
    %11 = vector.shape_cast %10 : vector<1x4x32x256xbf16> to vector<4x32x256xbf16>
    "tpu.trace_start"() <{level = 10 : i32, message = "hdq,hdk->hqk"}> : () -> ()
    %cst = arith.constant dense<0.000000e+00> : vector<4x256x256xf32>
    %12 = tpu.matmul %7, %9, %cst {dimension_numbers = #tpu.dot_dimension_numbers<[1], [1], [2], [2], [0, 0, 0, 2, 1, 2], [0], [0]>} : vector<4x32x256xbf16>, vector<4x32x256xbf16>, vector<4x256x256xf32> -> vector<4x256x256xf32>
    "tpu.trace_stop"() : () -> ()
    %cst_9 = arith.constant dense<0xFF800000> : vector<4x256xf32>
    %13 = vector.multi_reduction <maximumf>, %12, %cst_9 [2] : vector<4x256x256xf32> to vector<4x256xf32>
    %14 = vector.shape_cast %13 : vector<4x256xf32> to vector<4x256x1xf32>
    %15 = vector.broadcast %14 : vector<4x256x1xf32> to vector<4x256x256xf32>
    %16 = arith.subf %12, %15 : vector<4x256x256xf32>
    %17 = math.exp %16 : vector<4x256x256xf32>
    %cst_10 = arith.constant dense<0.000000e+00> : vector<4x256xf32>
    %18 = vector.multi_reduction <add>, %17, %cst_10 [2] : vector<4x256x256xf32> to vector<4x256xf32>
    %19 = vector.shape_cast %18 : vector<4x256xf32> to vector<4x256x1xf32>
    %20 = tpu.reciprocal %19 {approx = true} : vector<4x256x1xf32> -> vector<4x256x1xf32>
    %21 = arith.truncf %17 : vector<4x256x256xf32> to vector<4x256x256xbf16>
    "tpu.trace_start"() <{level = 10 : i32, message = "hdk,hqk->hdq"}> : () -> ()
    %cst_11 = arith.constant dense<0.000000e+00> : vector<4x32x256xf32>
    %22 = tpu.matmul %11, %21, %cst_11 {dimension_numbers = #tpu.dot_dimension_numbers<[2], [2], [1], [1], [0, 0, 0, 1, 1, 1], [0], [0]>} : vector<4x32x256xbf16>, vector<4x256x256xbf16>, vector<4x32x256xf32> -> vector<4x32x256xf32>
    "tpu.trace_stop"() : () -> ()
    %23 = tpu.transpose %20, [0, 2, 1] : vector<4x256x1xf32> -> vector<4x1x256xf32>
    %24 = vector.broadcast %23 : vector<4x1x256xf32> to vector<4x32x256xf32>
    %25 = arith.mulf %22, %24 : vector<4x32x256xf32>
    %26 = vector.shape_cast %25 : vector<4x32x256xf32> to vector<128x256xf32>
    %27 = arith.truncf %26 : vector<128x256xf32> to vector<128x256xbf16>
    %c0_12 = arith.constant 0 : index
    %c0_13 = arith.constant 0 : index
    %28 = vector.load %arg5[%c0_12, %c0_13] : memref<4x128xbf16, #tpu.memory_space<vmem>>, vector<4x128xbf16>
    %cst_14 = arith.constant dense<0.000000e+00> : vector<4x256xf32>
    %29 = tpu.matmul %28, %27, %cst_14 {dimension_numbers = #tpu.dot_dimension_numbers<[1], [0], [0], [1], [0, 0, 1, 1], [], []>} : vector<4x128xbf16>, vector<128x256xbf16>, vector<4x256xf32> -> vector<4x256xf32>
    %c0_15 = arith.constant 0 : index
    %c0_16 = arith.constant 0 : index
    %30 = vector.load %arg6[%c0_15, %c0_16] : memref<4x1xf32, #tpu.memory_space<vmem>>, vector<4x1xf32>
    %31 = vector.broadcast %30 : vector<4x1xf32> to vector<4x256xf32>
    %32 = arith.addf %29, %31 : vector<4x256xf32>
    %c0_17 = arith.constant 0 : index
    %c0_18 = arith.constant 0 : index
    %c0_19 = arith.constant 0 : index
    %33 = vector.load %arg7[%c0_17, %c0_18, %c0_19] : memref<1x4x256xf32, #tpu.memory_space<vmem>>, vector<1x4x256xf32>
    %34 = vector.shape_cast %33 : vector<1x4x256xf32> to vector<4x256xf32>
    %35 = vector.shape_cast %32 : vector<4x256xf32> to vector<1x4x256xf32>
    tpu.vector_store %arg7[%c0_17, %c0_18, %c0_19], %35 {strides = array<i32>} : memref<1x4x256xf32, #tpu.memory_space<vmem>>, vector<1x4x256xf32>,
    return
  }
  func.func @transform_0(%arg0: i32, %arg1: i32) -> (i32, i32, i32) {
    %c0_i32 = arith.constant 0 : i32
    %c0_i32_0 = arith.constant 0 : i32
    %c0_i32_1 = arith.constant 0 : i32
    return %arg0, %c0_i32, %c0_i32_0 : i32, i32, i32
  }
  func.func @transform_1(%arg0: i32, %arg1: i32) -> (i32, i32) {
    %c0_i32 = arith.constant 0 : i32
    %c0_i32_0 = arith.constant 0 : i32
    %c0_i32_1 = arith.constant 0 : i32
    return %c0_i32, %c0_i32_0 : i32, i32
  }
  func.func @transform_2(%arg0: i32, %arg1: i32) -> (i32, i32) {
    %c0_i32 = arith.constant 0 : i32
    %c0_i32_0 = arith.constant 0 : i32
    %c0_i32_1 = arith.constant 0 : i32
    return %c0_i32, %c0_i32_0 : i32, i32
  }
  func.func @transform_3(%arg0: i32, %arg1: i32) -> (i32, i32) {
    %c0_i32 = arith.constant 0 : i32
    %c0_i32_0 = arith.constant 0 : i32
    %c0_i32_1 = arith.constant 0 : i32
    return %c0_i32, %c0_i32_0 : i32, i32
  }
  func.func @transform_4(%arg0: i32, %arg1: i32) -> (i32, i32) {
    %c0_i32 = arith.constant 0 : i32
    %c0_i32_0 = arith.constant 0 : i32
    %c0_i32_1 = arith.constant 0 : i32
    return %c0_i32, %c0_i32_0 : i32, i32
  }
  func.func @transform_5(%arg0: i32, %arg1: i32) -> (i32, i32, i32) {
    %c0_i32 = arith.constant 0 : i32
    %c0_i32_0 = arith.constant 0 : i32
    return %arg0, %c0_i32, %arg1 : i32, i32, i32
  }
}

</mosaic_0001>

<bundles_post_ra>
// kernel: tpu_custom_call.1
= control target key start
LH: loop header
LB: loop body
LE: loop exit
PB: predicated region body
PF: predicated region fallthrough
CT: control target
= control target key end

     0   :  { %10 = vsyncpa [#allocation4], 0  ;;  %s9335_s0 = inlined_call_operand.hbm [shape: bf16[2,4,256], index: 0, kind: input, shape index: {}]   ;;  %s9336_s1 = inlined_call_operand.hbm [shape: f32[4,1], index: 1, kind: input, shape index: {}]   ;;  %s9337_s2 = inlined_call_operand.hbm [shape: bf16[384,4], index: 2, kind: input, shape index: {}]   ;;  %s9338_s3 = inlined_call_operand.hbm [shape: bf16[4,128], index: 3, kind: input, shape index: {}]   ;;  %s9339_s4 = inlined_call_operand.hbm [shape: f32[4,1], index: 4, kind: input, shape index: {}]   ;;  %s9340_s5 = inlined_call_operand.hbm [shape: f32[2,4,256], index: 5, kind: output, shape index: {}]  }
   0x1   :  { %12 = vsyncpa [#allocation4 + $0x1], 0 }
   0x2   :  { %13 = vsyncpa [#allocation7], 0 }
   0x3   :  { %14 = vsyncpa [#allocation10], 0 }
   0x4   :  { %15 = vsyncpa [#allocation5], 0 }
   0x5   :  { %17 = vsyncpa [#allocation5 + $0x1], 0  ;;  %s6013_s18 = smov 0   ;;  %s6015_s19 = smov 0  }
   0x6   :  { %s6017_s20 = smov 0   ;;  %s6019_s21 = smov 0  }
   0x7   :  { %s6021_s22 = smov 0   ;;  %s6023_s23 = smov 0  }
   0x8 LB: > { %s4693_s24 = sadd.s32 4294967295, %s5971_s23   ;;  %p4695_p0 = scmp.ge.s32.totalorder %s5971_s23, 1  ;;  %s5971_s23 = sphi %s6023_s23, %s23_s23   ;;  %s5967_s22 = sphi %s6021_s22, %s10589_s22   ;;  %s5963_s21 = sphi %s6019_s21, %s10588_s21   ;;  %s5959_s20 = sphi %s6017_s20, %s10587_s20   ;;  %s5955_s19 = sphi %s6015_s19, %s10586_s19   ;;  %s5951_s18 = sphi %s6013_s18, %s10585_s18  }
   0x9   : > { %p6047_p1 = scmp.eq.s32.totalorder %s4693_s24, 0  ;;  %p178_p2 = scmp.lt.s32.totalorder %s5971_s23, 3 }
   0xa   : > { %s5973_s27 = smov [#allocation6]   ;;  %s5974_s29 = smov [#allocation9]  }
   0xb   : > { %s9683_s25 = scalar_select %p6047_p1, 1, 0 }
   0xc   : > { %p6052_p3 = pnand %p4695_p0, %p178_p2  ;;  %s191_s28 = sshll.u32 %s5973_s27, 4  ;;  %s192_s28 = int_to_ptr.vmem [resolvable:$true] %s191_s28 }
   0xd   : > { %s215_s30 = sshll.u32 %s5974_s29, 4  ;;  %s5975_s7 = smov [#allocation8]   ;;  %s6065_s30 = int_to_ptr.vmem [resolvable:$true] %s215_s30 }
   0xe   : > { %s9684_s26 = scalar_select %p6052_p3, 1, 0 }
   0xf   : > { %p4855_p5 = pneg %p6052_p3  ;;  %s201_s8 = sshll.u32 %s5975_s7, 4  ;;  %s6067_s8 = int_to_ptr.vmem [resolvable:$true] %s201_s8 }
  0x10   : > { %s5739_s11 = scalar_lea.hbm %s9336_s1, 64 }
  0x11   : > { %p6061_p6 = pnand %p4855_p5, %p6047_p1  ;;  %p5740_p7 = scmp.ne.s32.totalorder %s9336_s1, %s5739_s11 }
  0x12   : > { %p5746_p11 = scmp.lt.u32.totalorder %s5739_s11, %s9336_s1 }
  0x13   : > { %p6077_p8 = pneg %p6061_p6 }
  0x15   : > { %p5742_p9 = pnand %p6077_p8, %p5740_p7 }
  0x17   : > { %p5743_p10 = pneg %p5742_p9 }
  0x19   : > { %p5748_p12 = pnand %p5746_p11, %p5743_p10 }
  0x1b   : > { %5751 = shalt.err (!%p5748_p12)
}
  0x1c   : > { %s5752_s17 = scalar_lea.vmem %s192_s28, 64  ;;  %p5760_p5 = scmp.lt.s32.totalorder %s192_s28, %s192_s28 }
  0x1d   : > { %p5753_p13 = scmp.ne.s32.totalorder %s192_s28, %s5752_s17  ;;  %p5761_p4 = scmp.lt.s32.totalorder %s5752_s17, %s5752_s17 }
  0x1f   : > { %p5755_p0 = pnand %p5753_p13, %p6077_p8  ;;  %p5762_p3 = por %p5761_p4, %p5760_p5 }
  0x21   : > { %p5756_p2 = pneg %p5755_p0 }
  0x23   : > { %p5763_p1 = pnand %p5762_p3, %p5756_p2 }
  0x25   : > { %5766 = shalt.err (!%p5763_p1)
}
  0x26   : > { %4858 = dma.hbm_to_vmem [thread:$0]  (!%p6061_p6), %s9336_s1, 64, %s192_s28, [#allocation7]  }
  0x27   : > { %s5767_s10 = scalar_lea.hbm %s9338_s3, 32 }
  0x28   : > { %p5768_p7 = scmp.ne.s32.totalorder %s9338_s3, %s5767_s10  ;;  %p5774_p1 = scmp.lt.u32.totalorder %s5767_s10, %s9338_s3 }
  0x2a   : > { %p5770_p9 = pnand %p5768_p7, %p6077_p8 }
  0x2c   : > { %p5771_p4 = pneg %p5770_p9 }
  0x2e   : > { %p5776_p3 = pnand %p5774_p1, %p5771_p4 }
  0x30   : > { %5779 = shalt.err (!%p5776_p3)
}
  0x31   : > { %s5780_s28 = scalar_lea.vmem %s6065_s30, 32  ;;  %p5788_p13 = scmp.lt.s32.totalorder %s6065_s30, %s6065_s30 }
  0x32   : > { %p5781_p10 = scmp.ne.s32.totalorder %s6065_s30, %s5780_s28  ;;  %p5789_p0 = scmp.lt.s32.totalorder %s5780_s28, %s5780_s28 }
  0x34   : > { %p5783_p11 = pnand %p5781_p10, %p6077_p8  ;;  %p5790_p2 = por %p5789_p0, %p5788_p13 }
  0x36   : > { %p5784_p12 = pneg %p5783_p11 }
  0x38   : > { %p5791_p5 = pnand %p5790_p2, %p5784_p12 }
  0x3a   : > { %5794 = shalt.err (!%p5791_p5)
}
  0x3b   : > { %4864 = dma.hbm_to_vmem [thread:$0]  (!%p6061_p6), %s9338_s3, 32, %s6065_s30, [#allocation10]  }
  0x3c   : > { %s5795_s7 = scalar_lea.hbm %s9337_s2, 3072 }
  0x3d   : > { %p5796_p7 = scmp.ne.s32.totalorder %s9337_s2, %s5795_s7  ;;  %p5802_p1 = scmp.lt.u32.totalorder %s5795_s7, %s9337_s2 }
  0x3f   : > { %p5798_p9 = pnand %p5796_p7, %p6077_p8 }
  0x41   : > { %p5799_p4 = pneg %p5798_p9 }
  0x43   : > { %p5804_p3 = pnand %p5802_p1, %p5799_p4 }
  0x45   : > { %5807 = shalt.err (!%p5804_p3)
}
  0x46   : > { %s5808_s30 = scalar_lea.vmem %s6067_s8, 3072  ;;  %p5816_p13 = scmp.lt.s32.totalorder %s6067_s8, %s6067_s8 }
  0x47   : > { %p5809_p10 = scmp.ne.s32.totalorder %s6067_s8, %s5808_s30  ;;  %p5817_p0 = scmp.lt.s32.totalorder %s5808_s30, %s5808_s30 }
  0x49   : > { %p5811_p11 = pnand %p5809_p10, %p6077_p8  ;;  %p5818_p2 = por %p5817_p0, %p5816_p13 }
  0x4b   : > { %p5812_p12 = pneg %p5811_p11 }
  0x4d   : > { %p5819_p5 = pnand %p5818_p2, %p5812_p12 }
  0x4f   : > { %5822 = shalt.err (!%p5819_p5)
}
  0x50   : > { %s5976_s13 = smov 64   ;;  %s5977_s15 = smov 4  }
  0x51   : > { %4861 = dma.hbm_to_vmem [thread:$0]  (!%p6061_p6), %s9337_s2, 3072, %s6067_s8, [#allocation7], %s5976_s13, %s5976_s13, %s5977_s15  }
  0x52   : > { %s5978_s17 = smov [#allocation11]   ;;  %s5823_s9 = scalar_lea.hbm %s9339_s4, 64 }
  0x53   : > { %s226_s27 = sshll.u32 %s5978_s17, 4  ;;  %p5824_p7 = scmp.ne.s32.totalorder %s9339_s4, %s5823_s9  ;;  %s227_s27 = int_to_ptr.vmem [resolvable:$true] %s226_s27 }
  0x54   : > { %p5830_p1 = scmp.lt.u32.totalorder %s5823_s9, %s9339_s4 }
  0x55   : > { %p5826_p9 = pnand %p5824_p7, %p6077_p8 }
  0x57   : > { %p5827_p4 = pneg %p5826_p9 }
  0x59   : > { %p5832_p3 = pnand %p5830_p1, %p5827_p4 }
  0x5b   : > { %5835 = shalt.err (!%p5832_p3)
}
  0x5c   : > { %s5836_s8 = scalar_lea.vmem %s227_s27, 64  ;;  %p5844_p13 = scmp.lt.s32.totalorder %s227_s27, %s227_s27 }
  0x5d   : > { %p5837_p10 = scmp.ne.s32.totalorder %s227_s27, %s5836_s8  ;;  %p5845_p0 = scmp.lt.s32.totalorder %s5836_s8, %s5836_s8 }
  0x5f   : > { %p5839_p11 = pnand %p5837_p10, %p6077_p8  ;;  %p5846_p2 = por %p5845_p0, %p5844_p13 }
  0x61   : > { %p5840_p12 = pneg %p5839_p11 }
  0x63   : > { %p5847_p5 = pnand %p5846_p2, %p5840_p12 }
  0x65   : > { %5850 = shalt.err (!%p5847_p5)
}
  0x66   : > { %4867 = dma.hbm_to_vmem [thread:$0]  (!%p6061_p6), %s9339_s4, 64, %s227_s27, [#allocation10]  }
  0x67   : > { %s4694_s14 = sadd.s32 4294967294, %s5971_s23   ;;  %s35_s28 = sadd.s32 1, %s5967_s22 }
  0x68   : > { %p37_p8 = scmp.ge.s32.totalorder %s35_s28, 2  ;;  %s42_s6 = sadd.s32 1, %s5959_s20 }
  0x69   : > { %p49_p7 = scmp.ne.s32.totalorder %s5959_s20, %s5955_s19  ;;  %p50_p9 = scmp.eq.s32.totalorder %s5971_s23, 0 }
  0x6a   : > { %s10591_s28 = smov (%p37_p8, %s35_s28), 0  ;;  %p55_p1 = scmp.ne.s32.totalorder %s5955_s19, %s5951_s18 }
  0x6b   : > { %p6165_p4 = por %p50_p9, %p49_p7  ;;  %s39_s17 = ssub.s32 %s5967_s22, %s10591_s28 }
  0x6c   : > { %p165_p6 = scmp.eq.s32.totalorder %s4693_s24, 1  ;;  %p40_p3 = scmp.eq.s32.totalorder %s39_s17, 0 }
  0x6d   : > { %p9688_p10 = scmp.ne.s32.totalorder %s9683_s25, 0  ;;  %p171_p13 = scmp.eq.s32.totalorder %s4694_s14, 1 }
  0x6e   : > { %p6181_p12 = por %p165_p6, %p49_p7  ;;  %p4880_p2 = scmp.lt.s32.totalorder %s5971_s23, 2 }
  0x6f   : > { %p6177_p11 = por %p9688_p10, %p55_p1  ;;  %p6188_p0 = por %p171_p13, %p55_p1 }
  0x70   : > { %s9690_s29 = scalar_select %p6181_p12, 1, 0 }
  0x71   : > { %s6186_s7 = scalar_select %p40_p3, %s5959_s20, %s42_s6  }
  0x72   : > { %s9691_s9 = scalar_select %p6188_p0, 1, 0 }
  0x73   : > { %s237_s10 = sand.u32 1, %s5959_s20   ;;  %s4829_s24 = sshll.u32 %s5967_s22, 6 }
  0x74   : > { %s4701_s11 = sshll.u32 %s237_s10, 2  ;;  %s6198_s8 = scalar_lea.hbm %s9335_s0, %s4829_s24 }
  0x75   : > { %s241_s13 = scalar_lea.vmem [#allocation3], %s4701_s11  ;;  %p6202_p5 = pnand %p4880_p2, %p6165_p4 }
  0x76   : > { %s249_s15 = sshll.u32 %s241_s13, 4  ;;  %s238_s6 = scalar_lea.sflag [#allocation4], %s237_s10  ;;  %s6206_s15 = int_to_ptr.vmem [resolvable:$true] %s249_s15 }
  0x77   : > { %s5851_s17 = scalar_lea.hbm %s6198_s8, 64  ;;  %p5853_p7 = pneg %p6202_p5 }
  0x78   : > { %p5852_p8 = scmp.ne.s32.totalorder %s6198_s8, %s5851_s17  ;;  %s5856_s16 = scalar_lea.hbm %s9335_s0, 128 }
  0x79   : > { %p5857_p4 = scmp.lt.u32.totalorder %s6198_s8, %s9335_s0  ;;  %p5858_p6 = scmp.lt.u32.totalorder %s5856_s16, %s5851_s17 }
  0x7a   : > { %p5854_p9 = pnand %p5853_p7, %p5852_p8  ;;  %p5860_p10 = scmp.lt.u32.totalorder %s5851_s17, %s6198_s8 }
  0x7b   : > { %p5859_p3 = por %p5858_p6, %p5857_p4 }
  0x7c   : > { %p5855_p1 = pneg %p5854_p9 }
  0x7d   : > { %p5861_p13 = por %p5860_p10, %p5859_p3 }
  0x7f   : > { %p5862_p2 = pnand %p5861_p13, %p5855_p1 }
  0x81   : > { %5865 = shalt.err (!%p5862_p2)
}
  0x82   : > { %s5866_s10 = scalar_lea.vmem %s6206_s15, 64  ;;  %s5979_s13 = smov [#allocation3]  }
  0x83   : > { %p5867_p8 = scmp.ne.s32.totalorder %s6206_s15, %s5866_s10  ;;  %s5871_s24 = sshll.u32 %s5979_s13, 4  ;;  %s5872_s24 = int_to_ptr.vmem [resolvable:$false] %s5871_s24 }
  0x84   : > { %s5873_s11 = scalar_lea.vmem %s5872_s24, 128  ;;  %p5874_p12 = scmp.lt.s32.totalorder %s6206_s15, %s5872_s24 }
  0x85   : > { %p5869_p9 = pnand %p5867_p8, %p5853_p7  ;;  %p5875_p4 = scmp.lt.s32.totalorder %s5873_s11, %s5866_s10 }
  0x87   : > { %p5870_p0 = pneg %p5869_p9  ;;  %p5876_p6 = por %p5875_p4, %p5874_p12 }
  0x89   : > { %p5877_p3 = pnand %p5876_p6, %p5870_p0 }
  0x8b   : > { %5880 = shalt.err (!%p5877_p3)
}
  0x8c   : > { %4871 = dma.hbm_to_vmem [thread:$0]  (!%p6202_p5), %s6198_s8, 64, %s6206_s15, %s238_s6  }
  0x8d   : > { %p9693_p1 = scmp.ne.s32.totalorder %s9684_s26, 0 }
  0x8f   : > { %258 = sbr.rel (%p9693_p1) target bundleno = 2289 (0x8f1), region = 40 }
  0x96   : > { %s6236_s17 = sand.u32 1, %s5955_s19  }
  0x97   : > { %s4705_s16 = sshll.u32 %s6236_s17, 2  ;;  %s261_s12 = scalar_lea.sflag [#allocation4], %s6236_s17 }
  0x98   : > { %s264_s30 = scalar_lea.vmem [#allocation3], %s4705_s16 }
  0x99   : > { %5934 = dma.done.wait (%p6177_p11), %s261_s12, 64  }
  0x9a   : > { %5936 = vsyncadd (%p6177_p11), %s261_s12, 4294967232  ;;  %p9694_p12 = scmp.ne.s32.totalorder %s9683_s25, 0 }
  0x9c   : > { %5938 = dma.done.wait (%p9694_p12), [#allocation7], 3136  }
  0x9d   : > { %5940 = vsyncadd (%p9694_p12), [#allocation7], 4294964160 }
  0x9e   : > { %5942 = dma.done.wait (%p9694_p12), [#allocation10], 96  }
  0x9f   : > { %5944 = vsyncadd (%p9694_p12), [#allocation10], 4294967200  ;;  %v9345_v0 = vmov 0   ;;  %v338_v1 = vld [vmem:[#allocation6] sm:$0xf]  ;;  %vm319_vm0 = vcmask 1043456   ;;  %v352_v25 = vlaneseq }
  0xa0   : > { %4942 = vset.pattern.permute.xlu0 %v9345_v0  ;;  %643 = vmatprep.mubr.bf16.mxu0 %v9345_v0  ;;  %v339_v2 = vmul.f32 2.0, %v338_v1  ;;  %v313_v3 = vld [vmem:[%s264_s30] sm:$0xf]  ;;  %v5981_v23 = vmov 839922192   ;;  %vm604_vm1 = vcmask 1041408  }
  0xa1   : > { %1202 = vmatprep.mubr.bf16.mxu1 %v9345_v0  ;;  %v314_v4 = vunpack.c.l.bf16 %v313_v3  ;;  %v350_v24 = vunpack.c.l.s4 %v5981_v23  ;;  %v6255_v29 = vshrl.u32 %v352_v25, 7  ;;  %v4943_v40 = vld [vmem:[#allocation8] sm:$0xff]   ;;  %vm531_vm2 = vcmask 31744   ;;  %v4944_v41 = vld [vmem:[#allocation8 + $0x8] sm:$0xff]   ;;  %v4945_v42 = vld [vmem:[#allocation8 + $0x10] sm:$0xff]   ;;  %s4710_s25 = sshll.u32 %s6236_s17, 3 }
  0xa2   : > { %347 = vperm.xlu0 %4942, %v339_v2   ;;  %v4946_v43 = vld [vmem:[#allocation8 + $0x18] sm:$0xff]   ;;  %v4947_v44 = vld [vmem:[#allocation8 + $0x20] sm:$0xff]   ;;  %v4948_v45 = vld [vmem:[#allocation8 + $0x28] sm:$0xff]   ;;  %vm1101_vm3 = vcmask 261120   ;;  %s4830_s26 = sshll.u32 %s5963_s21, 7  ;;  %s306_s27 = scalar_lea.vmem [#allocation12], %s4710_s25 }
  0xa3   : > { %v315_v5 = vmul.f32 %v314_v4, %v314_v4  ;;  %v351_v28 = vunpack.c.0.s8 %v350_v24  ;;  %9695 = vst [vmem:[#allocation17_spill] sm:$0xff] %v6255_v29  ;;  %v4949_v46 = vld [vmem:[#allocation8 + $0x30] sm:$0xff]   ;;  %v4950_v47 = vld [vmem:[#allocation8 + $0x38] sm:$0xff]   ;;  %v4951_v48 = vld [vmem:[#allocation8 + $0x40] sm:$0xff]   ;;  %s4572_s8 = sshll.u32 %s306_s27, 4  ;;  %s9286_s6 = scalar_lea.hbm %s9340_s5, %s4830_s26  ;;  %s9288_s8 = int_to_ptr.vmem [resolvable:$true] %s4572_s8 }
  0xa4   : > { %v4952_v49 = vld [vmem:[#allocation8 + $0x48] sm:$0xff]   ;;  %v4953_v50 = vld [vmem:[#allocation8 + $0x50] sm:$0xff]   ;;  %v4954_v51 = vld [vmem:[#allocation8 + $0x58] sm:$0xff]   ;;  %s4556_s10 = scalar_lea.sflag [#allocation5], %s6236_s17  ;;  %s5881_s13 = scalar_lea.vmem %s9288_s8, 128 }
  0xa5   : > { %v317_v6 = vcombine.high %v315_v5, %v315_v5  ;;  %v320_v7 = vsel %vm319_vm0, %v315_v5, 0.0  ;;  %v354_v31 = vsub.s32 %v351_v28, %v6255_v29  ;;  %v4955_v52 = vld [vmem:[#allocation8 + $0x60] sm:$0xff]   ;;  %v4956_v53 = vld [vmem:[#allocation8 + $0x68] sm:$0xff]   ;;  %v4957_v54 = vld [vmem:[#allocation8 + $0x70] sm:$0xff]   ;;  %v9724_v29 = vmov 0   ;;  %p5882_p11 = scmp.ne.s32.totalorder %s9288_s8, %s5881_s13  ;;  %p10582_p0 = scmp.ne.s32.totalorder %s9690_s29, 0 }
  0xa6   : > { %v321_v9 = vrot.slane %v320_v7, 4  ;;  %v4958_v55 = vld [vmem:[#allocation8 + $0x78] sm:$0xff]   ;;  %v4959_v56 = vld [vmem:[#allocation8 + $0x80] sm:$0xff]   ;;  %v4960_v57 = vld [vmem:[#allocation8 + $0x88] sm:$0xff]   ;;  %s5982_s21 = smov [#allocation12]  }
  0xa7   : > { %v327_v8 = vsel %vm319_vm0, %v317_v6, 0.0  ;;  %v4961_v58 = vld [vmem:[#allocation8 + $0x90] sm:$0xff]   ;;  %v4962_v59 = vld [vmem:[#allocation8 + $0x98] sm:$0xff]   ;;  %v4963_v60 = vld [vmem:[#allocation8 + $0xa0] sm:$0xff]   ;;  %p5883_p5 = pnand %p5882_p11, %p10582_p0  ;;  %s5885_s24 = sshll.u32 %s5982_s21, 4  ;;  %s5886_s24 = int_to_ptr.vmem [resolvable:$false] %s5885_s24 }
  0xa8   : > { %v328_v10 = vrot.slane %v327_v8, 4  ;;  %v322_v11 = vadd.f32 %v321_v9, %v320_v7  ;;  %v4964_v61 = vld [vmem:[#allocation8 + $0xa8] sm:$0xff]   ;;  %v4965_v62 = vld [vmem:[#allocation8 + $0xb0] sm:$0xff]   ;;  %v4966_v63 = vld [vmem:[#allocation8 + $0xb8] sm:$0xff]   ;;  %s5887_s11 = scalar_lea.vmem %s5886_s24, 256  ;;  %p5888_p10 = scmp.lt.s32.totalorder %s9288_s8, %s5886_s24 }
  0xa9   : > { %p5884_p7 = pneg %p5883_p5  ;;  %p5889_p13 = scmp.lt.s32.totalorder %s5887_s11, %s5881_s13 }
  0xaa   : > { %v329_v12 = vadd.f32 %v328_v10, %v327_v8  ;;  %v323_v13 = vrot.slane %v322_v11, 2 }
  0xab   : > { %p5890_p2 = por %p5889_p13, %p5888_p10 }
  0xac   : > { %v330_v14 = vrot.slane %v329_v12, 2  ;;  %v324_v15 = vadd.f32 %v323_v13, %v322_v11 }
  0xad   : > { %p5891_p8 = pnand %p5890_p2, %p5884_p7 }
  0xae   : > { %v331_v16 = vadd.f32 %v330_v14, %v329_v12  ;;  %v325_v17 = vrot.slane %v324_v15, 1 }
  0xb0   : > { %v332_v18 = vrot.slane %v331_v16, 1  ;;  %v326_v19 = vadd.f32 %v325_v17, %v324_v15 }
  0xb2   : > { %v333_v20 = vadd.f32 %v332_v18, %v331_v16  ;;  %v334_v21 = vmax.f32 %v326_v19, 1e-24 }
  0xb4   : > { %v335_v22 = vmax.f32 %v333_v20, 1e-24  ;;  %4967 = vrsqrt.f32 %v334_v21 }
  0xb6   : > { %4969 = vrsqrt.f32 %v335_v22 }
  0xbe   : > { %v4968_v26 = vpop.eup %4967 }
  0xc0   : > { %v4970_v27 = vpop.eup %4969 }
  0xc1   : > { %v342_v30 = vcombine.low %v4968_v26, %v4970_v27 }
  0xc3   : > { %v344_v32 = vmul.f32 %v342_v30, %v314_v4 }
 0x121   : > { %v348_v33 = vpop.permute.xlu0 %347 }
 0x122   : > { %v355_v34 = vrot.slane %v348_v33, %v354_v31 }
 0x124   : > { %v357_v35 = vmul.f32 %v355_v34, %v344_v32 }
 0x126   : > { %v359_v36 = vcombine.high %v357_v35, %v357_v35  ;;  %v361_v37 = vpack.c.bf16 %v357_v35, %v357_v35 }
 0x128   : > { %v362_v38 = vpack.c.bf16 %v359_v36, %v359_v36  ;;  %v606_v39 = vsel %vm604_vm1, %v361_v37, 0 }
 0x12a   : > { %4735 = vmatprep.subr.msk.bf16.mxu0 %vm604_vm1, %v362_v38 }
 0x12b   : > { %612 = vmatpush1.bf16.msra.mxu0 %v606_v39 }
 0x12e   : > { %4736 = vmatmul.mubr.msk.bf16.vlgmr.msra.gmra.mrb[0].mxu0 %vm531_vm2, %v4943_v40 }
 0x12f   : > { %653 = vmatprep.mubr.bf16.mxu0 %v9345_v0 }
 0x136   : > { %4737 = vmatmul.mubr.msk.bf16.gmra.mrb[4].mxu0 %vm531_vm2, %v4944_v41 }
 0x137   : > { %663 = vmatprep.mubr.bf16.mxu0 %v9345_v0 }
 0x13e   : > { %4738 = vmatmul.mubr.msk.bf16.gmra.mrb[8].mxu0 %vm531_vm2, %v4945_v42 }
 0x13f   : > { %673 = vmatprep.mubr.bf16.mxu0 %v9345_v0 }
 0x146   : > { %4739 = vmatmul.mubr.msk.bf16.gmra.mrb[12].mxu0 %vm531_vm2, %v4946_v43 }
 0x147   : > { %683 = vmatprep.mubr.bf16.mxu0 %v9345_v0 }
 0x14e   : > { %4740 = vmatmul.mubr.msk.bf16.gmra.mrb[16].mxu0 %vm531_vm2, %v4947_v44 }
 0x14f   : > { %693 = vmatprep.mubr.bf16.mxu0 %v9345_v0 }
 0x156   : > { %4741 = vmatmul.mubr.msk.bf16.gmra.mrb[20].mxu0 %vm531_vm2, %v4948_v45 }
 0x157   : > { %703 = vmatprep.mubr.bf16.mxu0 %v9345_v0 }
 0x15e   : > { %4742 = vmatmul.mubr.msk.bf16.gmra.mrb[24].mxu0 %vm531_vm2, %v4949_v46 }
 0x15f   : > { %713 = vmatprep.mubr.bf16.mxu0 %v9345_v0 }
 0x166   : > { %4743 = vmatmul.mubr.msk.bf16.gmra.mrb[28].mxu0 %vm531_vm2, %v4950_v47 }
 0x167   : > { %723 = vmatprep.mubr.bf16.mxu0 %v9345_v0 }
 0x16e   : > { %4744 = vmatmul.mubr.msk.bf16.gmra.mrb[32].mxu0 %vm531_vm2, %v4951_v48 }
 0x16f   : > { %733 = vmatprep.mubr.bf16.mxu0 %v9345_v0 }
 0x176   : > { %4745 = vmatmul.mubr.msk.bf16.gmra.mrb[36].mxu0 %vm531_vm2, %v4952_v49 }
 0x177   : > { %743 = vmatprep.mubr.bf16.mxu0 %v9345_v0 }
 0x17e   : > { %4746 = vmatmul.mubr.msk.bf16.gmra.mrb[40].mxu0 %vm531_vm2, %v4953_v50 }
 0x17f   : > { %753 = vmatprep.mubr.bf16.mxu0 %v9345_v0 }
 0x186   : > { %4747 = vmatmul.mubr.msk.bf16.gmra.mrb[44].mxu0 %vm531_vm2, %v4954_v51 }
 0x187   : > { %763 = vmatprep.mubr.bf16.mxu0 %v9345_v0 }
 0x18e   : > { %4748 = vmatmul.mubr.msk.bf16.gmra.mrb[48].mxu0 %vm531_vm2, %v4955_v52 }
 0x18f   : > { %773 = vmatprep.mubr.bf16.mxu0 %v9345_v0 }
 0x196   : > { %4749 = vmatmul.mubr.msk.bf16.gmra.mrb[52].mxu0 %vm531_vm2, %v4956_v53 }
 0x197   : > { %783 = vmatprep.mubr.bf16.mxu0 %v9345_v0 }
 0x19e   : > { %4750 = vmatmul.mubr.msk.bf16.gmra.mrb[56].mxu0 %vm531_vm2, %v4957_v54 }
 0x19f   : > { %793 = vmatprep.mubr.bf16.mxu0 %v9345_v0 }
 0x1a6   : > { %4751 = vmatmul.mubr.msk.bf16.gmra.mrb[60].mxu0 %vm531_vm2, %v4958_v55 }
 0x1a7   : > { %803 = vmatprep.mubr.bf16.mxu0 %v9345_v0 }
 0x1ae   : > { %4752 = vmatmul.mubr.msk.bf16.gmra.mrb[64].mxu0 %vm531_vm2, %v4959_v56 }
 0x1af   : > { %813 = vmatprep.mubr.bf16.mxu0 %v9345_v0 }
 0x1b6   : > { %4753 = vmatmul.mubr.msk.bf16.gmra.mrb[68].mxu0 %vm531_vm2, %v4960_v57 }
 0x1b7   : > { %823 = vmatprep.mubr.bf16.mxu0 %v9345_v0 }
 0x1be   : > { %4754 = vmatmul.mubr.msk.bf16.gmra.mrb[72].mxu0 %vm531_vm2, %v4961_v58 }
 0x1bf   : > { %833 = vmatprep.mubr.bf16.mxu0 %v9345_v0 }
 0x1c6   : > { %4755 = vmatmul.mubr.msk.bf16.gmra.mrb[76].mxu0 %vm531_vm2, %v4962_v59 }
 0x1c7   : > { %843 = vmatprep.mubr.bf16.mxu0 %v9345_v0 }
 0x1ce   : > { %4756 = vmatmul.mubr.msk.bf16.gmra.mrb[80].mxu0 %vm531_vm2, %v4963_v60 }
 0x1cf   : > { %853 = vmatprep.mubr.bf16.mxu0 %v9345_v0 }
 0x1d6   : > { %4757 = vmatmul.mubr.msk.bf16.gmra.mrb[84].mxu0 %vm531_vm2, %v4964_v61 }
 0x1d7   : > { %863 = vmatprep.mubr.bf16.mxu0 %v9345_v0 }
 0x1de   : > { %4758 = vmatmul.mubr.msk.bf16.gmra.mrb[88].mxu0 %vm531_vm2, %v4965_v62 }
 0x1df   : > { %873 = vmatprep.mubr.bf16.mxu0 %v9345_v0 }
 0x1e6   : > { %4759 = vmatmul.mubr.msk.bf16.gmra.mrb[92].mxu0 %vm531_vm2, %v4966_v63 }
 0x1e7   : > { %1182 = vmatprep.mubr.bf16.mxu0 %v9345_v0 }
 0x201   : > { %v645_v1 = vpop.f32.mrb[0].mxu0 }
 0x202   : > { %v647_v2 = vpop.f32.mrb[1].mxu0  ;;  %v884_v4 = vmul.f32 0.17677669, %v645_v1 }
 0x203   : > { %v649_v3 = vpop.f32.mrb[2].mxu0  ;;  %v885_v7 = vmul.f32 0.17677669, %v647_v2 }
 0x204   : > { %v886_v5 = vmul.f32 0.17677669, %v649_v3  ;;  %v651_v6 = vpop.f32.mrb[3].mxu0 }
 0x205   : > { %v887_v8 = vmul.f32 0.17677669, %v651_v6 }
 0x206   : > { %v916_v9 = vpack.c.bf16 %v886_v5, %v884_v4 }
 0x207   : > { %v917_v10 = vpack.c.bf16 %v887_v8, %v885_v7 }
 0x208   : > { %1069 = vxpose.xlu0.c.b16.start [1/2] (short) %v916_v9, 128 }
 0x209   : > { %1085 = vxpose.xlu1.c.b16.start [1/2] (short) %v917_v10, 128  ;;  %v655_v11 = vpop.f32.mrb[4].mxu0 }
 0x20a   : > { %v657_v12 = vpop.f32.mrb[5].mxu0  ;;  %v888_v14 = vmul.f32 0.17677669, %v655_v11 }
 0x20b   : > { %v659_v13 = vpop.f32.mrb[6].mxu0  ;;  %v889_v17 = vmul.f32 0.17677669, %v657_v12 }
 0x20c   : > { %v890_v15 = vmul.f32 0.17677669, %v659_v13  ;;  %v661_v16 = vpop.f32.mrb[7].mxu0 }
 0x20d   : > { %v891_v18 = vmul.f32 0.17677669, %v661_v16 }
 0x20e   : > { %v918_v19 = vpack.c.bf16 %v890_v15, %v888_v14 }
 0x20f   : > { %v919_v20 = vpack.c.bf16 %v891_v18, %v889_v17 }
 0x210   : > { %1070 = vxpose.xlu0.c.b16.end [2/2] (short) %v918_v19, 128 }
 0x211   : > { %1086 = vxpose.xlu1.c.b16.end [2/2] (short) %v919_v20, 128  ;;  %v665_v21 = vpop.f32.mrb[8].mxu0 }
 0x212   : > { %v892_v22 = vmul.f32 0.17677669, %v665_v21  ;;  %v667_v23 = vpop.f32.mrb[9].mxu0 }
 0x213   : > { %v6306_v24 = vmul.f32 0.17677669, %v667_v23  ;;  %v669_v25 = vpop.f32.mrb[10].mxu0 }
 0x214   : > { %v894_v26 = vmul.f32 0.17677669, %v669_v25  ;;  %v671_v27 = vpop.f32.mrb[11].mxu0 }
 0x215   : > { %v6308_v28 = vmul.f32 0.17677669, %v671_v27 }
 0x216   : > { %v920_v30 = vpack.c.bf16 %v894_v26, %v892_v22 }
 0x217   : > { %v921_v31 = vpack.c.bf16 %v6308_v28, %v6306_v24 }
 0x219   : > { %v675_v32 = vpop.f32.mrb[12].mxu0 }
 0x21a   : > { %v896_v33 = vmul.f32 0.17677669, %v675_v32  ;;  %v677_v34 = vpop.f32.mrb[13].mxu0 }
 0x21b   : > { %v6312_v35 = vmul.f32 0.17677669, %v677_v34  ;;  %v679_v36 = vpop.f32.mrb[14].mxu0 }
 0x21c   : > { %v898_v37 = vmul.f32 0.17677669, %v679_v36  ;;  %v681_v38 = vpop.f32.mrb[15].mxu0 }
 0x21d   : > { %v899_v39 = vmul.f32 0.17677669, %v681_v38 }
 0x21e   : > { %v922_v40 = vpack.c.bf16 %v898_v37, %v896_v33 }
 0x21f   : > { %v923_v41 = vpack.c.bf16 %v899_v39, %v6312_v35 }
 0x221   : > { %v685_v42 = vpop.f32.mrb[16].mxu0 }
 0x222   : > { %v900_v43 = vmul.f32 0.17677669, %v685_v42  ;;  %v687_v44 = vpop.f32.mrb[17].mxu0 }
 0x223   : > { %v901_v45 = vmul.f32 0.17677669, %v687_v44  ;;  %v689_v46 = vpop.f32.mrb[18].mxu0 }
 0x224   : > { %v902_v47 = vmul.f32 0.17677669, %v689_v46  ;;  %v691_v48 = vpop.f32.mrb[19].mxu0 }
 0x225   : > { %v903_v49 = vmul.f32 0.17677669, %v691_v48 }
 0x226   : > { %v924_v50 = vpack.c.bf16 %v902_v47, %v900_v43 }
 0x227   : > { %v925_v51 = vpack.c.bf16 %v903_v49, %v901_v45 }
 0x229   : > { %1616 = vxpose.xlu0.c.b16.start [1/2] (short) %v924_v50, 128  ;;  %v695_v52 = vpop.f32.mrb[20].mxu0 }
 0x22a   : > { %v904_v53 = vmul.f32 0.17677669, %v695_v52  ;;  %1343 = vxpose.xlu1.c.b16.start [1/2] (short) %v920_v30, 128  ;;  %v697_v54 = vpop.f32.mrb[21].mxu0 }
 0x22b   : > { %v905_v55 = vmul.f32 0.17677669, %v697_v54  ;;  %v699_v56 = vpop.f32.mrb[22].mxu0 }
 0x22c   : > { %v906_v57 = vmul.f32 0.17677669, %v699_v56  ;;  %v701_v58 = vpop.f32.mrb[23].mxu0 }
 0x22d   : > { %v907_v59 = vmul.f32 0.17677669, %v701_v58 }
 0x22e   : > { %v926_v60 = vpack.c.bf16 %v906_v57, %v904_v53  ;;  %1344 = vxpose.xlu1.c.b16.end [2/2] (short) %v922_v40, 128 }
 0x22f   : > { %v927_v61 = vpack.c.bf16 %v907_v59, %v905_v55 }
 0x230   : > { %1617 = vxpose.xlu0.c.b16.end [2/2] (short) %v926_v60, 128 }
 0x231   : > { %v705_v62 = vpop.f32.mrb[24].mxu0 }
 0x232   : > { %v908_v63 = vmul.f32 0.17677669, %v705_v62  ;;  %v707_v1 = vpop.f32.mrb[25].mxu0 }
 0x233   : > { %v6315_v2 = vmul.f32 0.17677669, %v707_v1  ;;  %v709_v3 = vpop.f32.mrb[26].mxu0 }
 0x234   : > { %v910_v4 = vmul.f32 0.17677669, %v709_v3  ;;  %v711_v5 = vpop.f32.mrb[27].mxu0 }
 0x235   : > { %v6317_v6 = vmul.f32 0.17677669, %v711_v5 }
 0x236   : > { %v928_v7 = vpack.c.bf16 %v910_v4, %v908_v63 }
 0x237   : > { %v929_v8 = vpack.c.bf16 %v6317_v6, %v6315_v2 }
 0x239   : > { %v715_v9 = vpop.f32.mrb[28].mxu0 }
 0x23a   : > { %v912_v10 = vmul.f32 0.17677669, %v715_v9  ;;  %v717_v11 = vpop.f32.mrb[29].mxu0 }
 0x23b   : > { %v6321_v12 = vmul.f32 0.17677669, %v717_v11  ;;  %v719_v13 = vpop.f32.mrb[30].mxu0 }
 0x23c   : > { %v914_v14 = vmul.f32 0.17677669, %v719_v13  ;;  %v721_v15 = vpop.f32.mrb[31].mxu0 }
 0x23d   : > { %v6323_v16 = vmul.f32 0.17677669, %v721_v15 }
 0x23e   : > { %v930_v17 = vpack.c.bf16 %v914_v14, %v912_v10 }
 0x23f   : > { %v931_v18 = vpack.c.bf16 %v6323_v16, %v6321_v12 }
 0x241   : > { %v725_v19 = vpop.f32.mrb[32].mxu0 }
 0x242   : > { %v727_v20 = vpop.f32.mrb[33].mxu0 }
 0x243   : > { %v729_v21 = vpop.f32.mrb[34].mxu0 }
 0x244   : > { %v948_v22 = vpack.c.bf16 %v729_v21, %v725_v19  ;;  %v731_v23 = vpop.f32.mrb[35].mxu0 }
 0x245   : > { %v949_v24 = vpack.c.bf16 %v731_v23, %v727_v20 }
 0x247   : > { %1359 = vxpose.xlu1.c.b16.start [1/2] (short) %v921_v31, 128  ;;  %1150 = vmatprep.subr.bf16.mxu0 %v949_v24 }
 0x248   : > { %4831 = vmatprep.subr.bf16.mxu1 %v949_v24  ;;  %1151 = vmatpush1.bf16.msra.mxu0 %v948_v22 }
 0x249   : > { %4833 = vmatpush1.bf16.msra.mxu1 %v948_v22  ;;  %1632 = vxpose.xlu0.c.b16.start [1/2] (short) %v925_v51, 128  ;;  %v735_v25 = vpop.f32.mrb[36].mxu0 }
 0x24a   : > { %v737_v26 = vpop.f32.mrb[37].mxu0 }
 0x24b   : > { %1360 = vxpose.xlu1.c.b16.end [2/2] (short) %v923_v41, 128  ;;  %v739_v27 = vpop.f32.mrb[38].mxu0 }
 0x24c   : > { %v950_v28 = vpack.c.bf16 %v739_v27, %v735_v25  ;;  %v741_v30 = vpop.f32.mrb[39].mxu0 }
 0x24d   : > { %1633 = vxpose.xlu0.c.b16.end [2/2] (short) %v927_v61, 128  ;;  %v951_v32 = vpack.c.bf16 %v741_v30, %v737_v26 }
 0x24f   : > { %1152 = vmatprep.subr.bf16.mxu0 %v951_v32  ;;  %4832 = vmatprep.subr.bf16.mxu1 %v951_v32 }
 0x250   : > { %1153 = vmatpush1.bf16.msra.mxu0 %v950_v28  ;;  %4834 = vmatpush1.bf16.msra.mxu1 %v950_v28 }
 0x251   : > { %v745_v33 = vpop.f32.mrb[40].mxu0 }
 0x252   : > { %v747_v34 = vpop.f32.mrb[41].mxu0 }
 0x253   : > { %v749_v31 = vpop.f32.mrb[42].mxu0 }
 0x254   : > { %v952_v35 = vpack.c.bf16 %v749_v31, %v745_v33  ;;  %v751_v36 = vpop.f32.mrb[43].mxu0 }
 0x255   : > { %v953_v37 = vpack.c.bf16 %v751_v36, %v747_v34 }
 0x257   : > { %1423 = vmatprep.subr.bf16.mxu1 %v953_v37 }
 0x259   : > { %v755_v38 = vpop.f32.mrb[44].mxu0 }
 0x25a   : > { %v757_v39 = vpop.f32.mrb[45].mxu0 }
 0x25b   : > { %v759_v40 = vpop.f32.mrb[46].mxu0 }
 0x25c   : > { %v954_v41 = vpack.c.bf16 %v759_v40, %v755_v38  ;;  %v761_v42 = vpop.f32.mrb[47].mxu0 }
 0x25d   : > { %v955_v43 = vpack.c.bf16 %v761_v42, %v757_v39 }
 0x261   : > { %v765_v44 = vpop.f32.mrb[48].mxu0 }
 0x262   : > { %v767_v45 = vpop.f32.mrb[49].mxu0 }
 0x263   : > { %v769_v46 = vpop.f32.mrb[50].mxu0 }
 0x264   : > { %1889 = vxpose.xlu1.c.b16.start [1/2] (short) %v928_v7, 128  ;;  %v956_v47 = vpack.c.bf16 %v769_v46, %v765_v44  ;;  %v771_v48 = vpop.f32.mrb[51].mxu0 }
 0x265   : > { %v957_v49 = vpack.c.bf16 %v771_v48, %v767_v45 }
 0x267   : > { %1696 = vmatprep.subr.bf16.mxu0 %v957_v49 }
 0x268   : > { %1890 = vxpose.xlu1.c.b16.end [2/2] (short) %v930_v17, 128 }
 0x269   : > { %v775_v50 = vpop.f32.mrb[52].mxu0 }
 0x26a   : > { %v777_v51 = vpop.f32.mrb[53].mxu0 }
 0x26b   : > { %v779_v52 = vpop.f32.mrb[54].mxu0 }
 0x26c   : > { %v958_v53 = vpack.c.bf16 %v779_v52, %v775_v50  ;;  %v781_v54 = vpop.f32.mrb[55].mxu0 }
 0x26d   : > { %v959_v55 = vpack.c.bf16 %v781_v54, %v777_v51 }
 0x271   : > { %v6329_v57 = vpop.f32.mrb[56].mxu0 }
 0x272   : > { %v1077_v56 = vpop.trf.xlu0  ;;  %v787_v58 = vpop.f32.mrb[57].mxu0 }
 0x273   : > { %4760 = vmatmul.mubr.msk.bf16.vlgmr.msra.gmra.mrb[96].mxu0 %vm1101_vm3, %v1077_v56  ;;  %v6331_v60 = vpop.f32.mrb[58].mxu0 }
 0x274   : > { %1192 = vmatprep.mubr.bf16.mxu0 %v9345_v0  ;;  %1697 = vmatpush1.bf16.msra.mxu0 %v956_v47  ;;  %v791_v61 = vpop.f32.mrb[59].mxu0  ;;  %v960_v63 = vpack.c.bf16 %v6331_v60, %v6329_v57 }
 0x275   : > { %1698 = vmatprep.subr.bf16.mxu0 %v959_v55  ;;  %v961_v62 = vpack.c.bf16 %v791_v61, %v787_v58 }
 0x276   : > { %v1078_v59 = vpop.trf.xlu0 }
 0x278   : > { %1699 = vmatpush1.bf16.msra.mxu0 %v958_v53 }
 0x279   : > { %v6339_v3 = vpop.f32.mrb[60].mxu0 }
 0x27a   : > { %v1079_v1 = vpop.trf.xlu0  ;;  %v6341_v4 = vpop.f32.mrb[61].mxu0 }
 0x27b   : > { %4761 = vmatmul.mubr.msk.bf16.gmra.mrb[100].mxu0 %vm1101_vm3, %v1078_v59  ;;  %4762 = vmatmul.mubr.msk.bf16.vlgmr.msra.gmra.mrb[0].mxu1 %vm1101_vm3, %v1079_v1  ;;  %v6343_v7 = vpop.f32.mrb[62].mxu0 }
 0x27c   : > { %1212 = vmatprep.mubr.bf16.mxu1 %v9345_v0  ;;  %1728 = vmatprep.mubr.bf16.mxu0 %v9345_v0  ;;  %v6345_v9 = vpop.f32.mrb[63].mxu0  ;;  %v962_v11 = vpack.c.bf16 %v6343_v7, %v6339_v3 }
 0x27d   : > { %1424 = vmatpush1.bf16.msra.mxu1 %v952_v35  ;;  %v963_v10 = vpack.c.bf16 %v6345_v9, %v6341_v4 }
 0x27e   : > { %v1080_v5 = vpop.trf.xlu0  ;;  %1425 = vmatprep.subr.bf16.mxu1 %v955_v43  ;;  %v1093_v43 = vpop.trf.xlu1 }
 0x281   : > { %1905 = vxpose.xlu1.c.b16.start [1/2] (short) %v929_v8, 128  ;;  %1426 = vmatpush1.bf16.msra.mxu1 %v954_v41  ;;  %v6359_v14 = vpop.f32.mrb[64].mxu0 }
 0x282   : > { %v1081_v13 = vpop.trf.xlu0  ;;  %1969 = vmatprep.subr.bf16.mxu1 %v961_v62  ;;  %9696 = vst [vmem:[#allocation18_spill] sm:$0xff] %v6359_v14  ;;  %v6361_v17 = vpop.f32.mrb[65].mxu0 }
 0x283   : > { %4763 = vmatmul.mubr.msk.bf16.gmra.mrb[4].mxu1 %vm1101_vm3, %v1080_v5  ;;  %v6363_v2 = vpop.f32.mrb[66].mxu0  ;;  %v1094_v51 = vpop.trf.xlu1 }
 0x284   : > { %1222 = vmatprep.mubr.bf16.mxu1 %v9345_v0  ;;  %9697 = vst [vmem:[#allocation19_spill] sm:$0xff] %v6363_v2  ;;  %v6365_v6 = vpop.f32.mrb[67].mxu0 }
 0x285   : > { %1906 = vxpose.xlu1.c.b16.end [2/2] (short) %v931_v18, 128  ;;  %v982_v19 = vpack.c.bf16 %v6365_v6, %v6361_v17 }
 0x286   : > { %v1082_v15 = vpop.trf.xlu0 }
 0x287   : > { %v1095_v61 = vpop.trf.xlu1 }
 0x289   : > { %v6373_v12 = vpop.f32.mrb[68].mxu0 }
 0x28a   : > { %v1083_v20 = vpop.trf.xlu0  ;;  %9698 = vst [vmem:[#allocation20_spill] sm:$0xff] %v6373_v12  ;;  %v6375_v18 = vpop.f32.mrb[69].mxu0 }
 0x28b   : > { %4764 = vmatmul.mubr.msk.bf16.gmra.mrb[8].mxu1 %vm1101_vm3, %v1081_v13  ;;  %9699 = vst [vmem:[#allocation21_spill] sm:$0xff] %v6375_v18  ;;  %v6377_v21 = vpop.f32.mrb[70].mxu0 }
 0x28c   : > { %1232 = vmatprep.mubr.bf16.mxu1 %v9345_v0  ;;  %9700 = vst [vmem:[#allocation22_spill] sm:$0xff] %v6377_v21  ;;  %v6379_v22 = vpop.f32.mrb[71].mxu0 }
 0x28d   : > { %9701 = vst [vmem:[#allocation23_spill] sm:$0xff] %v6379_v22 }
 0x28e   : > { %v1084_v16 = vpop.trf.xlu0 }
 0x291   : > { %v6389_v26 = vpop.f32.mrb[72].mxu0 }
 0x292   : > { %v1624_v25 = vpop.trf.xlu0  ;;  %9702 = vst [vmem:[#allocation24_spill] sm:$0xff] %v6389_v26  ;;  %v6391_v27 = vpop.f32.mrb[73].mxu0 }
 0x293   : > { %4765 = vmatmul.mubr.msk.bf16.gmra.mrb[12].mxu1 %vm1101_vm3, %v1082_v15  ;;  %4792 = vmatmul.mubr.msk.bf16.vlgmr.msra.gmra.mrb[104].mxu0 %vm1101_vm3, %v1624_v25  ;;  %v6393_v28 = vpop.f32.mrb[74].mxu0  ;;  %v1096_v25 = vpop.trf.xlu1 }
 0x294   : > { %1242 = vmatprep.mubr.bf16.mxu1 %v9345_v0  ;;  %1738 = vmatprep.mubr.bf16.mxu0 %v9345_v0  ;;  %9703 = vst [vmem:[#allocation25_spill] sm:$0xff] %v6393_v28  ;;  %v6395_v32 = vpop.f32.mrb[75].mxu0 }
 0x296   : > { %v1625_v30 = vpop.trf.xlu0 }
 0x299   : > { %v6405_v31 = vpop.f32.mrb[76].mxu0 }
 0x29a   : > { %9704 = vst [vmem:[#allocation26_spill] sm:$0xff] %v6405_v31  ;;  %v6407_v35 = vpop.f32.mrb[77].mxu0  ;;  %v1626_v37 = vpop.trf.xlu0 }
 0x29b   : > { %4766 = vmatmul.mubr.msk.bf16.gmra.mrb[16].mxu1 %vm1101_vm3, %v1083_v20  ;;  %4793 = vmatmul.mubr.msk.bf16.gmra.mrb[108].mxu0 %vm1101_vm3, %v1625_v30  ;;  %9705 = vst [vmem:[#allocation27_spill] sm:$0xff] %v6407_v35  ;;  %v6409_v36 = vpop.f32.mrb[78].mxu0 }
 0x29c   : > { %1252 = vmatprep.mubr.bf16.mxu1 %v9345_v0  ;;  %1748 = vmatprep.mubr.bf16.mxu0 %v9345_v0  ;;  %9706 = vst [vmem:[#allocation28_spill] sm:$0xff] %v6409_v36  ;;  %v6411_v38 = vpop.f32.mrb[79].mxu0 }
 0x29d   : > { %9707 = vst [vmem:[#allocation29_spill] sm:$0xff] %v6411_v38 }
 0x29e   : > { %v1627_v45 = vpop.trf.xlu0 }
 0x2a1   : > { %v6421_v41 = vpop.f32.mrb[80].mxu0 }
 0x2a2   : > { %9708 = vst [vmem:[#allocation30_spill] sm:$0xff] %v6421_v41  ;;  %v6423_v42 = vpop.f32.mrb[81].mxu0  ;;  %v1628_v53 = vpop.trf.xlu0 }
 0x2a3   : > { %4767 = vmatmul.mubr.msk.bf16.gmra.mrb[20].mxu1 %vm1101_vm3, %v1084_v16  ;;  %4794 = vmatmul.mubr.msk.bf16.gmra.mrb[112].mxu0 %vm1101_vm3, %v1626_v37  ;;  %9709 = vst [vmem:[#allocation31_spill] sm:$0xff] %v6423_v42  ;;  %v6425_v44 = vpop.f32.mrb[82].mxu0 }
 0x2a4   : > { %1262 = vmatprep.mubr.bf16.mxu1 %v9345_v0  ;;  %1758 = vmatprep.mubr.bf16.mxu0 %v9345_v0  ;;  %9710 = vst [vmem:[#allocation32_spill] sm:$0xff] %v6425_v44  ;;  %v6427_v46 = vpop.f32.mrb[83].mxu0 }
 0x2a5   : > { %9711 = vst [vmem:[#allocation33_spill] sm:$0xff] %v6427_v46 }
 0x2a6   : > { %v1629_v1 = vpop.trf.xlu0 }
 0x2a9   : > { %v6437_v49 = vpop.f32.mrb[84].mxu0 }
 0x2aa   : > { %9712 = vst [vmem:[#allocation34_spill] sm:$0xff] %v6437_v49  ;;  %v6439_v50 = vpop.f32.mrb[85].mxu0  ;;  %v1630_v37 = vpop.trf.xlu0 }
 0x2ab   : > { %4768 = vmatmul.mubr.msk.bf16.gmra.mrb[24].mxu1 %vm1101_vm3, %v1093_v43  ;;  %4795 = vmatmul.mubr.msk.bf16.gmra.mrb[116].mxu0 %vm1101_vm3, %v1627_v45  ;;  %9713 = vst [vmem:[#allocation35_spill] sm:$0xff] %v6439_v50  ;;  %v6441_v52 = vpop.f32.mrb[86].mxu0 }
 0x2ac   : > { %1272 = vmatprep.mubr.bf16.mxu1 %v9345_v0  ;;  %1768 = vmatprep.mubr.bf16.mxu0 %v9345_v0  ;;  %9714 = vst [vmem:[#allocation36_spill] sm:$0xff] %v6441_v52  ;;  %v6443_v54 = vpop.f32.mrb[87].mxu0 }
 0x2ad   : > { %9715 = vst [vmem:[#allocation37_spill] sm:$0xff] %v6443_v54 }
 0x2b1   : > { %v6453_v58 = vpop.f32.mrb[88].mxu0 }
 0x2b2   : > { %9716 = vst [vmem:[#allocation38_spill] sm:$0xff] %v6453_v58  ;;  %v6455_v59 = vpop.f32.mrb[89].mxu0 }
 0x2b3   : > { %4769 = vmatmul.mubr.msk.bf16.gmra.mrb[28].mxu1 %vm1101_vm3, %v1094_v51  ;;  %4796 = vmatmul.mubr.msk.bf16.gmra.mrb[120].mxu0 %vm1101_vm3, %v1628_v53  ;;  %9717 = vst [vmem:[#allocation39_spill] sm:$0xff] %v6455_v59  ;;  %v6457_v62 = vpop.f32.mrb[90].mxu0  ;;  %v1097_v53 = vpop.trf.xlu1 }
 0x2b4   : > { %1282 = vmatprep.mubr.bf16.mxu1 %v9345_v0  ;;  %1778 = vmatprep.mubr.bf16.mxu0 %v9345_v0  ;;  %9718 = vst [vmem:[#allocation40_spill] sm:$0xff] %v6457_v62  ;;  %v6459_v5 = vpop.f32.mrb[91].mxu0 }
 0x2b5   : > { %9719 = vst [vmem:[#allocation41_spill] sm:$0xff] %v6459_v5 }
 0x2b9   : > { %v6469_v20 = vpop.f32.mrb[92].mxu0 }
 0x2ba   : > { %9720 = vst [vmem:[#allocation42_spill] sm:$0xff] %v6469_v20  ;;  %v6471_v16 = vpop.f32.mrb[93].mxu0 }
 0x2bb   : > { %4770 = vmatmul.mubr.msk.bf16.gmra.mrb[32].mxu1 %vm1101_vm3, %v1095_v61  ;;  %4797 = vmatmul.mubr.msk.bf16.gmra.mrb[124].mxu0 %vm1101_vm3, %v1629_v1  ;;  %9721 = vst [vmem:[#allocation43_spill] sm:$0xff] %v6471_v16  ;;  %v6473_v30 = vpop.f32.mrb[94].mxu0  ;;  %v1631_v61 = vpop.trf.xlu0 }
 0x2bc   : > { %1292 = vmatprep.mubr.bf16.mxu1 %v9345_v0  ;;  %1788 = vmatprep.mubr.bf16.mxu0 %v9345_v0  ;;  %9722 = vst [vmem:[#allocation44_spill] sm:$0xff] %v6473_v30  ;;  %v6475_v43 = vpop.f32.mrb[95].mxu0  ;;  %v1098_v1 = vpop.trf.xlu1 }
 0x2bd   : > { %9723 = vst [vmem:[#allocation45_spill] sm:$0xff] %v6475_v43 }
 0x2bf   : > { %v1640_v45 = vpop.trf.xlu0 }
 0x2c3   : > { %4771 = vmatmul.mubr.msk.bf16.gmra.mrb[36].mxu1 %vm1101_vm3, %v1096_v25  ;;  %4798 = vmatmul.mubr.msk.bf16.gmra.mrb[128].mxu0 %vm1101_vm3, %v1630_v37  ;;  %v1099_v25 = vpop.trf.xlu1  ;;  %v1641_v37 = vpop.trf.xlu0 }
 0x2c4   : > { %1302 = vmatprep.mubr.bf16.mxu1 %v9345_v0  ;;  %1798 = vmatprep.mubr.bf16.mxu0 %v9345_v0 }
 0x2cb   : > { %4772 = vmatmul.mubr.msk.bf16.gmra.mrb[40].mxu1 %vm1101_vm3, %v1097_v53  ;;  %4799 = vmatmul.mubr.msk.bf16.gmra.mrb[132].mxu0 %vm1101_vm3, %v1631_v61  ;;  %v1100_v53 = vpop.trf.xlu1  ;;  %v1642_v61 = vpop.trf.xlu0 }
 0x2cc   : > { %1312 = vmatprep.mubr.bf16.mxu1 %v9345_v0  ;;  %1808 = vmatprep.mubr.bf16.mxu0 %v9345_v0 }
 0x2d3   : > { %4773 = vmatmul.mubr.msk.bf16.gmra.mrb[44].mxu1 %vm1101_vm3, %v1098_v1  ;;  %4800 = vmatmul.mubr.msk.bf16.gmra.mrb[136].mxu0 %vm1101_vm3, %v1640_v45  ;;  %v1351_v45 = vpop.trf.xlu1  ;;  %v1643_v1 = vpop.trf.xlu0 }
 0x2d4   : > { %1322 = vmatprep.mubr.bf16.mxu1 %v9345_v0  ;;  %1818 = vmatprep.mubr.bf16.mxu0 %v9345_v0 }
 0x2db   : > { %4774 = vmatmul.mubr.msk.bf16.gmra.mrb[48].mxu1 %vm1101_vm3, %v1099_v25  ;;  %4801 = vmatmul.mubr.msk.bf16.gmra.mrb[140].mxu0 %vm1101_vm3, %v1641_v37  ;;  %v1352_v25 = vpop.trf.xlu1  ;;  %v1644_v37 = vpop.trf.xlu0 }
 0x2dc   : > { %1332 = vmatprep.mubr.bf16.mxu1 %v9345_v0  ;;  %1828 = vmatprep.mubr.bf16.mxu0 %v9345_v0 }
 0x2df   : > { %v1353_v57 = vpop.trf.xlu1  ;;  %v1645_v60 = vpop.trf.xlu0 }
 0x2e3   : > { %4775 = vmatmul.mubr.msk.bf16.gmra.mrb[52].mxu1 %vm1101_vm3, %v1100_v53  ;;  %4802 = vmatmul.mubr.msk.bf16.gmra.mrb[144].mxu0 %vm1101_vm3, %v1642_v61  ;;  %v1646_v3 = vpop.trf.xlu0 }
 0x2e4   : > { %1455 = vmatprep.mubr.bf16.mxu1 %v9345_v0  ;;  %1838 = vmatprep.mubr.bf16.mxu0 %v9345_v0 }
 0x2e7   : > { %v1647_v7 = vpop.trf.xlu0 }
 0x2eb   : > { %4776 = vmatmul.mubr.msk.bf16.vlgmr.msra.gmra.mrb[56].mxu1 %vm1101_vm3, %v1351_v45  ;;  %4803 = vmatmul.mubr.msk.bf16.gmra.mrb[148].mxu0 %vm1101_vm3, %v1643_v1 }
 0x2ec   : > { %1465 = vmatprep.mubr.bf16.mxu1 %v9345_v0  ;;  %1848 = vmatprep.mubr.bf16.mxu0 %v9345_v0 }
 0x2ed   : > { %1970 = vmatpush1.bf16.msra.mxu1 %v960_v63  ;;  %v1354_v63 = vpop.trf.xlu1 }
 0x2ee   : > { %1971 = vmatprep.subr.bf16.mxu1 %v963_v10 }
 0x2f1   : > { %1972 = vmatpush1.bf16.msra.mxu1 %v962_v11  ;;  %v1355_v4 = vpop.trf.xlu1 }
 0x2f3   : > { %4777 = vmatmul.mubr.msk.bf16.gmra.mrb[60].mxu1 %vm1101_vm3, %v1352_v25  ;;  %4804 = vmatmul.mubr.msk.bf16.gmra.mrb[152].mxu0 %vm1101_vm3, %v1644_v37 }
 0x2f4   : > { %1475 = vmatprep.mubr.bf16.mxu1 %v9345_v0  ;;  %1858 = vmatprep.mubr.bf16.mxu0 %v9345_v0 }
 0x2f5   : > { %v1356_v9 = vpop.trf.xlu1 }
 0x2f9   : > { %v1357_v10 = vpop.trf.xlu1 }
 0x2fb   : > { %4778 = vmatmul.mubr.msk.bf16.gmra.mrb[64].mxu1 %vm1101_vm3, %v1353_v57  ;;  %4805 = vmatmul.mubr.msk.bf16.gmra.mrb[156].mxu0 %vm1101_vm3, %v1645_v60 }
 0x2fc   : > { %1485 = vmatprep.mubr.bf16.mxu1 %v9345_v0  ;;  %1868 = vmatprep.mubr.bf16.mxu0 %v9345_v0 }
 0x2fd   : > { %v1358_v11 = vpop.trf.xlu1 }
 0x301   : > { %v1367_v53 = vpop.trf.xlu1 }
 0x303   : > { %4779 = vmatmul.mubr.msk.bf16.gmra.mrb[68].mxu1 %vm1101_vm3, %v1354_v63  ;;  %4806 = vmatmul.mubr.msk.bf16.gmra.mrb[160].mxu0 %vm1101_vm3, %v1646_v3 }
 0x304   : > { %1495 = vmatprep.mubr.bf16.mxu1 %v9345_v0  ;;  %1878 = vmatprep.mubr.bf16.mxu0 %v9345_v0 }
 0x305   : > { %v1368_v17 = vpop.trf.xlu1 }
 0x309   : > { %v1369_v6 = vpop.trf.xlu1 }
 0x30b   : > { %4780 = vmatmul.mubr.msk.bf16.gmra.mrb[72].mxu1 %vm1101_vm3, %v1355_v4  ;;  %4807 = vmatmul.mubr.msk.bf16.gmra.mrb[164].mxu0 %vm1101_vm3, %v1647_v7 }
 0x30c   : > { %1505 = vmatprep.mubr.bf16.mxu1 %v9345_v0  ;;  %3986 = vmatprep.mubr.bf16.mxu0 %v982_v19 }
 0x30d   : > { %v1370_v19 = vpop.trf.xlu1 }
 0x311   : > { %v1371_v25 = vpop.trf.xlu1 }
 0x313   : > { %4781 = vmatmul.mubr.msk.bf16.gmra.mrb[76].mxu1 %vm1101_vm3, %v1356_v9 }
 0x314   : > { %1515 = vmatprep.mubr.bf16.mxu1 %v9345_v0 }
 0x315   : > { %v1372_v63 = vpop.trf.xlu1 }
 0x319   : > { %v1373_v13 = vpop.trf.xlu1 }
 0x31b   : > { %4782 = vmatmul.mubr.msk.bf16.gmra.mrb[80].mxu1 %vm1101_vm3, %v1357_v10 }
 0x31c   : > { %1525 = vmatprep.mubr.bf16.mxu1 %v9345_v0 }
 0x323   : > { %4783 = vmatmul.mubr.msk.bf16.gmra.mrb[84].mxu1 %vm1101_vm3, %v1358_v11 }
 0x324   : > { %1535 = vmatprep.mubr.bf16.mxu1 %v9345_v0 }
 0x32b   : > { %4784 = vmatmul.mubr.msk.bf16.gmra.mrb[88].mxu1 %vm1101_vm3, %v1367_v53 }
 0x32c   : > { %1545 = vmatprep.mubr.bf16.mxu1 %v9345_v0 }
 0x333   : > { %4785 = vmatmul.mubr.msk.bf16.gmra.mrb[92].mxu1 %vm1101_vm3, %v1368_v17 }
 0x334   : > { %1555 = vmatprep.mubr.bf16.mxu1 %v9345_v0 }
 0x33b   : > { %4786 = vmatmul.mubr.msk.bf16.gmra.mrb[96].mxu1 %vm1101_vm3, %v1369_v6 }
 0x33c   : > { %1565 = vmatprep.mubr.bf16.mxu1 %v9345_v0 }
 0x343   : > { %4787 = vmatmul.mubr.msk.bf16.gmra.mrb[100].mxu1 %vm1101_vm3, %v1370_v19 }
 0x344   : > { %1575 = vmatprep.mubr.bf16.mxu1 %v9345_v0 }
 0x346   : > { %v6546_v61 = vpop.f32.mrb[96].mxu0 }
 0x347   : > { %v6548_v45 = vpop.f32.mrb[97].mxu0 }
 0x348   : > { %v6550_v1 = vpop.f32.mrb[98].mxu0  ;;  %v2162_v37 = vmax.f32 %v6546_v61, %v6548_v45 }
 0x349   : > { %v6554_v57 = vpop.f32.mrb[99].mxu0 }
 0x34a   : > { %2163 = vmax.xlane.f32.xlu0 %v2162_v37  ;;  %v2165_v60 = vmax.f32 %v6550_v1, %v6554_v57 }
 0x34b   : > { %4788 = vmatmul.mubr.msk.bf16.gmra.mrb[104].mxu1 %vm1101_vm3, %v1371_v25 }
 0x34c   : > { %2166 = vmax.xlane.f32.xlu1 %v2165_v60  ;;  %1585 = vmatprep.mubr.bf16.mxu1 %v9345_v0 }
 0x34e   : > { %v6560_v3 = vpop.f32.mrb[100].mxu0  ;;  %v6562_v4 = vpop.f32.mrb[0].mxu1 }
 0x34f   : > { %v6564_v7 = vpop.f32.mrb[101].mxu0  ;;  %v6566_v9 = vpop.f32.mrb[1].mxu1 }
 0x350   : > { %v2168_v10 = vmax.f32 %v6560_v3, %v6564_v7  ;;  %v2174_v11 = vmax.f32 %v6562_v4, %v6566_v9  ;;  %v6572_v53 = vpop.f32.mrb[102].mxu0  ;;  %v6574_v17 = vpop.f32.mrb[2].mxu1 }
 0x351   : > { %v6576_v6 = vpop.f32.mrb[103].mxu0  ;;  %v6578_v19 = vpop.f32.mrb[3].mxu1 }
 0x352   : > { %2169 = vmax.xlane.f32.xlu0 %v2168_v10  ;;  %v2171_v25 = vmax.f32 %v6572_v53, %v6576_v6  ;;  %v2177_v37 = vmax.f32 %v6574_v17, %v6578_v19 }
 0x353   : > { %4789 = vmatmul.mubr.msk.bf16.gmra.mrb[108].mxu1 %vm1101_vm3, %v1372_v63  ;;  %v1374_v63 = vpop.trf.xlu1 }
 0x354   : > { %1595 = vmatprep.mubr.bf16.mxu1 %v9345_v0 }
 0x356   : > { %2175 = vmax.xlane.f32.xlu0 %v2174_v11  ;;  %v6586_v60 = vpop.f32.mrb[4].mxu1 }
 0x357   : > { %v6588_v51 = vpop.f32.mrb[5].mxu1 }
 0x358   : > { %v6590_v15 = vpop.f32.mrb[6].mxu1  ;;  %v2180_v10 = vmax.f32 %v6586_v60, %v6588_v51 }
 0x359   : > { %v6594_v39 = vpop.f32.mrb[7].mxu1 }
 0x35a   : > { %2172 = vmax.xlane.f32.xlu0 %v2171_v25  ;;  %v2183_v40 = vmax.f32 %v6590_v15, %v6594_v39  ;;  %v1897_v25 = vpop.trf.xlu1 }
 0x35b   : > { %4790 = vmatmul.mubr.msk.bf16.gmra.mrb[112].mxu1 %vm1101_vm3, %v1373_v13 }
 0x35c   : > { %1605 = vmatprep.mubr.bf16.mxu1 %v9345_v0 }
 0x35e   : > { %2178 = vmax.xlane.f32.xlu0 %v2177_v37  ;;  %v6600_v11 = vpop.f32.mrb[8].mxu1  ;;  %v1898_v37 = vpop.trf.xlu1 }
 0x35f   : > { %v6602_v33 = vpop.f32.mrb[9].mxu1 }
 0x360   : > { %v6604_v55 = vpop.f32.mrb[10].mxu1  ;;  %v2186_v56 = vmax.f32 %v6600_v11, %v6602_v33 }
 0x361   : > { %v6608_v47 = vpop.f32.mrb[11].mxu1 }
 0x362   : > { %2181 = vmax.xlane.f32.xlu0 %v2180_v10  ;;  %2187 = vmax.xlane.f32.xlu1 %v2186_v56  ;;  %v2189_v13 = vmax.f32 %v6604_v55, %v6608_v47  ;;  %v1899_v16 = vpop.trf.xlu1 }
 0x363   : > { %4791 = vmatmul.mubr.msk.bf16.gmra.mrb[116].mxu1 %vm1101_vm3, %v1374_v63 }
 0x364   : > { %2001 = vmatprep.mubr.bf16.mxu1 %v9345_v0 }
 0x366   : > { %v6614_v48 = vpop.f32.mrb[12].mxu1  ;;  %2184 = vmax.xlane.f32.xlu0 %v2183_v40  ;;  %v6616_v23 = vpop.f32.mrb[104].mxu0 }
 0x367   : > { %v6618_v24 = vpop.f32.mrb[13].mxu1  ;;  %v6620_v8 = vpop.f32.mrb[105].mxu0 }
 0x368   : > { %v6622_v34 = vpop.f32.mrb[14].mxu1  ;;  %v2192_v56 = vmax.f32 %v6614_v48, %v6618_v24  ;;  %v2354_v10 = vmax.f32 %v6616_v23, %v6620_v8  ;;  %v6628_v63 = vpop.f32.mrb[106].mxu0 }
 0x369   : > { %v6630_v0 = vpop.f32.mrb[15].mxu1  ;;  %v6632_v20 = vpop.f32.mrb[107].mxu0 }
 0x36a   : > { %2193 = vmax.xlane.f32.xlu1 %v2192_v56  ;;  %2190 = vmax.xlane.f32.xlu0 %v2189_v13  ;;  %v2195_v40 = vmax.f32 %v6622_v34, %v6630_v0  ;;  %v2357_v30 = vmax.f32 %v6628_v63, %v6632_v20  ;;  %v1900_v35 = vpop.trf.xlu1 }
 0x36b   : > { %4808 = vmatmul.mubr.msk.bf16.vlgmr.msra.gmra.mrb[120].mxu1 %vm1101_vm3, %v1897_v25 }
 0x36c   : > { %2011 = vmatprep.mubr.bf16.mxu1 %v9724_v29 }
 0x36e   : > { %v6640_v43 = vpop.f32.mrb[16].mxu1  ;;  %2196 = vmax.xlane.f32.xlu0 %v2195_v40  ;;  %2355 = vmax.xlane.f32.xlu1 %v2354_v10  ;;  %v6642_v58 = vpop.f32.mrb[108].mxu0 }
 0x36f   : > { %v6644_v62 = vpop.f32.mrb[17].mxu1  ;;  %v6646_v13 = vpop.f32.mrb[109].mxu0 }
 0x370   : > { %v6648_v56 = vpop.f32.mrb[18].mxu1  ;;  %v2198_v59 = vmax.f32 %v6640_v43, %v6644_v62  ;;  %v2360_v25 = vmax.f32 %v6642_v58, %v6646_v13  ;;  %v6654_v5 = vpop.f32.mrb[110].mxu0 }
 0x371   : > { %v6656_v31 = vpop.f32.mrb[19].mxu1  ;;  %v6658_v40 = vpop.f32.mrb[111].mxu0 }
 0x372   : > { %2199 = vmax.xlane.f32.xlu1 %v2198_v59  ;;  %2358 = vmax.xlane.f32.xlu0 %v2357_v30  ;;  %v2201_v10 = vmax.f32 %v6648_v56, %v6656_v31  ;;  %v2363_v36 = vmax.f32 %v6654_v5, %v6658_v40  ;;  %v1901_v41 = vpop.trf.xlu1 }
 0x373   : > { %4809 = vmatmul.mubr.msk.bf16.gmra.mrb[124].mxu1 %vm1101_vm3, %v1898_v37 }
 0x374   : > { %2021 = vmatprep.mubr.bf16.mxu1 %v9724_v29 }
 0x376   : > { %v6666_v38 = vpop.f32.mrb[20].mxu1  ;;  %2202 = vmax.xlane.f32.xlu0 %v2201_v10  ;;  %2361 = vmax.xlane.f32.xlu1 %v2360_v25  ;;  %v6668_v26 = vpop.f32.mrb[112].mxu0 }
 0x377   : > { %v6670_v28 = vpop.f32.mrb[21].mxu1  ;;  %v6672_v59 = vpop.f32.mrb[113].mxu0 }
 0x378   : > { %v6674_v30 = vpop.f32.mrb[22].mxu1  ;;  %v2204_v49 = vmax.f32 %v6666_v38, %v6670_v28  ;;  %v6678_v52 = vpop.f32.mrb[114].mxu0  ;;  %v2366_v37 = vmax.f32 %v6668_v26, %v6672_v59 }
 0x379   : > { %9725 = vst [vmem:[#allocation46_spill] sm:$0xff] %v6678_v52  ;;  %v6682_v50 = vpop.f32.mrb[23].mxu1  ;;  %v6684_v10 = vpop.f32.mrb[115].mxu0 }
 0x37a   : > { %9726 = vst [vmem:[#allocation47_spill] sm:$0xff] %v6684_v10  ;;  %2205 = vmax.xlane.f32.xlu1 %v2204_v49  ;;  %2364 = vmax.xlane.f32.xlu0 %v2363_v36  ;;  %v2207_v25 = vmax.f32 %v6674_v30, %v6682_v50  ;;  %v2369_v54 = vmax.f32 %v6678_v52, %v6684_v10  ;;  %v1902_v14 = vpop.trf.xlu1 }
 0x37b   : > { %4810 = vmatmul.mubr.msk.bf16.gmra.mrb[128].mxu1 %vm1101_vm3, %v1899_v16 }
 0x37c   : > { %2031 = vmatprep.mubr.bf16.mxu1 %v9724_v29 }
 0x37e   : > { %2208 = vmax.xlane.f32.xlu0 %v2207_v25  ;;  %v6692_v44 = vpop.f32.mrb[24].mxu1  ;;  %2367 = vmax.xlane.f32.xlu1 %v2366_v37  ;;  %v6694_v42 = vpop.f32.mrb[116].mxu0 }
 0x37f   : > { %9727 = vst [vmem:[#allocation48_spill] sm:$0xff] %v6692_v44  ;;  %9728 = vst [vmem:[#allocation49_spill] sm:$0xff] %v6694_v42  ;;  %v6696_v46 = vpop.f32.mrb[25].mxu1  ;;  %v6698_v36 = vpop.f32.mrb[117].mxu0 }
 0x380   : > { %9729 = vst [vmem:[#allocation50_spill] sm:$0xff] %v6696_v46  ;;  %9730 = vst [vmem:[#allocation51_spill] sm:$0xff] %v6698_v36  ;;  %v6700_v49 = vpop.f32.mrb[26].mxu1  ;;  %v2372_v12 = vmax.f32 %v6694_v42, %v6698_v36  ;;  %v6704_v21 = vpop.f32.mrb[118].mxu0  ;;  %v2210_v16 = vmax.f32 %v6692_v44, %v6696_v46 }
 0x381   : > { %9731 = vst [vmem:[#allocation52_spill] sm:$0xff] %v6700_v49  ;;  %9732 = vst [vmem:[#allocation53_spill] sm:$0xff] %v6704_v21  ;;  %v6708_v25 = vpop.f32.mrb[27].mxu1  ;;  %v6710_v18 = vpop.f32.mrb[119].mxu0 }
 0x382   : > { %9733 = vst [vmem:[#allocation54_spill] sm:$0xff] %v6708_v25  ;;  %9734 = vst [vmem:[#allocation55_spill] sm:$0xff] %v6710_v18  ;;  %2370 = vmax.xlane.f32.xlu0 %v2369_v54  ;;  %v2213_v37 = vmax.f32 %v6700_v49, %v6708_v25  ;;  %2211 = vmax.xlane.f32.xlu1 %v2210_v16  ;;  %v2375_v22 = vmax.f32 %v6704_v21, %v6710_v18 }
 0x383   : > { %4811 = vmatmul.mubr.msk.bf16.gmra.mrb[132].mxu1 %vm1101_vm3, %v1900_v35 }
 0x384   : > { %2041 = vmatprep.mubr.bf16.mxu1 %v9724_v29 }
 0x386   : > { %2214 = vmax.xlane.f32.xlu0 %v2213_v37  ;;  %v6718_v2 = vpop.f32.mrb[28].mxu1  ;;  %2373 = vmax.xlane.f32.xlu1 %v2372_v12  ;;  %v6720_v36 = vpop.f32.mrb[120].mxu0 }
 0x387   : > { %9735 = vst [vmem:[#allocation56_spill] sm:$0xff] %v6718_v2  ;;  %9736 = vst [vmem:[#allocation57_spill] sm:$0xff] %v6720_v36  ;;  %v6722_v42 = vpop.f32.mrb[29].mxu1  ;;  %v6724_v54 = vpop.f32.mrb[121].mxu0 }
 0x388   : > { %9737 = vst [vmem:[#allocation58_spill] sm:$0xff] %v6722_v42  ;;  %9738 = vst [vmem:[#allocation59_spill] sm:$0xff] %v6724_v54  ;;  %v2216_v16 = vmax.f32 %v6718_v2, %v6722_v42  ;;  %v6728_v25 = vpop.f32.mrb[30].mxu1  ;;  %v2378_v35 = vmax.f32 %v6720_v36, %v6724_v54  ;;  %v6732_v18 = vpop.f32.mrb[122].mxu0 }
 0x389   : > { %9739 = vst [vmem:[#allocation60_spill] sm:$0xff] %v6728_v25  ;;  %9740 = vst [vmem:[#allocation61_spill] sm:$0xff] %v6732_v18  ;;  %v6734_v37 = vpop.f32.mrb[31].mxu1  ;;  %v6736_v21 = vpop.f32.mrb[123].mxu0 }
 0x38a   : > { %9741 = vst [vmem:[#allocation62_spill] sm:$0xff] %v6734_v37  ;;  %9742 = vst [vmem:[#allocation63_spill] sm:$0xff] %v6736_v21  ;;  %2376 = vmax.xlane.f32.xlu0 %v2375_v22  ;;  %v2219_v12 = vmax.f32 %v6728_v25, %v6734_v37  ;;  %2217 = vmax.xlane.f32.xlu1 %v2216_v16  ;;  %v2381_v49 = vmax.f32 %v6732_v18, %v6736_v21  ;;  %v1903_v42 = vpop.trf.xlu1 }
 0x38b   : > { %4812 = vmatmul.mubr.msk.bf16.gmra.mrb[136].mxu1 %vm1101_vm3, %v1901_v41 }
 0x38c   : > { %2051 = vmatprep.mubr.bf16.mxu1 %v9724_v29 }
 0x38e   : > { %2220 = vmax.xlane.f32.xlu0 %v2219_v12  ;;  %v6744_v54 = vpop.f32.mrb[32].mxu1  ;;  %2379 = vmax.xlane.f32.xlu1 %v2378_v35  ;;  %v6746_v36 = vpop.f32.mrb[124].mxu0 }
 0x38f   : > { %9743 = vst [vmem:[#allocation64_spill] sm:$0xff] %v6744_v54  ;;  %9744 = vst [vmem:[#allocation65_spill] sm:$0xff] %v6746_v36  ;;  %v6748_v2 = vpop.f32.mrb[33].mxu1  ;;  %v6750_v22 = vpop.f32.mrb[125].mxu0 }
 0x390   : > { %9745 = vst [vmem:[#allocation66_spill] sm:$0xff] %v6748_v2  ;;  %9746 = vst [vmem:[#allocation67_spill] sm:$0xff] %v6750_v22  ;;  %v2222_v16 = vmax.f32 %v6744_v54, %v6748_v2  ;;  %v6754_v37 = vpop.f32.mrb[34].mxu1  ;;  %v2384_v41 = vmax.f32 %v6746_v36, %v6750_v22  ;;  %v6758_v21 = vpop.f32.mrb[126].mxu0 }
 0x391   : > { %9747 = vst [vmem:[#allocation68_spill] sm:$0xff] %v6754_v37  ;;  %9748 = vst [vmem:[#allocation69_spill] sm:$0xff] %v6758_v21  ;;  %v6760_v12 = vpop.f32.mrb[35].mxu1  ;;  %v6762_v18 = vpop.f32.mrb[127].mxu0 }
 0x392   : > { %9749 = vst [vmem:[#allocation70_spill] sm:$0xff] %v6760_v12  ;;  %9750 = vst [vmem:[#allocation71_spill] sm:$0xff] %v6762_v18  ;;  %2382 = vmax.xlane.f32.xlu0 %v2381_v49  ;;  %v2225_v35 = vmax.f32 %v6754_v37, %v6760_v12  ;;  %2223 = vmax.xlane.f32.xlu1 %v2222_v16  ;;  %v2387_v25 = vmax.f32 %v6758_v21, %v6762_v18  ;;  %v1904_v2 = vpop.trf.xlu1 }
 0x393   : > { %4813 = vmatmul.mubr.msk.bf16.gmra.mrb[140].mxu1 %vm1101_vm3, %v1902_v14 }
 0x394   : > { %2061 = vmatprep.mubr.bf16.mxu1 %v9724_v29 }
 0x396   : > { %2226 = vmax.xlane.f32.xlu0 %v2225_v35  ;;  %v6770_v22 = vpop.f32.mrb[36].mxu1  ;;  %2385 = vmax.xlane.f32.xlu1 %v2384_v41  ;;  %v6772_v36 = vpop.f32.mrb[128].mxu0 }
 0x397   : > { %9751 = vst [vmem:[#allocation72_spill] sm:$0xff] %v6770_v22  ;;  %9752 = vst [vmem:[#allocation73_spill] sm:$0xff] %v6772_v36  ;;  %v6774_v54 = vpop.f32.mrb[37].mxu1  ;;  %v6776_v49 = vpop.f32.mrb[129].mxu0 }
 0x398   : > { %9753 = vst [vmem:[#allocation74_spill] sm:$0xff] %v6774_v54  ;;  %9754 = vst [vmem:[#allocation75_spill] sm:$0xff] %v6776_v49  ;;  %v2228_v16 = vmax.f32 %v6770_v22, %v6774_v54  ;;  %v6780_v12 = vpop.f32.mrb[38].mxu1  ;;  %v2390_v14 = vmax.f32 %v6772_v36, %v6776_v49  ;;  %v6784_v18 = vpop.f32.mrb[130].mxu0 }
 0x399   : > { %9755 = vst [vmem:[#allocation76_spill] sm:$0xff] %v6780_v12  ;;  %9756 = vst [vmem:[#allocation77_spill] sm:$0xff] %v6784_v18  ;;  %v6786_v35 = vpop.f32.mrb[39].mxu1  ;;  %v6788_v21 = vpop.f32.mrb[131].mxu0 }
 0x39a   : > { %9757 = vst [vmem:[#allocation78_spill] sm:$0xff] %v6786_v35  ;;  %9758 = vst [vmem:[#allocation79_spill] sm:$0xff] %v6788_v21  ;;  %2388 = vmax.xlane.f32.xlu0 %v2387_v25  ;;  %v2231_v41 = vmax.f32 %v6780_v12, %v6786_v35  ;;  %2229 = vmax.xlane.f32.xlu1 %v2228_v16  ;;  %v2393_v37 = vmax.f32 %v6784_v18, %v6788_v21  ;;  %v1913_v54 = vpop.trf.xlu1 }
 0x39b   : > { %4814 = vmatmul.mubr.msk.bf16.gmra.mrb[144].mxu1 %vm1101_vm3, %v1903_v42 }
 0x39c   : > { %2071 = vmatprep.mubr.bf16.mxu1 %v9724_v29 }
 0x39e   : > { %2232 = vmax.xlane.f32.xlu0 %v2231_v41  ;;  %v6796_v49 = vpop.f32.mrb[40].mxu1  ;;  %2391 = vmax.xlane.f32.xlu1 %v2390_v14  ;;  %v6798_v36 = vpop.f32.mrb[132].mxu0 }
 0x39f   : > { %9759 = vst [vmem:[#allocation80_spill] sm:$0xff] %v6796_v49  ;;  %9760 = vst [vmem:[#allocation81_spill] sm:$0xff] %v6798_v36  ;;  %v6800_v22 = vpop.f32.mrb[41].mxu1  ;;  %v6802_v25 = vpop.f32.mrb[133].mxu0 }
 0x3a0   : > { %9761 = vst [vmem:[#allocation82_spill] sm:$0xff] %v6800_v22  ;;  %9762 = vst [vmem:[#allocation83_spill] sm:$0xff] %v6802_v25  ;;  %v2234_v16 = vmax.f32 %v6796_v49, %v6800_v22  ;;  %v6806_v35 = vpop.f32.mrb[42].mxu1  ;;  %v2396_v42 = vmax.f32 %v6798_v36, %v6802_v25  ;;  %v6810_v21 = vpop.f32.mrb[134].mxu0 }
 0x3a1   : > { %9763 = vst [vmem:[#allocation84_spill] sm:$0xff] %v6806_v35  ;;  %9764 = vst [vmem:[#allocation85_spill] sm:$0xff] %v6810_v21  ;;  %v6812_v41 = vpop.f32.mrb[43].mxu1  ;;  %v6814_v18 = vpop.f32.mrb[135].mxu0 }
 0x3a2   : > { %9765 = vst [vmem:[#allocation86_spill] sm:$0xff] %v6812_v41  ;;  %9766 = vst [vmem:[#allocation87_spill] sm:$0xff] %v6814_v18  ;;  %2394 = vmax.xlane.f32.xlu0 %v2393_v37  ;;  %v2237_v14 = vmax.f32 %v6806_v35, %v6812_v41  ;;  %2235 = vmax.xlane.f32.xlu1 %v2234_v16  ;;  %v2399_v12 = vmax.f32 %v6810_v21, %v6814_v18  ;;  %v1914_v22 = vpop.trf.xlu1 }
 0x3a3   : > { %4815 = vmatmul.mubr.msk.bf16.gmra.mrb[148].mxu1 %vm1101_vm3, %v1904_v2 }
 0x3a4   : > { %2081 = vmatprep.mubr.bf16.mxu1 %v9724_v29 }
 0x3a6   : > { %2238 = vmax.xlane.f32.xlu0 %v2237_v14  ;;  %v6822_v25 = vpop.f32.mrb[44].mxu1  ;;  %2397 = vmax.xlane.f32.xlu1 %v2396_v42  ;;  %v6824_v36 = vpop.f32.mrb[136].mxu0 }
 0x3a7   : > { %9767 = vst [vmem:[#allocation88_spill] sm:$0xff] %v6822_v25  ;;  %9768 = vst [vmem:[#allocation89_spill] sm:$0xff] %v6824_v36  ;;  %v6826_v49 = vpop.f32.mrb[45].mxu1  ;;  %v6828_v37 = vpop.f32.mrb[137].mxu0 }
 0x3a8   : > { %9769 = vst [vmem:[#allocation90_spill] sm:$0xff] %v6826_v49  ;;  %9770 = vst [vmem:[#allocation91_spill] sm:$0xff] %v6828_v37  ;;  %v2240_v16 = vmax.f32 %v6822_v25, %v6826_v49  ;;  %v6832_v41 = vpop.f32.mrb[46].mxu1  ;;  %v2402_v2 = vmax.f32 %v6824_v36, %v6828_v37  ;;  %v6836_v18 = vpop.f32.mrb[138].mxu0 }
 0x3a9   : > { %9771 = vst [vmem:[#allocation92_spill] sm:$0xff] %v6832_v41  ;;  %9772 = vst [vmem:[#allocation93_spill] sm:$0xff] %v6836_v18  ;;  %v6838_v14 = vpop.f32.mrb[47].mxu1  ;;  %v6840_v21 = vpop.f32.mrb[139].mxu0 }
 0x3aa   : > { %9773 = vst [vmem:[#allocation94_spill] sm:$0xff] %v6838_v14  ;;  %9774 = vst [vmem:[#allocation95_spill] sm:$0xff] %v6840_v21  ;;  %2400 = vmax.xlane.f32.xlu0 %v2399_v12  ;;  %v2243_v42 = vmax.f32 %v6832_v41, %v6838_v14  ;;  %v2405_v35 = vmax.f32 %v6836_v18, %v6840_v21  ;;  %2241 = vmax.xlane.f32.xlu1 %v2240_v16  ;;  %v1915_v49 = vpop.trf.xlu1 }
 0x3ab   : > { %4816 = vmatmul.mubr.msk.bf16.gmra.mrb[152].mxu1 %vm1101_vm3, %v1913_v54 }
 0x3ac   : > { %2091 = vmatprep.mubr.bf16.mxu1 %v9724_v29 }
 0x3ae   : > { %2244 = vmax.xlane.f32.xlu0 %v2243_v42  ;;  %v6848_v37 = vpop.f32.mrb[48].mxu1  ;;  %2403 = vmax.xlane.f32.xlu1 %v2402_v2  ;;  %v6850_v36 = vpop.f32.mrb[140].mxu0 }
 0x3af   : > { %9775 = vst [vmem:[#allocation96_spill] sm:$0xff] %v6848_v37  ;;  %9776 = vst [vmem:[#allocation97_spill] sm:$0xff] %v6850_v36  ;;  %v6852_v25 = vpop.f32.mrb[49].mxu1  ;;  %v6854_v12 = vpop.f32.mrb[141].mxu0 }
 0x3b0   : > { %9777 = vst [vmem:[#allocation98_spill] sm:$0xff] %v6852_v25  ;;  %9778 = vst [vmem:[#allocation99_spill] sm:$0xff] %v6854_v12  ;;  %v2246_v14 = vmax.f32 %v6848_v37, %v6852_v25  ;;  %v6858_v21 = vpop.f32.mrb[50].mxu1  ;;  %v2408_v54 = vmax.f32 %v6850_v36, %v6854_v12  ;;  %v6862_v16 = vpop.f32.mrb[142].mxu0 }
 0x3b1   : > { %9779 = vst [vmem:[#allocation100_spill] sm:$0xff] %v6858_v21  ;;  %9780 = vst [vmem:[#allocation101_spill] sm:$0xff] %v6862_v16  ;;  %v6864_v42 = vpop.f32.mrb[51].mxu1  ;;  %v6866_v18 = vpop.f32.mrb[143].mxu0 }
 0x3b2   : > { %9781 = vst [vmem:[#allocation102_spill] sm:$0xff] %v6864_v42  ;;  %9782 = vst [vmem:[#allocation103_spill] sm:$0xff] %v6866_v18  ;;  %2406 = vmax.xlane.f32.xlu0 %v2405_v35  ;;  %v2249_v2 = vmax.f32 %v6858_v21, %v6864_v42  ;;  %v2411_v41 = vmax.f32 %v6862_v16, %v6866_v18  ;;  %2247 = vmax.xlane.f32.xlu1 %v2246_v14  ;;  %v1916_v25 = vpop.trf.xlu1 }
 0x3b3   : > { %4817 = vmatmul.mubr.msk.bf16.gmra.mrb[156].mxu1 %vm1101_vm3, %v1914_v22 }
 0x3b4   : > { %2101 = vmatprep.mubr.bf16.mxu1 %v9724_v29 }
 0x3b6   : > { %2250 = vmax.xlane.f32.xlu0 %v2249_v2  ;;  %v6874_v12 = vpop.f32.mrb[52].mxu1  ;;  %2409 = vmax.xlane.f32.xlu1 %v2408_v54  ;;  %v6876_v36 = vpop.f32.mrb[144].mxu0 }
 0x3b7   : > { %9783 = vst [vmem:[#allocation104_spill] sm:$0xff] %v6874_v12  ;;  %9784 = vst [vmem:[#allocation105_spill] sm:$0xff] %v6876_v36  ;;  %v6878_v37 = vpop.f32.mrb[53].mxu1  ;;  %v6880_v35 = vpop.f32.mrb[145].mxu0 }
 0x3b8   : > { %9785 = vst [vmem:[#allocation106_spill] sm:$0xff] %v6878_v37  ;;  %9786 = vst [vmem:[#allocation107_spill] sm:$0xff] %v6880_v35  ;;  %v2252_v42 = vmax.f32 %v6874_v12, %v6878_v37  ;;  %v6884_v18 = vpop.f32.mrb[54].mxu1  ;;  %v2414_v22 = vmax.f32 %v6876_v36, %v6880_v35  ;;  %v6888_v14 = vpop.f32.mrb[146].mxu0 }
 0x3b9   : > { %9787 = vst [vmem:[#allocation108_spill] sm:$0xff] %v6884_v18  ;;  %9788 = vst [vmem:[#allocation109_spill] sm:$0xff] %v6888_v14  ;;  %v6890_v2 = vpop.f32.mrb[55].mxu1  ;;  %v6892_v16 = vpop.f32.mrb[147].mxu0 }
 0x3ba   : > { %9789 = vst [vmem:[#allocation110_spill] sm:$0xff] %v6890_v2  ;;  %9790 = vst [vmem:[#allocation111_spill] sm:$0xff] %v6892_v16  ;;  %2412 = vmax.xlane.f32.xlu0 %v2411_v41  ;;  %v2255_v54 = vmax.f32 %v6884_v18, %v6890_v2  ;;  %v2417_v21 = vmax.f32 %v6888_v14, %v6892_v16  ;;  %2253 = vmax.xlane.f32.xlu1 %v2252_v42  ;;  %v1917_v37 = vpop.trf.xlu1 }
 0x3bb   : > { %4818 = vmatmul.mubr.msk.bf16.gmra.mrb[160].mxu1 %vm1101_vm3, %v1915_v49 }
 0x3bc   : > { %2111 = vmatprep.mubr.bf16.mxu1 %v9724_v29 }
 0x3be   : > { %2256 = vmax.xlane.f32.xlu0 %v2255_v54  ;;  %v6900_v35 = vpop.f32.mrb[56].mxu1  ;;  %2415 = vmax.xlane.f32.xlu1 %v2414_v22  ;;  %v6902_v36 = vpop.f32.mrb[148].mxu0 }
 0x3bf   : > { %9791 = vst [vmem:[#allocation112_spill] sm:$0xff] %v6900_v35  ;;  %9792 = vst [vmem:[#allocation113_spill] sm:$0xff] %v6902_v36  ;;  %v6904_v12 = vpop.f32.mrb[57].mxu1  ;;  %v6906_v41 = vpop.f32.mrb[149].mxu0 }
 0x3c0   : > { %9793 = vst [vmem:[#allocation114_spill] sm:$0xff] %v6904_v12  ;;  %9794 = vst [vmem:[#allocation115_spill] sm:$0xff] %v6906_v41  ;;  %v2258_v2 = vmax.f32 %v6900_v35, %v6904_v12  ;;  %v2420_v42 = vmax.f32 %v6902_v36, %v6906_v41  ;;  %v6912_v49 = vpop.f32.mrb[58].mxu1  ;;  %v6914_v16 = vpop.f32.mrb[150].mxu0 }
 0x3c1   : > { %9795 = vst [vmem:[#allocation116_spill] sm:$0xff] %v6912_v49  ;;  %9796 = vst [vmem:[#allocation117_spill] sm:$0xff] %v6914_v16  ;;  %v6916_v54 = vpop.f32.mrb[59].mxu1  ;;  %v6918_v14 = vpop.f32.mrb[151].mxu0 }
 0x3c2   : > { %9797 = vst [vmem:[#allocation118_spill] sm:$0xff] %v6916_v54  ;;  %9798 = vst [vmem:[#allocation119_spill] sm:$0xff] %v6918_v14  ;;  %2418 = vmax.xlane.f32.xlu0 %v2417_v21  ;;  %v2261_v22 = vmax.f32 %v6912_v49, %v6916_v54  ;;  %2421 = vmax.xlane.f32.xlu1 %v2420_v42  ;;  %v2423_v18 = vmax.f32 %v6914_v16, %v6918_v14  ;;  %v1918_v12 = vpop.trf.xlu1 }
 0x3c3   : > { %4819 = vmatmul.mubr.msk.bf16.gmra.mrb[164].mxu1 %vm1101_vm3, %v1916_v25 }
 0x3c4   : > { %2121 = vmatprep.mubr.bf16.mxu1 %v9724_v29 }
 0x3c6   : > { %2259 = vmax.xlane.f32.xlu0 %v2258_v2  ;;  %v6926_v35 = vpop.f32.mrb[60].mxu1  ;;  %v6928_v41 = vpop.f32.mrb[152].mxu0 }
 0x3c7   : > { %9799 = vst [vmem:[#allocation120_spill] sm:$0xff] %v6926_v35  ;;  %9800 = vst [vmem:[#allocation121_spill] sm:$0xff] %v6928_v41  ;;  %v6930_v36 = vpop.f32.mrb[61].mxu1  ;;  %v6932_v21 = vpop.f32.mrb[153].mxu0 }
 0x3c8   : > { %9801 = vst [vmem:[#allocation122_spill] sm:$0xff] %v6930_v36  ;;  %9802 = vst [vmem:[#allocation123_spill] sm:$0xff] %v6932_v21  ;;  %v2264_v42 = vmax.f32 %v6926_v35, %v6930_v36  ;;  %v2426_v14 = vmax.f32 %v6928_v41, %v6932_v21  ;;  %v6938_v16 = vpop.f32.mrb[62].mxu1  ;;  %v6940_v25 = vpop.f32.mrb[154].mxu0 }
 0x3c9   : > { %9803 = vst [vmem:[#allocation124_spill] sm:$0xff] %v6938_v16  ;;  %9804 = vst [vmem:[#allocation125_spill] sm:$0xff] %v6940_v25  ;;  %v6942_v54 = vpop.f32.mrb[63].mxu1  ;;  %v6944_v2 = vpop.f32.mrb[155].mxu0 }
 0x3ca   : > { %9805 = vst [vmem:[#allocation126_spill] sm:$0xff] %v6942_v54  ;;  %9806 = vst [vmem:[#allocation127_spill] sm:$0xff] %v6944_v2  ;;  %2262 = vmax.xlane.f32.xlu0 %v2261_v22  ;;  %2265 = vmax.xlane.f32.xlu1 %v2264_v42  ;;  %v2267_v49 = vmax.f32 %v6938_v16, %v6942_v54  ;;  %v2429_v46 = vmax.f32 %v6940_v25, %v6944_v2  ;;  %v1919_v21 = vpop.trf.xlu1 }
 0x3cb   : > { %4820 = vmatmul.mubr.msk.bf16.gmra.mrb[168].mxu1 %vm1101_vm3, %v1917_v37 }
 0x3cc   : > { %2131 = vmatprep.mubr.bf16.mxu1 %v9724_v29 }
 0x3ce   : > { %2424 = vmax.xlane.f32.xlu0 %v2423_v18  ;;  %v6952_v41 = vpop.f32.mrb[64].mxu1  ;;  %2427 = vmax.xlane.f32.xlu1 %v2426_v14  ;;  %v6954_v36 = vpop.f32.mrb[156].mxu0 }
 0x3cf   : > { %9807 = vst [vmem:[#allocation128_spill] sm:$0xff] %v6952_v41  ;;  %9808 = vst [vmem:[#allocation129_spill] sm:$0xff] %v6954_v36  ;;  %v6956_v35 = vpop.f32.mrb[65].mxu1  ;;  %v6958_v22 = vpop.f32.mrb[157].mxu0 }
 0x3d0   : > { %9809 = vst [vmem:[#allocation130_spill] sm:$0xff] %v6956_v35  ;;  %9810 = vst [vmem:[#allocation131_spill] sm:$0xff] %v6958_v22  ;;  %v2270_v42 = vmax.f32 %v6952_v41, %v6956_v35  ;;  %v2432_v2 = vmax.f32 %v6954_v36, %v6958_v22  ;;  %v6964_v37 = vpop.f32.mrb[66].mxu1  ;;  %v6966_v25 = vpop.f32.mrb[158].mxu0 }
 0x3d1   : > { %9811 = vst [vmem:[#allocation132_spill] sm:$0xff] %v6964_v37  ;;  %9812 = vst [vmem:[#allocation133_spill] sm:$0xff] %v6966_v25  ;;  %v6968_v18 = vpop.f32.mrb[67].mxu1  ;;  %v6970_v54 = vpop.f32.mrb[159].mxu0 }
 0x3d2   : > { %9813 = vst [vmem:[#allocation134_spill] sm:$0xff] %v6968_v18  ;;  %9814 = vst [vmem:[#allocation135_spill] sm:$0xff] %v6970_v54  ;;  %2268 = vmax.xlane.f32.xlu0 %v2267_v49  ;;  %2271 = vmax.xlane.f32.xlu1 %v2270_v42  ;;  %v2273_v14 = vmax.f32 %v6964_v37, %v6968_v18  ;;  %v2435_v16 = vmax.f32 %v6966_v25, %v6970_v54  ;;  %v1920_v35 = vpop.trf.xlu1 }
 0x3d3   : > { %4821 = vmatmul.mubr.msk.bf16.gmra.mrb[172].mxu1 %vm1101_vm3, %v1918_v12 }
 0x3d4   : > { %2141 = vmatprep.mubr.bf16.mxu1 %v9724_v29 }
 0x3d6   : > { %2430 = vmax.xlane.f32.xlu0 %v2429_v46  ;;  %v6978_v22 = vpop.f32.mrb[68].mxu1  ;;  %2433 = vmax.xlane.f32.xlu1 %v2432_v2  ;;  %v6980_v36 = vpop.f32.mrb[160].mxu0 }
 0x3d7   : > { %9815 = vst [vmem:[#allocation136_spill] sm:$0xff] %v6978_v22  ;;  %9816 = vst [vmem:[#allocation137_spill] sm:$0xff] %v6980_v36  ;;  %v6982_v41 = vpop.f32.mrb[69].mxu1  ;;  %v2164_v49 = vpop.xlane.xlu0 %2163 }
 0x3d8   : > { %9817 = vst [vmem:[#allocation138_spill] sm:$0xff] %v6982_v41  ;;  %v2276_v42 = vmax.f32 %v6978_v22, %v6982_v41  ;;  %v2546_v18 = vsub.f32 %v6546_v61, %v2164_v49  ;;  %v2547_v54 = vsub.f32 %v6548_v45, %v2164_v49  ;;  %v6988_v12 = vpop.f32.mrb[161].mxu0  ;;  %v6990_v25 = vpop.f32.mrb[70].mxu1 }
 0x3d9   : > { %9818 = vst [vmem:[#allocation139_spill] sm:$0xff] %v6988_v12  ;;  %9819 = vst [vmem:[#allocation140_spill] sm:$0xff] %v6990_v25  ;;  %v2167_v46 = vpop.xlane.xlu1 %2166  ;;  %v2438_v2 = vmax.f32 %v6980_v36, %v6988_v12  ;;  %v6994_v37 = vpop.f32.mrb[71].mxu1 }
 0x3da   : > { %9820 = vst [vmem:[#allocation141_spill] sm:$0xff] %v6994_v37  ;;  %v2802_v44 = vmul.f32 1.442695, %v2546_v18  ;;  %v2804_v10 = vmul.f32 1.442695, %v2547_v54  ;;  %v2548_v52 = vsub.f32 %v6550_v1, %v2167_v46  ;;  %v2549_v41 = vsub.f32 %v6554_v57, %v2167_v46  ;;  %2274 = vmax.xlane.f32.xlu0 %v2273_v14  ;;  %2277 = vmax.xlane.f32.xlu1 %v2276_v42  ;;  %v6998_v61 = vpop.f32.mrb[162].mxu0 }
 0x3db   : > { %9821 = vst [vmem:[#allocation142_spill] sm:$0xff] %v6998_v61  ;;  %4822 = vmatmul.mubr.msk.bf16.gmra.mrb[176].mxu1 %vm1101_vm3, %v1919_v21  ;;  %v2279_v45 = vmax.f32 %v6990_v25, %v6994_v37  ;;  %v7003_v49 = vpop.f32.mrb[163].mxu0  ;;  %v9922_v25 = vld [vmem:[#allocation82_spill] sm:$0xff] }
 0x3dc   : > { %9822 = vst [vmem:[#allocation143_spill] sm:$0xff] %v7003_v49  ;;  %4971 = vpow2.f32 %v2802_v44  ;;  %v2806_v12 = vmul.f32 1.442695, %v2548_v52  ;;  %v2808_v36 = vmul.f32 1.442695, %v2549_v41  ;;  %2151 = vmatprep.mubr.bf16.mxu1 %v9724_v29  ;;  %v2441_v1 = vmax.f32 %v6998_v61, %v7003_v49 }
 0x3dd   : > { %4973 = vpow2.f32 %v2804_v10 }
 0x3de   : > { %4975 = vpow2.f32 %v2806_v12  ;;  %2436 = vmax.xlane.f32.xlu0 %v2435_v16  ;;  %v7008_v57 = vpop.f32.mrb[72].mxu1  ;;  %2439 = vmax.xlane.f32.xlu1 %v2438_v2  ;;  %v7010_v54 = vpop.f32.mrb[164].mxu0 }
 0x3df   : > { %9823 = vst [vmem:[#allocation144_spill] sm:$0xff] %v7008_v57  ;;  %9824 = vst [vmem:[#allocation145_spill] sm:$0xff] %v7010_v54  ;;  %4977 = vpow2.f32 %v2808_v36  ;;  %v2170_v21 = vpop.xlane.xlu0 %2169  ;;  %v7012_v18 = vpop.f32.mrb[73].mxu1 }
 0x3e0   : > { %9825 = vst [vmem:[#allocation146_spill] sm:$0xff] %v7012_v18  ;;  %v2550_v44 = vsub.f32 %v6560_v3, %v2170_v21  ;;  %v2551_v52 = vsub.f32 %v6564_v7, %v2170_v21  ;;  %v2282_v41 = vmax.f32 %v7008_v57, %v7012_v18  ;;  %v7018_v14 = vpop.f32.mrb[165].mxu0  ;;  %v7020_v10 = vpop.f32.mrb[74].mxu1 }
 0x3e1   : > { %9826 = vst [vmem:[#allocation147_spill] sm:$0xff] %v7018_v14  ;;  %9827 = vst [vmem:[#allocation148_spill] sm:$0xff] %v7020_v10  ;;  %v2444_v16 = vmax.f32 %v7010_v54, %v7018_v14  ;;  %v7024_v42 = vpop.f32.mrb[75].mxu1  ;;  %v7026_v36 = vpop.f32.mrb[166].mxu0 }
 0x3e2   : > { %9828 = vst [vmem:[#allocation149_spill] sm:$0xff] %v7024_v42  ;;  %9829 = vst [vmem:[#allocation150_spill] sm:$0xff] %v7026_v36  ;;  %v2810_v12 = vmul.f32 1.442695, %v2550_v44  ;;  %v2812_v46 = vmul.f32 1.442695, %v2551_v52  ;;  %2280 = vmax.xlane.f32.xlu0 %v2279_v45  ;;  %2283 = vmax.xlane.f32.xlu1 %v2282_v41  ;;  %v2285_v3 = vmax.f32 %v7020_v10, %v7024_v42 }
 0x3e3   : > { %v7030_v7 = vpop.f32.mrb[167].mxu0  ;;  %4823 = vmatmul.mubr.msk.bf16.gmra.mrb[180].mxu1 %vm1101_vm3, %v1920_v35  ;;  %v2176_v2 = vpop.xlane.xlu0 %2175  ;;  %v9831_v45 = vpack.c.bf16 %v6395_v32, %v6391_v27 }
 0x3e4   : > { %9830 = vst [vmem:[#allocation151_spill] sm:$0xff] %v7030_v7  ;;  %v2447_v21 = vmax.f32 %v7026_v36, %v7030_v7  ;;  %4979 = vpow2.f32 %v2810_v12  ;;  %v2554_v29 = vsub.f32 %v6562_v4, %v2176_v2  ;;  %v2555_v14 = vsub.f32 %v6566_v9, %v2176_v2  ;;  %v9904_v36 = vld [vmem:[#allocation74_spill] sm:$0xff] }
 0x3e5   : > { %4039 = vmatprep.mubr.bf16.mxu1 %v9831_v45  ;;  %4981 = vpow2.f32 %v2812_v46 }
 0x3e6   : > { %v4972_v44 = vpop.eup %4971  ;;  %v2818_v52 = vmul.f32 1.442695, %v2554_v29  ;;  %v2820_v41 = vmul.f32 1.442695, %v2555_v14  ;;  %2442 = vmax.xlane.f32.xlu0 %v2441_v1  ;;  %2445 = vmax.xlane.f32.xlu1 %v2444_v16  ;;  %v7040_v35 = vpop.f32.mrb[76].mxu1 }
 0x3e7   : > { %9832 = vst [vmem:[#allocation152_spill] sm:$0xff] %v7040_v35  ;;  %v4974_v42 = vpop.eup %4973  ;;  %v2173_v10 = vpop.xlane.xlu0 %2172 }
 0x3e8   : > { %v7042_v7 = vpop.f32.mrb[77].mxu1  ;;  %v4976_v12 = vpop.eup %4975  ;;  %4983 = vpow2.f32 %v2818_v52  ;;  %v2552_v4 = vsub.f32 %v6572_v53, %v2173_v10  ;;  %v2553_v9 = vsub.f32 %v6576_v6, %v2173_v10  ;;  %v3314_v27 = vadd.f32 %v4974_v42, %v4972_v44 }
 0x3e9   : > { %9833 = vst [vmem:[#allocation153_spill] sm:$0xff] %v7042_v7  ;;  %v7046_v32 = vpop.f32.mrb[78].mxu1  ;;  %v4978_v46 = vpop.eup %4977  ;;  %4985 = vpow2.f32 %v2820_v41  ;;  %v2288_v29 = vmax.f32 %v7040_v35, %v7042_v7  ;;  %v3826_v1 = vpack.c.bf16 %v4976_v12, %v4972_v44 }
 0x3ea   : > { %9834 = vst [vmem:[#allocation154_spill] sm:$0xff] %v7046_v32  ;;  %v7050_v14 = vpop.f32.mrb[79].mxu1  ;;  %v2814_v16 = vmul.f32 1.442695, %v2552_v4  ;;  %v2816_v2 = vmul.f32 1.442695, %v2553_v9  ;;  %2286 = vmax.xlane.f32.xlu0 %v2285_v3  ;;  %v3827_v45 = vpack.c.bf16 %v4978_v46, %v4974_v42  ;;  %3315 = vadd.xlane.f32.xlu1 %v3314_v27  ;;  %v3317_v52 = vadd.f32 %v4978_v46, %v4976_v12 }
 0x3eb   : > { %9835 = vst [vmem:[#allocation155_spill] sm:$0xff] %v7050_v14  ;;  %v2179_v53 = vpop.xlane.xlu0 %2178  ;;  %v2291_v6 = vmax.f32 %v7046_v32, %v7050_v14  ;;  %v9895_v14 = vld [vmem:[#allocation67_spill] sm:$0xff] }
 0x3ec   : > { %4987 = vpow2.f32 %v2814_v16  ;;  %v2556_v10 = vsub.f32 %v6574_v17, %v2179_v53  ;;  %v2557_v41 = vsub.f32 %v6578_v19, %v2179_v53  ;;  %3954 = vmatprep.subr.bf16.mxu0 %v3827_v45 }
 0x3ed   : > { %4989 = vpow2.f32 %v2816_v2  ;;  %3955 = vmatpush1.bf16.xpose.msra.mxu0 %v3826_v1 }
 0x3ee   : > { %v7056_v44 = vpop.eup %4979  ;;  %v2822_v4 = vmul.f32 1.442695, %v2556_v10  ;;  %v2824_v9 = vmul.f32 1.442695, %v2557_v41  ;;  %2448 = vmax.xlane.f32.xlu0 %v2447_v21  ;;  %2289 = vmax.xlane.f32.xlu1 %v2288_v29  ;;  %v7058_v42 = vpop.f32.mrb[80].mxu1 }
 0x3ef   : > { %9836 = vst [vmem:[#allocation156_spill] sm:$0xff] %v7058_v42  ;;  %v4982_v3 = vpop.eup %4981  ;;  %v2182_v12 = vpop.xlane.xlu0 %2181 }
 0x3f0   : > { %v2188_v27 = vpop.xlane.xlu1 %2187  ;;  %4991 = vpow2.f32 %v2822_v4  ;;  %v2558_v46 = vsub.f32 %v6586_v60, %v2182_v12  ;;  %v2559_v17 = vsub.f32 %v6588_v51, %v2182_v12  ;;  %v7063_v16 = vpop.f32.mrb[81].mxu1  ;;  %v3320_v21 = vadd.f32 %v4982_v3, %v7056_v44 }
 0x3f1   : > { %v2562_v19 = vsub.f32 %v6600_v11, %v2188_v27  ;;  %9837 = vst [vmem:[#allocation157_spill] sm:$0xff] %v7063_v16  ;;  %4993 = vpow2.f32 %v2824_v9  ;;  %v2563_v1 = vsub.f32 %v6602_v33, %v2188_v27  ;;  %v2294_v29 = vmax.f32 %v7058_v42, %v7063_v16  ;;  %v7069_v2 = vpop.f32.mrb[82].mxu1  ;;  %v9886_v42 = vld [vmem:[#allocation66_spill] sm:$0xff] }
 0x3f2   : > { %9838 = vst [vmem:[#allocation158_spill] sm:$0xff] %v7069_v2  ;;  %v7071_v45 = vpop.eup %4983  ;;  %v2826_v53 = vmul.f32 1.442695, %v2558_v46  ;;  %v2828_v60 = vmul.f32 1.442695, %v2559_v17  ;;  %3318 = vadd.xlane.f32.xlu0 %v3317_v52  ;;  %3321 = vadd.xlane.f32.xlu1 %v3320_v21  ;;  %v7075_v4 = vpop.f32.mrb[83].mxu1 }
 0x3f3   : > { %v2834_v10 = vmul.f32 1.442695, %v2562_v19  ;;  %v7073_v51 = vpop.eup %4985  ;;  %v2836_v11 = vmul.f32 1.442695, %v2563_v1  ;;  %v2185_v41 = vpop.xlane.xlu0 %2184  ;;  %9839 = vst [vmem:[#allocation159_spill] sm:$0xff] %v7075_v4 }
 0x3f4   : > { %4995 = vpow2.f32 %v2826_v53  ;;  %v2560_v33 = vsub.f32 %v6590_v15, %v2185_v41  ;;  %v2561_v9 = vsub.f32 %v6594_v39, %v2185_v41  ;;  %v3326_v12 = vadd.f32 %v7073_v51, %v7071_v45 }
 0x3f5   : > { %4997 = vpow2.f32 %v2828_v60 }
 0x3f6   : > { %v4988_v52 = vpop.eup %4987  ;;  %4999 = vpow2.f32 %v2834_v10  ;;  %v2830_v46 = vmul.f32 1.442695, %v2560_v33  ;;  %v2832_v17 = vmul.f32 1.442695, %v2561_v9  ;;  %2292 = vmax.xlane.f32.xlu0 %v2291_v6  ;;  %v7083_v19 = vpop.f32.mrb[84].mxu1  ;;  %3327 = vadd.xlane.f32.xlu1 %v3326_v12 }
 0x3f7   : > { %9840 = vst [vmem:[#allocation160_spill] sm:$0xff] %v7083_v19  ;;  %v4990_v1 = vpop.eup %4989  ;;  %5001 = vpow2.f32 %v2836_v11  ;;  %v2194_v21 = vpop.xlane.xlu1 %2193  ;;  %v3828_v39 = vpack.c.bf16 %v4988_v52, %v7056_v44 }
 0x3f8   : > { %v2191_v15 = vpop.xlane.xlu0 %2190  ;;  %5003 = vpow2.f32 %v2830_v46  ;;  %v2566_v53 = vsub.f32 %v6614_v48, %v2194_v21  ;;  %v2567_v60 = vsub.f32 %v6618_v24, %v2194_v21  ;;  %v7089_v10 = vpop.f32.mrb[85].mxu1  ;;  %v3829_v33 = vpack.c.bf16 %v4990_v1, %v4982_v3 }
 0x3f9   : > { %v2564_v41 = vsub.f32 %v6604_v55, %v2191_v15  ;;  %9841 = vst [vmem:[#allocation161_spill] sm:$0xff] %v7089_v10  ;;  %5005 = vpow2.f32 %v2832_v17  ;;  %v2565_v6 = vsub.f32 %v6608_v47, %v2191_v15  ;;  %v3323_v9 = vadd.f32 %v4990_v1, %v4988_v52  ;;  %v7092_v11 = vpop.f32.mrb[86].mxu1 }
 0x3fa   : > { %9842 = vst [vmem:[#allocation162_spill] sm:$0xff] %v7092_v11  ;;  %v4992_v27 = vpop.eup %4991  ;;  %v2842_v12 = vmul.f32 1.442695, %v2566_v53  ;;  %v2844_v16 = vmul.f32 1.442695, %v2567_v60  ;;  %v2300_v48 = vmax.f32 %v7083_v19, %v7089_v10  ;;  %3956 = vmatprep.subr.bf16.mxu0 %v3829_v33  ;;  %2295 = vmax.xlane.f32.xlu1 %v2294_v29  ;;  %v7100_v1 = vpop.f32.mrb[87].mxu1 }
 0x3fb   : > { %v2838_v44 = vmul.f32 1.442695, %v2564_v41  ;;  %v4994_v46 = vpop.eup %4993  ;;  %v2840_v24 = vmul.f32 1.442695, %v2565_v6  ;;  %3324 = vadd.xlane.f32.xlu0 %v3323_v9  ;;  %v2356_v21 = vpop.xlane.xlu1 %2355  ;;  %v3830_v17 = vpack.c.bf16 %v4992_v27, %v7071_v45  ;;  %3957 = vmatpush1.bf16.xpose.msra.mxu0 %v3828_v39  ;;  %9843 = vst [vmem:[#allocation163_spill] sm:$0xff] %v7100_v1  ;;  %v9878_v19 = vld [vmem:[#allocation59_spill] sm:$0xff] }
 0x3fc   : > { %v2197_v55 = vpop.xlane.xlu0 %2196  ;;  %5007 = vpow2.f32 %v2842_v12  ;;  %v2674_v52 = vsub.f32 %v6616_v23, %v2356_v21  ;;  %v2675_v15 = vsub.f32 %v6620_v8, %v2356_v21  ;;  %v3831_v53 = vpack.c.bf16 %v4994_v46, %v7073_v51 }
 0x3fd   : > { %v2568_v47 = vsub.f32 %v6622_v34, %v2197_v55  ;;  %v2569_v3 = vsub.f32 %v6630_v0, %v2197_v55  ;;  %5009 = vpow2.f32 %v2844_v16  ;;  %v3329_v60 = vadd.f32 %v4994_v46, %v4992_v27 }
 0x3fe   : > { %v7104_v41 = vpop.eup %4995  ;;  %5011 = vpow2.f32 %v2838_v44  ;;  %v3058_v6 = vmul.f32 1.442695, %v2674_v52  ;;  %v3060_v0 = vmul.f32 1.442695, %v2675_v15  ;;  %3958 = vmatprep.subr.bf16.mxu0 %v3831_v53  ;;  %v2303_v16 = vmax.f32 %v7092_v11, %v7100_v1  ;;  %v7113_v9 = vpop.f32.mrb[88].mxu1 }
 0x3ff   : > { %v2846_v45 = vmul.f32 1.442695, %v2568_v47  ;;  %v2848_v39 = vmul.f32 1.442695, %v2569_v3  ;;  %v4998_v34 = vpop.eup %4997  ;;  %5013 = vpow2.f32 %v2840_v24  ;;  %3330 = vadd.xlane.f32.xlu0 %v3329_v60  ;;  %v2200_v23 = vpop.xlane.xlu1 %2199  ;;  %9844 = vst [vmem:[#allocation164_spill] sm:$0xff] %v7113_v9  ;;  %v9846_v3 = vmax.f32 %v7069_v2, %v7075_v4 }
 0x400   : > { %v2359_v29 = vpop.xlane.xlu0 %2358  ;;  %v7108_v8 = vpop.eup %4999  ;;  %v2570_v51 = vsub.f32 %v6640_v43, %v2200_v23  ;;  %v2571_v27 = vsub.f32 %v6644_v62, %v2200_v23  ;;  %v3332_v46 = vadd.f32 %v4998_v34, %v7104_v41 }
 0x401   : > { %5015 = vpow2.f32 %v2846_v45  ;;  %v2676_v33 = vsub.f32 %v6628_v63, %v2359_v29  ;;  %v7115_v12 = vpop.eup %5001  ;;  %v2677_v44 = vsub.f32 %v6632_v20, %v2359_v29  ;;  %v7119_v24 = vpop.f32.mrb[89].mxu1 }
 0x402   : > { %5017 = vpow2.f32 %v2848_v39  ;;  %9845 = vst [vmem:[#allocation165_spill] sm:$0xff] %v7119_v24  ;;  %v7121_v55 = vpop.eup %5003  ;;  %v2850_v21 = vmul.f32 1.442695, %v2570_v51  ;;  %v2852_v43 = vmul.f32 1.442695, %v2571_v27  ;;  %3333 = vadd.xlane.f32.xlu1 %v3332_v46  ;;  %v3338_v15 = vadd.f32 %v7115_v12, %v7108_v8 }
 0x403   : > { %5019 = vpow2.f32 %v3058_v6  ;;  %v3062_v47 = vmul.f32 1.442695, %v2676_v33  ;;  %v5006_v62 = vpop.eup %5005  ;;  %v3064_v63 = vmul.f32 1.442695, %v2677_v44  ;;  %2298 = vmax.xlane.f32.xlu0 %v9846_v3  ;;  %v2362_v20 = vpop.xlane.xlu1 %2361  ;;  %v2306_v53 = vmax.f32 %v7113_v9, %v7119_v24  ;;  %3959 = vmatpush1.bf16.xpose.msra.mxu0 %v3830_v17 }
 0x404   : > { %5021 = vpow2.f32 %v3060_v0  ;;  %v2203_v52 = vpop.xlane.xlu0 %2202  ;;  %v2678_v39 = vsub.f32 %v6642_v58, %v2362_v20  ;;  %v7133_v6 = vpop.f32.mrb[90].mxu1  ;;  %v2679_v0 = vsub.f32 %v6646_v13, %v2362_v20  ;;  %v3833_v23 = vpack.c.bf16 %v5006_v62, %v4998_v34 }
 0x405   : > { %5023 = vpow2.f32 %v2850_v21  ;;  %v2572_v60 = vsub.f32 %v6648_v56, %v2203_v52  ;;  %v2573_v45 = vsub.f32 %v6656_v31, %v2203_v52  ;;  %9847 = vst [vmem:[#allocation166_spill] sm:$0xff] %v7133_v6  ;;  %v3335_v29 = vadd.f32 %v5006_v62, %v7121_v55  ;;  %v7137_v51 = vpop.f32.mrb[91].mxu1 }
 0x406   : > { %5025 = vpow2.f32 %v2852_v43  ;;  %9848 = vst [vmem:[#allocation167_spill] sm:$0xff] %v7137_v51  ;;  %v7139_v27 = vpop.eup %5007  ;;  %v3066_v56 = vmul.f32 1.442695, %v2678_v39  ;;  %v3068_v31 = vmul.f32 1.442695, %v2679_v0  ;;  %3960 = vmatprep.subr.bf16.mxu0 %v3833_v23  ;;  %2301 = vmax.xlane.f32.xlu1 %v2300_v48  ;;  %v3832_v34 = vpack.c.bf16 %v7121_v55, %v7104_v41 }
 0x407   : > { %5027 = vpow2.f32 %v3062_v47  ;;  %v2854_v17 = vmul.f32 1.442695, %v2572_v60  ;;  %v2856_v33 = vmul.f32 1.442695, %v2573_v45  ;;  %v7141_v44 = vpop.eup %5009  ;;  %v2206_v58 = vpop.xlane.xlu1 %2205  ;;  %v2309_v46 = vmax.f32 %v7133_v6, %v7137_v51  ;;  %3336 = vadd.xlane.f32.xlu0 %v3335_v29  ;;  %v9869_v6 = vld [vmem:[#allocation58_spill] sm:$0xff] }
 0x408   : > { %5029 = vpow2.f32 %v3064_v63  ;;  %v2365_v13 = vpop.xlane.xlu0 %2364  ;;  %v7150_v21 = vpop.eup %5011  ;;  %v2574_v43 = vsub.f32 %v6666_v38, %v2206_v58  ;;  %v2575_v47 = vsub.f32 %v6670_v28, %v2206_v58  ;;  %v7160_v41 = vadd.f32 %v7141_v44, %v7139_v27 }
 0x409   : > { %5031 = vpow2.f32 %v2854_v17  ;;  %v2680_v62 = vsub.f32 %v6654_v5, %v2365_v13  ;;  %v7155_v63 = vpop.f32.mrb[92].mxu1  ;;  %v5014_v48 = vpop.eup %5013  ;;  %v2681_v3 = vsub.f32 %v6658_v40, %v2365_v13  ;;  %v3834_v55 = vpack.c.bf16 %v7150_v21, %v7108_v8 }
 0x40a   : > { %9849 = vst [vmem:[#allocation168_spill] sm:$0xff] %v7155_v63  ;;  %5033 = vpow2.f32 %v2856_v33  ;;  %v7164_v52 = vpop.f32.mrb[93].mxu1  ;;  %v2858_v28 = vmul.f32 1.442695, %v2574_v43  ;;  %v2860_v5 = vmul.f32 1.442695, %v2575_v47  ;;  %3339 = vadd.xlane.f32.xlu1 %v3338_v15  ;;  %v3835_v40 = vpack.c.bf16 %v5014_v48, %v7115_v12 }
 0x40b   : > { %9850 = vst [vmem:[#allocation169_spill] sm:$0xff] %v7164_v52  ;;  %v7166_v38 = vpop.eup %5015  ;;  %5035 = vpow2.f32 %v3066_v56  ;;  %v3070_v20 = vmul.f32 1.442695, %v2680_v62  ;;  %v3072_v45 = vmul.f32 1.442695, %v2681_v3  ;;  %v3341_v0 = vadd.f32 %v5014_v48, %v7150_v21  ;;  %v2368_v23 = vpop.xlane.xlu1 %2367  ;;  %3961 = vmatpush1.bf16.xpose.msra.mxu0 %v3832_v34  ;;  %2304 = vmax.xlane.f32.xlu0 %v2303_v16 }
 0x40c   : > { %v7168_v60 = vpop.eup %5017  ;;  %5037 = vpow2.f32 %v3068_v31  ;;  %v2209_v39 = vpop.xlane.xlu0 %2208  ;;  %v2682_v15 = vsub.f32 %v6668_v26, %v2368_v23  ;;  %3962 = vmatprep.subr.bf16.mxu0 %v3835_v40  ;;  %v2683_v31 = vsub.f32 %v6672_v59, %v2368_v23  ;;  %v9855_v40 = vld [vmem:[#allocation48_spill] sm:$0xff] }
 0x40d   : > { %v7172_v29 = vpop.eup %5019  ;;  %5039 = vpow2.f32 %v2858_v28  ;;  %v2576_v17 = vsub.f32 %v6674_v30, %v2209_v39  ;;  %v2577_v33 = vsub.f32 %v6682_v50, %v2209_v39  ;;  %v7180_v56 = vpop.f32.mrb[94].mxu1  ;;  %v3837_v58 = vpack.c.bf16 %v7168_v60, %v7141_v44  ;;  %v9853_v28 = vld [vmem:[#allocation46_spill] sm:$0xff] }
 0x40e   : > { %9851 = vst [vmem:[#allocation170_spill] sm:$0xff] %v7180_v56  ;;  %v7182_v12 = vpop.eup %5021  ;;  %5041 = vpow2.f32 %v2860_v5  ;;  %v7189_v13 = vpop.f32.mrb[95].mxu1  ;;  %v3074_v34 = vmul.f32 1.442695, %v2682_v15  ;;  %2307 = vmax.xlane.f32.xlu1 %v2306_v53  ;;  %v3076_v44 = vmul.f32 1.442695, %v2683_v31  ;;  %v3347_v48 = vadd.f32 %v7168_v60, %v7166_v38 }
 0x40f   : > { %9852 = vst [vmem:[#allocation171_spill] sm:$0xff] %v7189_v13  ;;  %v7191_v30 = vpop.eup %5023  ;;  %5043 = vpow2.f32 %v3070_v20  ;;  %v2862_v26 = vmul.f32 1.442695, %v2576_v17  ;;  %v2864_v50 = vmul.f32 1.442695, %v2577_v33  ;;  %v2212_v47 = vpop.xlane.xlu1 %2211  ;;  %v3506_v62 = vadd.f32 %v7182_v12, %v7172_v29  ;;  %3342 = vadd.xlane.f32.xlu0 %v3341_v0  ;;  %v9854_v20 = vld [vmem:[#allocation47_spill] sm:$0xff] }
 0x410   : > { %v7193_v43 = vpop.eup %5025  ;;  %5045 = vpow2.f32 %v3072_v45  ;;  %v2371_v59 = vpop.xlane.xlu0 %2370  ;;  %v2578_v39 = vsub.f32 %v9855_v40, %v2212_v47  ;;  %v9857_v17 = vld [vmem:[#allocation50_spill] sm:$0xff] }
 0x411   : > { %v7202_v3 = vpop.eup %5027  ;;  %5047 = vpow2.f32 %v2862_v26  ;;  %v2684_v5 = vsub.f32 %v9853_v28, %v2371_v59  ;;  %v2685_v45 = vsub.f32 %v9854_v20, %v2371_v59  ;;  %v7207_v53 = vpop.f32.mrb[96].mxu1  ;;  %v2579_v33 = vsub.f32 %v9857_v17, %v2212_v47 }
 0x412   : > { %9856 = vst [vmem:[#allocation46_spill] sm:$0xff] %v7207_v53  ;;  %v7209_v23 = vpop.eup %5029  ;;  %5049 = vpow2.f32 %v2864_v50  ;;  %v7216_v0 = vpop.f32.mrb[97].mxu1  ;;  %v2866_v28 = vmul.f32 1.442695, %v2578_v39  ;;  %3345 = vadd.xlane.f32.xlu1 %v7160_v41  ;;  %v7227_v15 = vadd.f32 %v7193_v43, %v7191_v30  ;;  %v9859_v41 = vld [vmem:[#allocation52_spill] sm:$0xff] }
 0x413   : > { %9858 = vst [vmem:[#allocation47_spill] sm:$0xff] %v7216_v0  ;;  %v7218_v31 = vpop.eup %5031  ;;  %v3078_v26 = vmul.f32 1.442695, %v2684_v5  ;;  %v3080_v59 = vmul.f32 1.442695, %v2685_v45  ;;  %5051 = vpow2.f32 %v3074_v34  ;;  %v2374_v40 = vpop.xlane.xlu1 %2373  ;;  %v3509_v17 = vadd.f32 %v7209_v23, %v7202_v3  ;;  %3963 = vmatpush1.bf16.xpose.msra.mxu0 %v3834_v55  ;;  %2310 = vmax.xlane.f32.xlu0 %v2309_v46  ;;  %v9861_v45 = vld [vmem:[#allocation49_spill] sm:$0xff] }
 0x414   : > { %v7220_v20 = vpop.eup %5033  ;;  %5053 = vpow2.f32 %v3076_v44  ;;  %v2215_v50 = vpop.xlane.xlu0 %2214  ;;  %v2868_v47 = vmul.f32 1.442695, %v2579_v33  ;;  %v9860_v44 = vld [vmem:[#allocation54_spill] sm:$0xff]  ;;  %v2686_v39 = vsub.f32 %v9861_v45, %v2374_v40  ;;  %3964 = vmatprep.subr.bf16.mxu0 %v3837_v58 }
 0x415   : > { %v7229_v60 = vpop.eup %5035  ;;  %5055 = vpow2.f32 %v3078_v26  ;;  %v2580_v34 = vsub.f32 %v9859_v41, %v2215_v50  ;;  %v2581_v5 = vsub.f32 %v9860_v44, %v2215_v50  ;;  %v7240_v33 = vpop.f32.mrb[98].mxu1  ;;  %v9863_v26 = vld [vmem:[#allocation51_spill] sm:$0xff]  ;;  %v3839_v8 = vpack.c.bf16 %v7220_v20, %v7193_v43 }
 0x416   : > { %9862 = vst [vmem:[#allocation48_spill] sm:$0xff] %v7240_v33  ;;  %v7242_v16 = vpop.eup %5037  ;;  %5057 = vpow2.f32 %v3080_v59  ;;  %v2687_v24 = vsub.f32 %v9863_v26, %v2374_v40  ;;  %v7249_v21 = vpop.f32.mrb[99].mxu1  ;;  %v3082_v44 = vmul.f32 1.442695, %v2686_v39  ;;  %3507 = vadd.xlane.f32.xlu1 %v3506_v62  ;;  %v7273_v26 = vadd.f32 %v7220_v20, %v7218_v31 }
 0x417   : > { %9864 = vst [vmem:[#allocation50_spill] sm:$0xff] %v7249_v21  ;;  %v7251_v55 = vpop.eup %5039  ;;  %v2870_v50 = vmul.f32 1.442695, %v2580_v34  ;;  %v2872_v41 = vmul.f32 1.442695, %v2581_v5  ;;  %5059 = vpow2.f32 %v2866_v28  ;;  %v2218_v40 = vpop.xlane.xlu1 %2217  ;;  %v7257_v43 = vadd.f32 %v7242_v16, %v7229_v60  ;;  %3348 = vadd.xlane.f32.xlu0 %v3347_v48  ;;  %v9865_v28 = vld [vmem:[#allocation53_spill] sm:$0xff] }
 0x418   : > { %v7253_v45 = vpop.eup %5041  ;;  %5061 = vpow2.f32 %v2868_v47  ;;  %v2377_v58 = vpop.xlane.xlu0 %2376  ;;  %v3084_v59 = vmul.f32 1.442695, %v2687_v24  ;;  %v9866_v5 = vld [vmem:[#allocation55_spill] sm:$0xff]  ;;  %v9867_v47 = vld [vmem:[#allocation56_spill] sm:$0xff]  ;;  %v2583_v9 = vsub.f32 %v9869_v6, %v2218_v40  ;;  %v9871_v6 = vmax.f32 %v7155_v63, %v7164_v52  ;;  %v9876_v52 = vld [vmem:[#allocation57_spill] sm:$0xff] }
 0x419   : > { %v7261_v46 = vpop.eup %5043  ;;  %5063 = vpow2.f32 %v2870_v50  ;;  %v2688_v34 = vsub.f32 %v9865_v28, %v2377_v58  ;;  %v2689_v39 = vsub.f32 %v9866_v5, %v2377_v58  ;;  %v2582_v62 = vsub.f32 %v9867_v47, %v2218_v40  ;;  %v7266_v51 = vpop.f32.mrb[100].mxu1 }
 0x41a   : > { %9868 = vst [vmem:[#allocation52_spill] sm:$0xff] %v7266_v51  ;;  %v7268_v24 = vpop.eup %5045  ;;  %5065 = vpow2.f32 %v2872_v41  ;;  %v7277_v50 = vpop.f32.mrb[101].mxu1  ;;  %2313 = vmax.xlane.f32.xlu1 %v9871_v6  ;;  %v2876_v41 = vmul.f32 1.442695, %v2583_v9  ;;  %v9875_v9 = vld [vmem:[#allocation62_spill] sm:$0xff] }
 0x41b   : > { %9870 = vst [vmem:[#allocation54_spill] sm:$0xff] %v7277_v50  ;;  %v7279_v28 = vpop.eup %5047  ;;  %v3086_v58 = vmul.f32 1.442695, %v2688_v34  ;;  %v3088_v5 = vmul.f32 1.442695, %v2689_v39  ;;  %5067 = vpow2.f32 %v3082_v44  ;;  %v2380_v40 = vpop.xlane.xlu1 %2379  ;;  %v7288_v48 = vadd.f32 %v7268_v24, %v7261_v46  ;;  %3510 = vadd.xlane.f32.xlu0 %v3509_v17  ;;  %v9874_v39 = vld [vmem:[#allocation60_spill] sm:$0xff] }
 0x41c   : > { %v2874_v47 = vmul.f32 1.442695, %v2582_v62  ;;  %v7281_v1 = vpop.eup %5049  ;;  %5069 = vpow2.f32 %v3084_v59  ;;  %v2221_v20 = vpop.xlane.xlu0 %2220  ;;  %v7292_v34 = vadd.f32 %v7253_v45, %v7251_v55  ;;  %v9873_v59 = vpack.c.bf16 %v7166_v38, %v7139_v27 }
 0x41d   : > { %v7294_v44 = vpop.eup %5051  ;;  %5071 = vpow2.f32 %v3086_v58  ;;  %v2584_v62 = vsub.f32 %v9874_v39, %v2221_v20  ;;  %v2585_v6 = vsub.f32 %v9875_v9, %v2221_v20  ;;  %v2690_v63 = vsub.f32 %v9876_v52, %v2380_v40  ;;  %v7302_v11 = vpop.f32.mrb[102].mxu1 }
 0x41e   : > { %9872 = vst [vmem:[#allocation49_spill] sm:$0xff] %v7294_v44  ;;  %3965 = vmatpush1.bf16.xpose.msra.mxu0 %v9873_v59  ;;  %9877 = vst [vmem:[#allocation51_spill] sm:$0xff] %v7302_v11  ;;  %v7304_v10 = vpop.eup %5053  ;;  %5073 = vpow2.f32 %v3088_v5  ;;  %v2691_v4 = vsub.f32 %v9878_v19, %v2380_v40  ;;  %v3841_v58 = vpack.c.bf16 %v7281_v1, %v7253_v45  ;;  %v7311_v38 = vpop.f32.mrb[103].mxu1  ;;  %3351 = vadd.xlane.f32.xlu1 %v7227_v15  ;;  %v9883_v15 = vld [vmem:[#allocation63_spill] sm:$0xff] }
 0x41f   : > { %3966 = vmatprep.subr.bf16.mxu0 %v3839_v8  ;;  %9879 = vst [vmem:[#allocation53_spill] sm:$0xff] %v7311_v38  ;;  %v7313_v17 = vpop.eup %5055  ;;  %v2878_v20 = vmul.f32 1.442695, %v2584_v62  ;;  %v2880_v52 = vmul.f32 1.442695, %v2585_v6  ;;  %5075 = vpow2.f32 %v2874_v47  ;;  %v2224_v5 = vpop.xlane.xlu1 %2223  ;;  %v7320_v45 = vadd.f32 %v7304_v10, %v7294_v44  ;;  %v9882_v47 = vld [vmem:[#allocation61_spill] sm:$0xff] }
 0x420   : > { %9880 = vst [vmem:[#allocation55_spill] sm:$0xff] %v7313_v17  ;;  %v3090_v59 = vmul.f32 1.442695, %v2690_v63  ;;  %v7315_v39 = vpop.eup %5057  ;;  %5077 = vpow2.f32 %v2876_v41  ;;  %v2383_v19 = vpop.xlane.xlu0 %2382  ;;  %v3092_v8 = vmul.f32 1.442695, %v2691_v4  ;;  %v9881_v63 = vmax.f32 %v7180_v56, %v7189_v13  ;;  %v9884_v4 = vld [vmem:[#allocation64_spill] sm:$0xff] }
 0x421   : > { %v7324_v9 = vpop.eup %5059  ;;  %5079 = vpow2.f32 %v2878_v20  ;;  %v2692_v41 = vsub.f32 %v9882_v47, %v2383_v19  ;;  %v2693_v62 = vsub.f32 %v9883_v15, %v2383_v19  ;;  %v2586_v6 = vsub.f32 %v9884_v4, %v2224_v5  ;;  %v7332_v27 = vpop.f32.mrb[104].mxu1 }
 0x422   : > { %2316 = vmax.xlane.f32.xlu0 %v9881_v63  ;;  %9885 = vst [vmem:[#allocation56_spill] sm:$0xff] %v7332_v27  ;;  %v7334_v2 = vpop.eup %5061  ;;  %5081 = vpow2.f32 %v2880_v52  ;;  %v2587_v40 = vsub.f32 %v9886_v42, %v2224_v5  ;;  %v7339_v20 = vadd.f32 %v7281_v1, %v7279_v28  ;;  %v7343_v63 = vadd.f32 %v7315_v39, %v7313_v17  ;;  %v7345_v47 = vpop.f32.mrb[105].mxu1 }
 0x423   : > { %9887 = vst [vmem:[#allocation58_spill] sm:$0xff] %v7345_v47  ;;  %v7347_v19 = vpop.eup %5063  ;;  %v3094_v15 = vmul.f32 1.442695, %v2692_v41  ;;  %v3096_v4 = vmul.f32 1.442695, %v2693_v62  ;;  %5083 = vpow2.f32 %v3090_v59  ;;  %3513 = vadd.xlane.f32.xlu1 %v7257_v43  ;;  %v2386_v52 = vpop.xlane.xlu1 %2385  ;;  %v9889_v59 = vpack.c.bf16 %v7218_v31, %v7191_v30  ;;  %v9891_v41 = vld [vmem:[#allocation70_spill] sm:$0xff] }
 0x424   : > { %v2882_v13 = vmul.f32 1.442695, %v2586_v6  ;;  %v7349_v56 = vpop.eup %5065  ;;  %5085 = vpow2.f32 %v3092_v8  ;;  %v2227_v42 = vpop.xlane.xlu0 %2226  ;;  %v2884_v1 = vmul.f32 1.442695, %v2587_v40  ;;  %v9890_v8 = vld [vmem:[#allocation68_spill] sm:$0xff]  ;;  %v9892_v62 = vld [vmem:[#allocation65_spill] sm:$0xff]  ;;  %v7374_v31 = vadd.f32 %v7334_v2, %v7324_v9 }
 0x425   : > { %v7356_v32 = vpop.eup %5067  ;;  %5087 = vpow2.f32 %v3094_v15  ;;  %v2588_v43 = vsub.f32 %v9890_v8, %v2227_v42  ;;  %v2589_v40 = vsub.f32 %v9891_v41, %v2227_v42  ;;  %v2694_v6 = vsub.f32 %v9892_v62, %v2386_v52  ;;  %v7365_v7 = vpop.f32.mrb[106].mxu1 }
 0x426   : > { %9888 = vst [vmem:[#allocation60_spill] sm:$0xff] %v7356_v32  ;;  %3967 = vmatpush1.bf16.xpose.msra.mxu0 %v9889_v59  ;;  %3354 = vadd.xlane.f32.xlu0 %v7273_v26  ;;  %9893 = vst [vmem:[#allocation62_spill] sm:$0xff] %v7365_v7  ;;  %v7367_v5 = vpop.eup %5069  ;;  %5089 = vpow2.f32 %v3096_v4  ;;  %v2695_v15 = vsub.f32 %v9895_v14, %v2386_v52  ;;  %v3843_v30 = vpack.c.bf16 %v7349_v56, %v7334_v2  ;;  %v7376_v26 = vpop.f32.mrb[107].mxu1 }
 0x427   : > { %9894 = vst [vmem:[#allocation57_spill] sm:$0xff] %v7367_v5  ;;  %3968 = vmatprep.subr.bf16.mxu0 %v3841_v58  ;;  %9896 = vst [vmem:[#allocation59_spill] sm:$0xff] %v7376_v26  ;;  %v7378_v42 = vpop.eup %5071  ;;  %v2886_v59 = vmul.f32 1.442695, %v2588_v43  ;;  %v2888_v8 = vmul.f32 1.442695, %v2589_v40  ;;  %5091 = vpow2.f32 %v2882_v13  ;;  %v9899_v14 = vmax.f32 %v7207_v53, %v7216_v0  ;;  %v2230_v52 = vpop.xlane.xlu1 %2229 }
 0x428   : > { %9897 = vst [vmem:[#allocation61_spill] sm:$0xff] %v7378_v42  ;;  %v3098_v41 = vmul.f32 1.442695, %v2694_v6  ;;  %v7380_v62 = vpop.eup %5073  ;;  %5093 = vpow2.f32 %v2884_v1  ;;  %v2389_v58 = vpop.xlane.xlu0 %2388  ;;  %v3100_v4 = vmul.f32 1.442695, %v2695_v15  ;;  %v7387_v2 = vadd.f32 %v7367_v5, %v7356_v32  ;;  %v9900_v13 = vld [vmem:[#allocation69_spill] sm:$0xff] }
 0x429   : > { %9898 = vst [vmem:[#allocation63_spill] sm:$0xff] %v7380_v62  ;;  %2319 = vmax.xlane.f32.xlu1 %v9899_v14  ;;  %v7391_v40 = vpop.eup %5075  ;;  %5095 = vpow2.f32 %v2886_v59  ;;  %v2696_v1 = vsub.f32 %v9900_v13, %v2389_v58  ;;  %v9901_v6 = vld [vmem:[#allocation71_spill] sm:$0xff]  ;;  %v9902_v14 = vld [vmem:[#allocation72_spill] sm:$0xff]  ;;  %v7397_v15 = vpop.f32.mrb[108].mxu1  ;;  %v2591_v54 = vsub.f32 %v9904_v36, %v2230_v52  ;;  %v7404_v43 = vadd.f32 %v7349_v56, %v7347_v19 }
 0x42a   : > { %3516 = vadd.xlane.f32.xlu0 %v7288_v48  ;;  %v2697_v0 = vsub.f32 %v9901_v6, %v2389_v58  ;;  %v2590_v53 = vsub.f32 %v9902_v14, %v2230_v52  ;;  %9903 = vst [vmem:[#allocation64_spill] sm:$0xff] %v7397_v15  ;;  %v7399_v35 = vpop.eup %5077  ;;  %5097 = vpow2.f32 %v2888_v8  ;;  %v7408_v48 = vadd.f32 %v7380_v62, %v7378_v42  ;;  %v7410_v59 = vpop.f32.mrb[109].mxu1 }
 0x42b   : > { %9905 = vst [vmem:[#allocation66_spill] sm:$0xff] %v7410_v59  ;;  %v7412_v58 = vpop.eup %5079  ;;  %v3102_v13 = vmul.f32 1.442695, %v2696_v1  ;;  %5099 = vpow2.f32 %v3098_v41  ;;  %v2892_v56 = vmul.f32 1.442695, %v2591_v54  ;;  %v2392_v8 = vpop.xlane.xlu1 %2391  ;;  %v9910_v41 = vld [vmem:[#allocation78_spill] sm:$0xff] }
 0x42c   : > { %v3104_v6 = vmul.f32 1.442695, %v2697_v0  ;;  %v2890_v14 = vmul.f32 1.442695, %v2590_v53  ;;  %v7414_v49 = vpop.eup %5081  ;;  %5101 = vpow2.f32 %v3100_v4  ;;  %v2233_v36 = vpop.xlane.xlu0 %2232  ;;  %v9907_v53 = vpack.c.bf16 %v7279_v28, %v7251_v55  ;;  %v9911_v1 = vld [vmem:[#allocation73_spill] sm:$0xff] }
 0x42d   : > { %3357 = vadd.xlane.f32.xlu1 %v7292_v34  ;;  %v7421_v18 = vpop.eup %5083  ;;  %5103 = vpow2.f32 %v3102_v13  ;;  %v9908_v0 = vmax.f32 %v7240_v33, %v7249_v21  ;;  %v9909_v34 = vld [vmem:[#allocation76_spill] sm:$0xff]  ;;  %v2593_v4 = vsub.f32 %v9910_v41, %v2233_v36  ;;  %v2698_v52 = vsub.f32 %v9911_v1, %v2392_v8  ;;  %v7432_v57 = vpop.f32.mrb[110].mxu1  ;;  %v9914_v13 = vld [vmem:[#allocation75_spill] sm:$0xff] }
 0x42e   : > { %9906 = vst [vmem:[#allocation68_spill] sm:$0xff] %v7421_v18  ;;  %3969 = vmatpush1.bf16.xpose.msra.mxu0 %v9907_v53  ;;  %v2592_v54 = vsub.f32 %v9909_v34, %v2233_v36  ;;  %9912 = vst [vmem:[#allocation70_spill] sm:$0xff] %v7432_v57  ;;  %v7434_v61 = vpop.eup %5085  ;;  %5105 = vpow2.f32 %v3104_v6  ;;  %v2699_v37 = vsub.f32 %v9914_v13, %v2392_v8  ;;  %v7443_v53 = vpop.f32.mrb[111].mxu1 }
 0x42f   : > { %2322 = vmax.xlane.f32.xlu0 %v9908_v0  ;;  %9913 = vst [vmem:[#allocation65_spill] sm:$0xff] %v7434_v61  ;;  %3970 = vmatprep.subr.bf16.mxu0 %v3843_v30  ;;  %v3845_v55 = vpack.c.bf16 %v7414_v49, %v7399_v35  ;;  %v7441_v28 = vadd.f32 %v7399_v35, %v7391_v40  ;;  %9915 = vst [vmem:[#allocation67_spill] sm:$0xff] %v7443_v53  ;;  %v7445_v36 = vpop.eup %5087  ;;  %v2896_v34 = vmul.f32 1.442695, %v2593_v4  ;;  %v2236_v8 = vpop.xlane.xlu1 %2235 }
 0x430   : > { %9916 = vst [vmem:[#allocation69_spill] sm:$0xff] %v7445_v36  ;;  %v2894_v0 = vmul.f32 1.442695, %v2592_v54  ;;  %5107 = vpow2.f32 %v2890_v14  ;;  %v3106_v41 = vmul.f32 1.442695, %v2698_v52  ;;  %v7447_v1 = vpop.eup %5089  ;;  %v2395_v30 = vpop.xlane.xlu0 %2394  ;;  %v7452_v35 = vadd.f32 %v7434_v61, %v7421_v18  ;;  %v9918_v14 = vld [vmem:[#allocation77_spill] sm:$0xff] }
 0x431   : > { %9917 = vst [vmem:[#allocation71_spill] sm:$0xff] %v7447_v1  ;;  %5109 = vpow2.f32 %v2892_v56  ;;  %3519 = vadd.xlane.f32.xlu1 %v7320_v45  ;;  %v3108_v6 = vmul.f32 1.442695, %v2699_v37  ;;  %v7456_v21 = vpop.eup %5091  ;;  %v2700_v52 = vsub.f32 %v9918_v14, %v2395_v30  ;;  %v9919_v56 = vld [vmem:[#allocation79_spill] sm:$0xff]  ;;  %v9920_v45 = vld [vmem:[#allocation80_spill] sm:$0xff]  ;;  %v7462_v37 = vpop.f32.mrb[112].mxu1  ;;  %v2595_v22 = vsub.f32 %v9922_v25, %v2236_v8 }
 0x432   : > { %5111 = vpow2.f32 %v2894_v0  ;;  %v2701_v54 = vsub.f32 %v9919_v56, %v2395_v30  ;;  %v2594_v4 = vsub.f32 %v9920_v45, %v2236_v8  ;;  %9921 = vst [vmem:[#allocation72_spill] sm:$0xff] %v7462_v37  ;;  %v7464_v33 = vpop.eup %5093  ;;  %v7469_v13 = vadd.f32 %v7414_v49, %v7412_v58  ;;  %v7475_v0 = vpop.f32.mrb[113].mxu1 }
 0x433   : > { %3360 = vadd.xlane.f32.xlu0 %v7339_v20  ;;  %5113 = vpow2.f32 %v2896_v34  ;;  %v7473_v20 = vadd.f32 %v7447_v1, %v7445_v36  ;;  %9923 = vst [vmem:[#allocation74_spill] sm:$0xff] %v7475_v0  ;;  %v7477_v30 = vpop.eup %5095  ;;  %v3110_v14 = vmul.f32 1.442695, %v2700_v52  ;;  %v9924_v25 = vmax.f32 %v7266_v51, %v7277_v50  ;;  %v2398_v8 = vpop.xlane.xlu1 %2397  ;;  %v9932_v1 = vld [vmem:[#allocation83_spill] sm:$0xff] }
 0x434   : > { %v3112_v56 = vmul.f32 1.442695, %v2701_v54  ;;  %5115 = vpow2.f32 %v3106_v41  ;;  %v2898_v45 = vmul.f32 1.442695, %v2594_v4  ;;  %v7479_v18 = vpop.eup %5097  ;;  %v2239_v49 = vpop.xlane.xlu0 %2238  ;;  %v2900_v34 = vmul.f32 1.442695, %v2595_v22 }
 0x435   : > { %5117 = vpow2.f32 %v3108_v6  ;;  %2325 = vmax.xlane.f32.xlu1 %v9924_v25  ;;  %v7488_v52 = vpop.eup %5099  ;;  %v9926_v41 = vpack.c.bf16 %v7347_v19, %v7324_v9  ;;  %v9927_v6 = vld [vmem:[#allocation84_spill] sm:$0xff]  ;;  %v9928_v4 = vld [vmem:[#allocation86_spill] sm:$0xff]  ;;  %v9929_v25 = vld [vmem:[#allocation81_spill] sm:$0xff]  ;;  %v7497_v51 = vpop.f32.mrb[114].mxu1  ;;  %v3847_v9 = vpack.c.bf16 %v7479_v18, %v7464_v33 }
 0x436   : > { %9925 = vst [vmem:[#allocation76_spill] sm:$0xff] %v7488_v52  ;;  %5119 = vpow2.f32 %v3110_v14  ;;  %v2596_v54 = vsub.f32 %v9927_v6, %v2239_v49  ;;  %v2597_v22 = vsub.f32 %v9928_v4, %v2239_v49  ;;  %v2702_v50 = vsub.f32 %v9929_v25, %v2398_v8  ;;  %9930 = vst [vmem:[#allocation78_spill] sm:$0xff] %v7497_v51  ;;  %v7499_v36 = vpop.eup %5101  ;;  %v7508_v19 = vpop.f32.mrb[115].mxu1 }
 0x437   : > { %3971 = vmatpush1.bf16.xpose.msra.mxu0 %v9926_v41  ;;  %3522 = vadd.xlane.f32.xlu0 %v7343_v63  ;;  %9931 = vst [vmem:[#allocation73_spill] sm:$0xff] %v7499_v36  ;;  %5121 = vpow2.f32 %v3112_v56  ;;  %v2703_v14 = vsub.f32 %v9932_v1, %v2398_v8  ;;  %v7506_v63 = vadd.f32 %v7464_v33, %v7456_v21  ;;  %9933 = vst [vmem:[#allocation75_spill] sm:$0xff] %v7508_v19  ;;  %v7510_v49 = vpop.eup %5103  ;;  %v2242_v56 = vpop.xlane.xlu1 %2241 }
 0x438   : > { %3972 = vmatprep.subr.bf16.mxu0 %v3845_v55  ;;  %9934 = vst [vmem:[#allocation77_spill] sm:$0xff] %v7510_v49  ;;  %v2902_v41 = vmul.f32 1.442695, %v2596_v54  ;;  %v2904_v6 = vmul.f32 1.442695, %v2597_v22  ;;  %5123 = vpow2.f32 %v2898_v45  ;;  %v7512_v25 = vpop.eup %5105  ;;  %v2401_v55 = vpop.xlane.xlu0 %2400  ;;  %v7517_v33 = vadd.f32 %v7499_v36, %v7488_v52  ;;  %v9937_v45 = vld [vmem:[#allocation85_spill] sm:$0xff] }
 0x439   : > { %v3114_v4 = vmul.f32 1.442695, %v2702_v50  ;;  %9935 = vst [vmem:[#allocation79_spill] sm:$0xff] %v7512_v25  ;;  %5125 = vpow2.f32 %v2900_v34  ;;  %3363 = vadd.xlane.f32.xlu1 %v7374_v31  ;;  %v3116_v1 = vmul.f32 1.442695, %v2703_v14  ;;  %v9936_v50 = vmax.f32 %v7302_v11, %v7311_v38  ;;  %v9938_v31 = vld [vmem:[#allocation87_spill] sm:$0xff] }
 0x43a   : > { %v7521_v61 = vpop.eup %5107  ;;  %5127 = vpow2.f32 %v2902_v41  ;;  %v2704_v34 = vsub.f32 %v9937_v45, %v2401_v55  ;;  %v2705_v54 = vsub.f32 %v9938_v31, %v2401_v55  ;;  %v9939_v22 = vld [vmem:[#allocation88_spill] sm:$0xff]  ;;  %v7529_v42 = vpop.f32.mrb[116].mxu1  ;;  %v9941_v36 = vld [vmem:[#allocation90_spill] sm:$0xff]  ;;  %v7536_v41 = vadd.f32 %v7479_v18, %v7477_v30 }
 0x43b   : > { %2328 = vmax.xlane.f32.xlu0 %v9936_v50  ;;  %v2598_v14 = vsub.f32 %v9939_v22, %v2242_v56  ;;  %9940 = vst [vmem:[#allocation80_spill] sm:$0xff] %v7529_v42  ;;  %v7531_v52 = vpop.eup %5109  ;;  %5129 = vpow2.f32 %v2904_v6  ;;  %v2599_v8 = vsub.f32 %v9941_v36, %v2242_v56  ;;  %v7540_v50 = vadd.f32 %v7512_v25, %v7510_v49  ;;  %v7542_v45 = vpop.f32.mrb[117].mxu1  ;;  %v9950_v49 = vld [vmem:[#allocation91_spill] sm:$0xff] }
 0x43c   : > { %9942 = vst [vmem:[#allocation82_spill] sm:$0xff] %v7542_v45  ;;  %v7544_v55 = vpop.eup %5111  ;;  %v3118_v31 = vmul.f32 1.442695, %v2704_v34  ;;  %v3120_v22 = vmul.f32 1.442695, %v2705_v54  ;;  %5131 = vpow2.f32 %v3114_v4  ;;  %v2245_v36 = vpop.xlane.xlu0 %2244  ;;  %v9944_v4 = vpack.c.bf16 %v7412_v58, %v7391_v40  ;;  %v9946_v34 = vld [vmem:[#allocation94_spill] sm:$0xff] }
 0x43d   : > { %v2906_v38 = vmul.f32 1.442695, %v2598_v14  ;;  %v7546_v11 = vpop.eup %5113  ;;  %5133 = vpow2.f32 %v3116_v1  ;;  %3525 = vadd.xlane.f32.xlu1 %v7387_v2  ;;  %v2908_v18 = vmul.f32 1.442695, %v2599_v8  ;;  %v2404_v6 = vpop.xlane.xlu1 %2403  ;;  %v9945_v1 = vld [vmem:[#allocation92_spill] sm:$0xff]  ;;  %v2601_v8 = vsub.f32 %v9946_v34, %v2245_v36  ;;  %v9947_v54 = vld [vmem:[#allocation89_spill] sm:$0xff] }
 0x43e   : > { %v7553_v25 = vpop.eup %5115  ;;  %5135 = vpow2.f32 %v3118_v31  ;;  %v2600_v2 = vsub.f32 %v9945_v1, %v2245_v36  ;;  %v2706_v14 = vsub.f32 %v9947_v54, %v2404_v6  ;;  %v7562_v32 = vpop.f32.mrb[118].mxu1  ;;  %v2707_v31 = vsub.f32 %v9950_v49, %v2404_v6 }
 0x43f   : > { %9943 = vst [vmem:[#allocation84_spill] sm:$0xff] %v7553_v25  ;;  %3973 = vmatpush1.bf16.xpose.msra.mxu0 %v9944_v4  ;;  %3366 = vadd.xlane.f32.xlu0 %v7404_v43  ;;  %9948 = vst [vmem:[#allocation86_spill] sm:$0xff] %v7562_v32  ;;  %v7564_v56 = vpop.eup %5117  ;;  %5137 = vpow2.f32 %v3120_v22  ;;  %v3849_v40 = vpack.c.bf16 %v7546_v11, %v7531_v52  ;;  %v7571_v43 = vadd.f32 %v7531_v52, %v7521_v61  ;;  %v7573_v58 = vpop.f32.mrb[119].mxu1 }
 0x440   : > { %9949 = vst [vmem:[#allocation81_spill] sm:$0xff] %v7564_v56  ;;  %3974 = vmatprep.subr.bf16.mxu0 %v3847_v9  ;;  %9951 = vst [vmem:[#allocation83_spill] sm:$0xff] %v7573_v58  ;;  %v7575_v36 = vpop.eup %5119  ;;  %v2910_v4 = vmul.f32 1.442695, %v2600_v2  ;;  %v2912_v1 = vmul.f32 1.442695, %v2601_v8  ;;  %5139 = vpow2.f32 %v2906_v38  ;;  %v9954_v9 = vmax.f32 %v7332_v27, %v7345_v47  ;;  %v2407_v49 = vpop.xlane.xlu0 %2406 }
 0x441   : > { %9952 = vst [vmem:[#allocation85_spill] sm:$0xff] %v7575_v36  ;;  %v3122_v34 = vmul.f32 1.442695, %v2706_v14  ;;  %v7577_v54 = vpop.eup %5121  ;;  %5141 = vpow2.f32 %v2908_v18  ;;  %v3124_v22 = vmul.f32 1.442695, %v2707_v31  ;;  %v2248_v6 = vpop.xlane.xlu1 %2247  ;;  %v7584_v52 = vadd.f32 %v7564_v56, %v7553_v25  ;;  %v9955_v38 = vld [vmem:[#allocation93_spill] sm:$0xff] }
 0x442   : > { %9953 = vst [vmem:[#allocation87_spill] sm:$0xff] %v7577_v54  ;;  %2331 = vmax.xlane.f32.xlu1 %v9954_v9  ;;  %v7588_v8 = vpop.eup %5123  ;;  %5143 = vpow2.f32 %v2910_v4  ;;  %v2708_v18 = vsub.f32 %v9955_v38, %v2407_v49  ;;  %v9956_v14 = vld [vmem:[#allocation95_spill] sm:$0xff]  ;;  %v9957_v9 = vld [vmem:[#allocation96_spill] sm:$0xff]  ;;  %v7594_v31 = vpop.f32.mrb[120].mxu1  ;;  %v9959_v25 = vld [vmem:[#allocation98_spill] sm:$0xff]  ;;  %v7601_v2 = vadd.f32 %v7546_v11, %v7544_v55 }
 0x443   : > { %3528 = vadd.xlane.f32.xlu0 %v7408_v48  ;;  %v2709_v47 = vsub.f32 %v9956_v14, %v2407_v49  ;;  %v2602_v27 = vsub.f32 %v9957_v9, %v2248_v6  ;;  %9958 = vst [vmem:[#allocation88_spill] sm:$0xff] %v7594_v31  ;;  %v7596_v19 = vpop.eup %5125  ;;  %5145 = vpow2.f32 %v2912_v1  ;;  %v2603_v56 = vsub.f32 %v9959_v25, %v2248_v6  ;;  %v7607_v4 = vpop.f32.mrb[121].mxu1 }
 0x444   : > { %v7605_v48 = vadd.f32 %v7577_v54, %v7575_v36  ;;  %9961 = vst [vmem:[#allocation92_spill] sm:$0xff] %v7607_v4  ;;  %v7609_v49 = vpop.eup %5127  ;;  %v3126_v38 = vmul.f32 1.442695, %v2708_v18  ;;  %5147 = vpow2.f32 %v3122_v34  ;;  %v2251_v25 = vpop.xlane.xlu0 %2250  ;;  %v9966_v34 = vld [vmem:[#allocation102_spill] sm:$0xff]  ;;  %v9967_v18 = vld [vmem:[#allocation97_spill] sm:$0xff] }
 0x445   : > { %v3128_v14 = vmul.f32 1.442695, %v2709_v47  ;;  %v2914_v9 = vmul.f32 1.442695, %v2602_v27  ;;  %v7611_v45 = vpop.eup %5129  ;;  %5149 = vpow2.f32 %v3124_v22  ;;  %v2916_v11 = vmul.f32 1.442695, %v2603_v56  ;;  %v2410_v1 = vpop.xlane.xlu1 %2409 }
 0x446   : > { %9960 = vst [vmem:[#allocation90_spill] sm:$0xff] %v7605_v48  ;;  %3369 = vadd.xlane.f32.xlu1 %v7441_v28  ;;  %v7618_v54 = vpop.eup %5131  ;;  %5151 = vpow2.f32 %v3126_v38  ;;  %v9963_v27 = vpack.c.bf16 %v7477_v30, %v7456_v21  ;;  %v9964_v47 = vmax.f32 %v7365_v7, %v7376_v26  ;;  %v9965_v28 = vld [vmem:[#allocation100_spill] sm:$0xff]  ;;  %v2605_v22 = vsub.f32 %v9966_v34, %v2251_v25  ;;  %v7629_v48 = vpop.f32.mrb[122].mxu1  ;;  %v9970_v38 = vld [vmem:[#allocation99_spill] sm:$0xff] }
 0x447   : > { %9962 = vst [vmem:[#allocation94_spill] sm:$0xff] %v7618_v54  ;;  %v2604_v56 = vsub.f32 %v9965_v28, %v2251_v25  ;;  %v2710_v6 = vsub.f32 %v9967_v18, %v2410_v1  ;;  %9968 = vst [vmem:[#allocation89_spill] sm:$0xff] %v7629_v48  ;;  %v7631_v36 = vpop.eup %5133  ;;  %5153 = vpow2.f32 %v3128_v14  ;;  %v2711_v58 = vsub.f32 %v9970_v38, %v2410_v1  ;;  %v9996_v48 = vld [vmem:[#allocation115_spill] sm:$0xff] }
 0x448   : > { %3975 = vmatpush1.bf16.xpose.msra.mxu0 %v9963_v27  ;;  %2334 = vmax.xlane.f32.xlu0 %v9964_v47  ;;  %9969 = vst [vmem:[#allocation91_spill] sm:$0xff] %v7631_v36  ;;  %v3851_v21 = vpack.c.bf16 %v7611_v45, %v7596_v19  ;;  %v7638_v30 = vadd.f32 %v7596_v19, %v7588_v8  ;;  %v7640_v27 = vpop.f32.mrb[123].mxu1  ;;  %v7642_v25 = vpop.eup %5135  ;;  %v2920_v28 = vmul.f32 1.442695, %v2605_v22  ;;  %5155 = vpow2.f32 %v2914_v9  ;;  %v9974_v9 = vld [vmem:[#allocation101_spill] sm:$0xff] }
 0x449   : > { %3976 = vmatprep.subr.bf16.mxu0 %v3849_v40  ;;  %9971 = vst [vmem:[#allocation93_spill] sm:$0xff] %v7640_v27  ;;  %9972 = vst [vmem:[#allocation95_spill] sm:$0xff] %v7642_v25  ;;  %v2918_v47 = vmul.f32 1.442695, %v2604_v56  ;;  %v3130_v34 = vmul.f32 1.442695, %v2710_v6  ;;  %v7644_v18 = vpop.eup %5137  ;;  %5157 = vpow2.f32 %v2916_v11  ;;  %v2413_v40 = vpop.xlane.xlu0 %2412  ;;  %v7649_v19 = vadd.f32 %v7631_v36, %v7618_v54 }
 0x44a   : > { %9973 = vst [vmem:[#allocation96_spill] sm:$0xff] %v7644_v18  ;;  %3531 = vadd.xlane.f32.xlu1 %v7452_v35  ;;  %v3132_v14 = vmul.f32 1.442695, %v2711_v58  ;;  %v2254_v1 = vpop.xlane.xlu1 %2253  ;;  %v7653_v26 = vpop.eup %5139  ;;  %v2712_v6 = vsub.f32 %v9974_v9, %v2413_v40  ;;  %v9975_v11 = vld [vmem:[#allocation103_spill] sm:$0xff]  ;;  %v9976_v35 = vld [vmem:[#allocation104_spill] sm:$0xff]  ;;  %v9978_v54 = vld [vmem:[#allocation106_spill] sm:$0xff]  ;;  %v7666_v38 = vadd.f32 %v7611_v45, %v7609_v49  ;;  %v7683_v31 = vadd.f32 %v7644_v18, %v7642_v25 }
 0x44b   : > { %5159 = vpow2.f32 %v2918_v47  ;;  %v2713_v56 = vsub.f32 %v9975_v11, %v2413_v40  ;;  %v2606_v22 = vsub.f32 %v9976_v35, %v2254_v1  ;;  %v7659_v58 = vpop.f32.mrb[124].mxu1  ;;  %v7661_v7 = vpop.eup %5141  ;;  %v2607_v36 = vsub.f32 %v9978_v54, %v2254_v1  ;;  %v9988_v25 = vld [vmem:[#allocation107_spill] sm:$0xff] }
 0x44c   : > { %3372 = vadd.xlane.f32.xlu0 %v7469_v13  ;;  %9977 = vst [vmem:[#allocation98_spill] sm:$0xff] %v7659_v58  ;;  %5161 = vpow2.f32 %v2920_v28  ;;  %v7670_v47 = vpop.f32.mrb[125].mxu1  ;;  %v7672_v9 = vpop.eup %5143  ;;  %v3134_v40 = vmul.f32 1.442695, %v2712_v6  ;;  %v9980_v54 = vmax.f32 %v7397_v15, %v7410_v59 }
 0x44d   : > { %9979 = vst [vmem:[#allocation100_spill] sm:$0xff] %v7670_v47  ;;  %v3136_v11 = vmul.f32 1.442695, %v2713_v56  ;;  %5163 = vpow2.f32 %v3130_v34  ;;  %v2922_v35 = vmul.f32 1.442695, %v2606_v22  ;;  %v7674_v4 = vpop.eup %5145  ;;  %v2257_v45 = vpop.xlane.xlu0 %2256  ;;  %v9982_v34 = vpack.c.bf16 %v7544_v55, %v7521_v61 }
 0x44e   : > { %5165 = vpow2.f32 %v3132_v14  ;;  %2337 = vmax.xlane.f32.xlu1 %v9980_v54  ;;  %v2924_v28 = vmul.f32 1.442695, %v2607_v36  ;;  %v2416_v1 = vpop.xlane.xlu1 %2415  ;;  %v7685_v6 = vpop.eup %5147  ;;  %v9983_v14 = vld [vmem:[#allocation108_spill] sm:$0xff]  ;;  %v9984_v36 = vld [vmem:[#allocation110_spill] sm:$0xff]  ;;  %v9985_v54 = vld [vmem:[#allocation105_spill] sm:$0xff]  ;;  %v3853_v61 = vpack.c.bf16 %v7674_v4, %v7661_v7 }
 0x44f   : > { %9981 = vst [vmem:[#allocation102_spill] sm:$0xff] %v7685_v6  ;;  %5167 = vpow2.f32 %v3134_v40  ;;  %v2608_v56 = vsub.f32 %v9983_v14, %v2257_v45  ;;  %v2609_v22 = vsub.f32 %v9984_v36, %v2257_v45  ;;  %v2714_v59 = vsub.f32 %v9985_v54, %v2416_v1  ;;  %v7694_v13 = vpop.f32.mrb[126].mxu1  ;;  %v7696_v15 = vpop.eup %5149 }
 0x450   : > { %3977 = vmatpush1.bf16.xpose.msra.mxu0 %v9982_v34  ;;  %3534 = vadd.xlane.f32.xlu0 %v7473_v20  ;;  %9986 = vst [vmem:[#allocation97_spill] sm:$0xff] %v7694_v13  ;;  %9987 = vst [vmem:[#allocation99_spill] sm:$0xff] %v7696_v15  ;;  %5169 = vpow2.f32 %v3136_v11  ;;  %v2715_v40 = vsub.f32 %v9988_v25, %v2416_v1  ;;  %v7703_v55 = vpop.f32.mrb[127].mxu1  ;;  %v7705_v34 = vpop.eup %5151  ;;  %v7712_v1 = vadd.f32 %v7661_v7, %v7653_v26 }
 0x451   : > { %3978 = vmatprep.subr.bf16.mxu0 %v3851_v21  ;;  %9989 = vst [vmem:[#allocation101_spill] sm:$0xff] %v7703_v55  ;;  %9990 = vst [vmem:[#allocation103_spill] sm:$0xff] %v7705_v34  ;;  %v2926_v45 = vmul.f32 1.442695, %v2608_v56  ;;  %v2928_v14 = vmul.f32 1.442695, %v2609_v22  ;;  %5171 = vpow2.f32 %v2922_v35  ;;  %v7707_v54 = vpop.eup %5153  ;;  %v2419_v21 = vpop.xlane.xlu0 %2418 }
 0x452   : > { %v3138_v36 = vmul.f32 1.442695, %v2714_v59  ;;  %5173 = vpow2.f32 %v2924_v28  ;;  %3375 = vadd.xlane.f32.xlu1 %v7506_v63  ;;  %v3140_v25 = vmul.f32 1.442695, %v2715_v40  ;;  %v2422_v11 = vpop.xlane.xlu1 %2421  ;;  %v7716_v18 = vpop.eup %5155  ;;  %v9991_v59 = vmax.f32 %v7432_v57, %v7443_v53  ;;  %v9992_v35 = vld [vmem:[#allocation109_spill] sm:$0xff]  ;;  %v9993_v63 = vld [vmem:[#allocation111_spill] sm:$0xff] }
 0x453   : > { %5175 = vpow2.f32 %v2926_v45  ;;  %v2716_v28 = vsub.f32 %v9992_v35, %v2419_v21  ;;  %v2717_v56 = vsub.f32 %v9993_v63, %v2419_v21  ;;  %v9994_v22 = vld [vmem:[#allocation113_spill] sm:$0xff]  ;;  %v7724_v27 = vpop.f32.mrb[128].mxu1  ;;  %v7726_v7 = vpop.eup %5157  ;;  %v2719_v20 = vsub.f32 %v9996_v48, %v2422_v11 }
 0x454   : > { %2340 = vmax.xlane.f32.xlu0 %v9991_v59  ;;  %v2718_v40 = vsub.f32 %v9994_v22, %v2422_v11  ;;  %9995 = vst [vmem:[#allocation104_spill] sm:$0xff] %v7724_v27  ;;  %5177 = vpow2.f32 %v2928_v14  ;;  %v7733_v53 = vadd.f32 %v7696_v15, %v7685_v6  ;;  %v7735_v59 = vpop.f32.mrb[129].mxu1  ;;  %v10020_v27 = vld [vmem:[#allocation119_spill] sm:$0xff] }
 0x455   : > { %9997 = vst [vmem:[#allocation106_spill] sm:$0xff] %v7735_v59  ;;  %v7737_v35 = vpop.eup %5159  ;;  %v3142_v21 = vmul.f32 1.442695, %v2716_v28  ;;  %v3144_v63 = vmul.f32 1.442695, %v2717_v56  ;;  %5179 = vpow2.f32 %v3138_v36  ;;  %v2260_v48 = vpop.xlane.xlu0 %2259  ;;  %v10000_v36 = vpack.c.bf16 %v7609_v49, %v7588_v8  ;;  %v10021_v59 = vld [vmem:[#allocation121_spill] sm:$0xff] }
 0x456   : > { %v3146_v22 = vmul.f32 1.442695, %v2718_v40  ;;  %v7739_v57 = vpop.eup %5161  ;;  %5181 = vpow2.f32 %v3140_v25  ;;  %3537 = vadd.xlane.f32.xlu1 %v7517_v33  ;;  %v3148_v14 = vmul.f32 1.442695, %v2719_v20  ;;  %v7746_v6 = vpop.f32.mrb[130].mxu1  ;;  %v10001_v33 = vld [vmem:[#allocation112_spill] sm:$0xff]  ;;  %v7770_v8 = vadd.f32 %v7707_v54, %v7705_v34 }
 0x457   : > { %9998 = vst [vmem:[#allocation108_spill] sm:$0xff] %v7746_v6  ;;  %v7748_v15 = vpop.eup %5163  ;;  %5183 = vpow2.f32 %v3142_v21  ;;  %v2610_v25 = vsub.f32 %v10001_v33, %v2260_v48  ;;  %v10002_v20 = vld [vmem:[#allocation114_spill] sm:$0xff]  ;;  %v3855_v56 = vpack.c.bf16 %v7739_v57, %v7726_v7  ;;  %v7758_v40 = vpop.f32.mrb[131].mxu1  ;;  %v7764_v21 = vadd.f32 %v7674_v4, %v7672_v9 }
 0x458   : > { %9999 = vst [vmem:[#allocation110_spill] sm:$0xff] %v7748_v15  ;;  %3979 = vmatpush1.bf16.xpose.msra.mxu0 %v10000_v36  ;;  %3378 = vadd.xlane.f32.xlu0 %v7536_v41  ;;  %v2611_v28 = vsub.f32 %v10002_v20, %v2260_v48  ;;  %10003 = vst [vmem:[#allocation105_spill] sm:$0xff] %v7758_v40  ;;  %v7760_v45 = vpop.eup %5165  ;;  %5185 = vpow2.f32 %v3144_v63  ;;  %v10005_v4 = vmax.f32 %v7462_v37, %v7475_v0  ;;  %v2266_v41 = vpop.xlane.xlu1 %2265  ;;  %v10008_v63 = vld [vmem:[#allocation118_spill] sm:$0xff]  ;;  %v10009_v37 = vld [vmem:[#allocation120_spill] sm:$0xff] }
 0x459   : > { %3980 = vmatprep.subr.bf16.mxu0 %v3853_v61  ;;  %v7772_v49 = vpop.eup %5167  ;;  %v2930_v48 = vmul.f32 1.442695, %v2610_v25  ;;  %5187 = vpow2.f32 %v3146_v22  ;;  %v7776_v61 = vpop.f32.mrb[132].mxu1  ;;  %v7787_v22 = vadd.f32 %v7726_v7, %v7716_v18  ;;  %v7791_v25 = vadd.f32 %v7760_v45, %v7748_v15  ;;  %v10011_v7 = vld [vmem:[#allocation122_spill] sm:$0xff] }
 0x45a   : > { %v2932_v36 = vmul.f32 1.442695, %v2611_v28  ;;  %10004 = vst [vmem:[#allocation107_spill] sm:$0xff] %v7776_v61  ;;  %v7778_v33 = vpop.eup %5169  ;;  %5189 = vpow2.f32 %v3148_v14  ;;  %2343 = vmax.xlane.f32.xlu1 %v10005_v4  ;;  %v2263_v20 = vpop.xlane.xlu0 %2262  ;;  %v10007_v14 = vld [vmem:[#allocation116_spill] sm:$0xff]  ;;  %v2614_v55 = vsub.f32 %v10009_v37, %v2266_v41  ;;  %v2615_v34 = vsub.f32 %v10011_v7, %v2266_v41 }
 0x45b   : > { %10006 = vst [vmem:[#allocation109_spill] sm:$0xff] %v7791_v25  ;;  %v7793_v28 = vpop.eup %5171  ;;  %5191 = vpow2.f32 %v2930_v48  ;;  %v2612_v4 = vsub.f32 %v10007_v14, %v2263_v20  ;;  %v2613_v0 = vsub.f32 %v10008_v63, %v2263_v20  ;;  %v7799_v11 = vpop.f32.mrb[133].mxu1  ;;  %v7814_v15 = vadd.f32 %v7739_v57, %v7737_v35 }
 0x45c   : > { %3540 = vadd.xlane.f32.xlu0 %v7540_v50  ;;  %10010 = vst [vmem:[#allocation111_spill] sm:$0xff] %v7799_v11  ;;  %v7801_v13 = vpop.eup %5173  ;;  %5193 = vpow2.f32 %v2932_v36  ;;  %v7808_v50 = vpop.f32.mrb[134].mxu1  ;;  %v2938_v37 = vmul.f32 1.442695, %v2614_v55  ;;  %v2940_v41 = vmul.f32 1.442695, %v2615_v34  ;;  %v10016_v57 = vpack.c.bf16 %v7672_v9, %v7653_v26 }
 0x45d   : > { %10012 = vst [vmem:[#allocation113_spill] sm:$0xff] %v7808_v50  ;;  %v7810_v14 = vpop.eup %5175  ;;  %v2934_v63 = vmul.f32 1.442695, %v2612_v4  ;;  %v2936_v20 = vmul.f32 1.442695, %v2613_v0  ;;  %10013 = vst [vmem:[#allocation115_spill] sm:$0xff] %v7814_v15  ;;  %v2428_v25 = vpop.xlane.xlu1 %2427  ;;  %v7825_v0 = vadd.f32 %v7778_v33, %v7772_v49 }
 0x45e   : > { %v7816_v36 = vpop.eup %5177  ;;  %3381 = vadd.xlane.f32.xlu1 %v7571_v43  ;;  %v2425_v7 = vpop.xlane.xlu0 %2424  ;;  %v10017_v43 = vld [vmem:[#allocation75_spill] sm:$0xff]  ;;  %v10019_v4 = vld [vmem:[#allocation117_spill] sm:$0xff]  ;;  %v2722_v5 = vsub.f32 %v10021_v59, %v2428_v25 }
 0x45f   : > { %10014 = vst [vmem:[#allocation112_spill] sm:$0xff] %v7825_v0  ;;  %v7827_v55 = vpop.eup %5179  ;;  %5195 = vpow2.f32 %v2934_v63  ;;  %v10018_v34 = vmax.f32 %v7497_v51, %v10017_v43  ;;  %v2720_v48 = vsub.f32 %v10019_v4, %v2425_v7  ;;  %v2721_v15 = vsub.f32 %v10020_v27, %v2425_v7  ;;  %v7838_v62 = vpop.f32.mrb[135].mxu1  ;;  %v10024_v63 = vld [vmem:[#allocation123_spill] sm:$0xff] }
 0x460   : > { %10015 = vst [vmem:[#allocation114_spill] sm:$0xff] %v7827_v55  ;;  %3981 = vmatpush1.bf16.xpose.msra.mxu0 %v10016_v57  ;;  %10022 = vst [vmem:[#allocation116_spill] sm:$0xff] %v7838_v62  ;;  %v7840_v0 = vpop.eup %5181  ;;  %5197 = vpow2.f32 %v2936_v20  ;;  %v2723_v44 = vsub.f32 %v10024_v63, %v2428_v25  ;;  %v3857_v26 = vpack.c.bf16 %v7816_v36, %v7801_v13  ;;  %v3154_v59 = vmul.f32 1.442695, %v2722_v5  ;;  %v10030_v5 = vld [vmem:[#allocation124_spill] sm:$0xff]  ;;  %v10059_v62 = vld [vmem:[#allocation138_spill] sm:$0xff] }
 0x461   : > { %2346 = vmax.xlane.f32.xlu0 %v10018_v34  ;;  %10023 = vst [vmem:[#allocation118_spill] sm:$0xff] %v7840_v0  ;;  %3982 = vmatprep.subr.bf16.mxu0 %v3855_v56  ;;  %v7847_v57 = vpop.eup %5183  ;;  %5199 = vpow2.f32 %v2938_v37  ;;  %v3150_v27 = vmul.f32 1.442695, %v2720_v48  ;;  %v3152_v7 = vmul.f32 1.442695, %v2721_v15  ;;  %v2272_v25 = vpop.xlane.xlu1 %2271  ;;  %v7854_v20 = vadd.f32 %v7801_v13, %v7793_v28  ;;  %v10031_v48 = vld [vmem:[#allocation126_spill] sm:$0xff] }
 0x462   : > { %10025 = vst [vmem:[#allocation120_spill] sm:$0xff] %v7847_v57  ;;  %v7849_v34 = vpop.eup %5185  ;;  %5201 = vpow2.f32 %v2940_v41  ;;  %v3156_v4 = vmul.f32 1.442695, %v2723_v44  ;;  %3543 = vadd.xlane.f32.xlu1 %v7584_v52  ;;  %v2269_v56 = vpop.xlane.xlu0 %2268  ;;  %v10032_v37 = vld [vmem:[#allocation128_spill] sm:$0xff]  ;;  %v10034_v13 = vld [vmem:[#allocation130_spill] sm:$0xff]  ;;  %v7886_v43 = vadd.f32 %v7816_v36, %v7810_v14 }
 0x463   : > { %10026 = vst [vmem:[#allocation122_spill] sm:$0xff] %v7849_v34  ;;  %10027 = vst [vmem:[#allocation117_spill] sm:$0xff] %v7854_v20  ;;  %v7858_v51 = vpop.eup %5187  ;;  %5203 = vpow2.f32 %v3150_v27  ;;  %v2616_v15 = vsub.f32 %v10030_v5, %v2269_v56  ;;  %v2617_v44 = vsub.f32 %v10031_v48, %v2269_v56  ;;  %v2618_v52 = vsub.f32 %v10032_v37, %v2272_v25  ;;  %v7864_v41 = vpop.f32.mrb[136].mxu1 }
 0x464   : > { %10033 = vst [vmem:[#allocation119_spill] sm:$0xff] %v7864_v41  ;;  %v7866_v40 = vpop.eup %5189  ;;  %5205 = vpow2.f32 %v3152_v7  ;;  %v2619_v6 = vsub.f32 %v10034_v13, %v2272_v25  ;;  %v7873_v27 = vadd.f32 %v7840_v0, %v7827_v55  ;;  %v10039_v25 = vld [vmem:[#allocation82_spill] sm:$0xff]  ;;  %10041 = vst [vmem:[#allocation124_spill] sm:$0xff] %v7886_v43 }
 0x465   : > { %3384 = vadd.xlane.f32.xlu0 %v7601_v2  ;;  %v7875_v2 = vpop.f32.mrb[137].mxu1  ;;  %v7877_v5 = vpop.eup %5191  ;;  %5207 = vpow2.f32 %v3154_v59  ;;  %v2942_v56 = vmul.f32 1.442695, %v2616_v15  ;;  %v2944_v48 = vmul.f32 1.442695, %v2617_v44  ;;  %v10040_v13 = vmax.f32 %v7529_v42, %v10039_v25  ;;  %v10045_v44 = vld [vmem:[#allocation127_spill] sm:$0xff] }
 0x466   : > { %10037 = vst [vmem:[#allocation121_spill] sm:$0xff] %v7873_v27  ;;  %10038 = vst [vmem:[#allocation123_spill] sm:$0xff] %v7875_v2  ;;  %v2946_v37 = vmul.f32 1.442695, %v2618_v52  ;;  %v5194_v9 = vpop.eup %5193  ;;  %5209 = vpow2.f32 %v3156_v4  ;;  %v2948_v7 = vmul.f32 1.442695, %v2619_v6  ;;  %v2431_v63 = vpop.xlane.xlu0 %2430  ;;  %v10042_v59 = vpack.c.bf16 %v7737_v35, %v7716_v18 }
 0x467   : > { %2349 = vmax.xlane.f32.xlu1 %v10040_v13  ;;  %v2434_v20 = vpop.xlane.xlu1 %2433  ;;  %5211 = vpow2.f32 %v2942_v56  ;;  %v10043_v4 = vld [vmem:[#allocation90_spill] sm:$0xff]  ;;  %v10044_v6 = vld [vmem:[#allocation125_spill] sm:$0xff]  ;;  %v2725_v52 = vsub.f32 %v10045_v44, %v2431_v63  ;;  %v7895_v42 = vpop.f32.mrb[138].mxu1  ;;  %v10048_v27 = vld [vmem:[#allocation131_spill] sm:$0xff]  ;;  %v7902_v18 = vadd.f32 %v7849_v34, %v7847_v57 }
 0x468   : > { %3983 = vmatpush1.bf16.xpose.msra.mxu0 %v10042_v59  ;;  %v2724_v15 = vsub.f32 %v10044_v6, %v2431_v63  ;;  %v10046_v13 = vld [vmem:[#allocation129_spill] sm:$0xff]  ;;  %10047 = vst [vmem:[#allocation126_spill] sm:$0xff] %v7895_v42  ;;  %5213 = vpow2.f32 %v2944_v48  ;;  %v2727_v36 = vsub.f32 %v10048_v27, %v2434_v20  ;;  %v7904_v35 = vpop.f32.mrb[139].mxu1  ;;  %v10058_v56 = vld [vmem:[#allocation136_spill] sm:$0xff]  ;;  %v10152_v34 = vld [vmem:[#allocation155_spill] sm:$0xff] }
 0x469   : > { %3546 = vadd.xlane.f32.xlu0 %v10043_v4  ;;  %v2726_v25 = vsub.f32 %v10046_v13, %v2434_v20  ;;  %3984 = vmatprep.subr.bf16.mxu0 %v3857_v26  ;;  %10051 = vst [vmem:[#allocation128_spill] sm:$0xff] %v7902_v18  ;;  %10052 = vst [vmem:[#allocation130_spill] sm:$0xff] %v7904_v35  ;;  %v7906_v59 = vpop.eup %5195  ;;  %5215 = vpow2.f32 %v2946_v37  ;;  %v3160_v4 = vmul.f32 1.442695, %v2725_v52  ;;  %v10053_v37 = vld [vmem:[#allocation83_spill] sm:$0xff]  ;;  %v10056_v52 = vld [vmem:[#allocation134_spill] sm:$0xff] }
 0x46a   : > { %v3158_v63 = vmul.f32 1.442695, %v2724_v15  ;;  %v7908_v44 = vpop.eup %5197  ;;  %5217 = vpow2.f32 %v2948_v7  ;;  %v3164_v26 = vmul.f32 1.442695, %v2727_v36  ;;  %v2275_v20 = vpop.xlane.xlu0 %2274  ;;  %v3858_v48 = vpack.c.bf16 %v7906_v59, %v7877_v5  ;;  %v10055_v15 = vld [vmem:[#allocation132_spill] sm:$0xff]  ;;  %v10101_v35 = vld [vmem:[#allocation93_spill] sm:$0xff] }
 0x46b   : > { %v3162_v6 = vmul.f32 1.442695, %v2726_v25  ;;  %3387 = vadd.xlane.f32.xlu1 %v7638_v30  ;;  %v2278_v27 = vpop.xlane.xlu1 %2277  ;;  %v7915_v61 = vpop.eup %5199  ;;  %v10054_v25 = vmax.f32 %v7562_v32, %v10053_v37  ;;  %v2620_v7 = vsub.f32 %v10055_v15, %v2275_v20  ;;  %v2621_v36 = vsub.f32 %v10056_v52, %v2275_v20 }
 0x46c   : > { %5219 = vpow2.f32 %v3158_v63  ;;  %v3859_v30 = vpack.c.bf16 %v7908_v44, %v5194_v9  ;;  %v7923_v18 = vpop.f32.mrb[140].mxu1  ;;  %v7925_v11 = vpop.eup %5201  ;;  %v2622_v13 = vsub.f32 %v10058_v56, %v2278_v27  ;;  %v2623_v50 = vsub.f32 %v10059_v62, %v2278_v27 }
 0x46d   : > { %2352 = vmax.xlane.f32.xlu0 %v10054_v25  ;;  %10057 = vst [vmem:[#allocation90_spill] sm:$0xff] %v7923_v18  ;;  %5221 = vpow2.f32 %v3160_v4  ;;  %v7931_v37 = vpop.f32.mrb[141].mxu1  ;;  %v7933_v25 = vpop.eup %5203  ;;  %v2950_v20 = vmul.f32 1.442695, %v2620_v7  ;;  %v2952_v15 = vmul.f32 1.442695, %v2621_v36  ;;  %v7936_v52 = vadd.f32 %v5194_v9, %v7877_v5 }
 0x46e   : > { %10062 = vst [vmem:[#allocation125_spill] sm:$0xff] %v7931_v37  ;;  %10063 = vst [vmem:[#allocation127_spill] sm:$0xff] %v7933_v25  ;;  %5223 = vpow2.f32 %v3162_v6  ;;  %4007 = vmatprep.subr.bf16.mxu1 %v3859_v30  ;;  %v7938_v32 = vpop.f32.mrb[142].mxu1  ;;  %v7940_v4 = vpop.eup %5205  ;;  %v2954_v62 = vmul.f32 1.442695, %v2622_v13  ;;  %v7945_v6 = vadd.f32 %v7866_v40, %v7858_v51  ;;  %v10066_v9 = vpack.c.bf16 %v7810_v14, %v7793_v28  ;;  %v10067_v5 = vld [vmem:[#allocation133_spill] sm:$0xff] }
 0x46f   : > { %10064 = vst [vmem:[#allocation129_spill] sm:$0xff] %v7936_v52  ;;  %5225 = vpow2.f32 %v3164_v26  ;;  %v2956_v56 = vmul.f32 1.442695, %v2623_v50  ;;  %3549 = vadd.xlane.f32.xlu1 %v7649_v19  ;;  %4008 = vmatpush1.bf16.xpose.msra.mxu1 %v3858_v48  ;;  %v2437_v27 = vpop.xlane.xlu0 %2436  ;;  %v2440_v17 = vpop.xlane.xlu1 %2439  ;;  %v10068_v26 = vld [vmem:[#allocation135_spill] sm:$0xff]  ;;  %v10069_v48 = vld [vmem:[#allocation137_spill] sm:$0xff]  ;;  %v8002_v14 = vadd.f32 %v7940_v4, %v7933_v25  ;;  %v10121_v37 = vld [vmem:[#allocation20_spill] sm:$0xff] }
 0x470   : > { %10065 = vst [vmem:[#allocation131_spill] sm:$0xff] %v7945_v6  ;;  %v7947_v7 = vpop.eup %5207  ;;  %5227 = vpow2.f32 %v2950_v20  ;;  %3985 = vmatpush1.bf16.xpose.msra.mxu0 %v10066_v9  ;;  %v2728_v50 = vsub.f32 %v10067_v5, %v2437_v27  ;;  %v2729_v19 = vsub.f32 %v10068_v26, %v2437_v27  ;;  %v2730_v13 = vsub.f32 %v10069_v48, %v2440_v17  ;;  %v7956_v36 = vpop.f32.mrb[143].mxu1  ;;  %v10071_v6 = vld [vmem:[#allocation139_spill] sm:$0xff]  ;;  %v10092_v9 = vld [vmem:[#allocation21_spill] sm:$0xff]  ;;  %v10132_v18 = vld [vmem:[#allocation152_spill] sm:$0xff] }
 0x471   : > { %3390 = vadd.xlane.f32.xlu0 %v7666_v38  ;;  %v7958_v30 = vpop.eup %5209  ;;  %5229 = vpow2.f32 %v2952_v15  ;;  %v10070_v20 = vpack.c.bf16 %v7209_v23, %v7182_v12  ;;  %v2731_v28 = vsub.f32 %v10071_v6, %v2440_v17  ;;  %v10074_v12 = vld [vmem:[#allocation88_spill] sm:$0xff]  ;;  %v7979_v5 = vadd.f32 %v7908_v44, %v7906_v59  ;;  %v10081_v44 = vld [vmem:[#allocation146_spill] sm:$0xff]  ;;  %10085 = vst [vmem:[#allocation136_spill] sm:$0xff] %v8002_v14  ;;  %v10091_v14 = vld [vmem:[#allocation23_spill] sm:$0xff] }
 0x472   : > { %v7968_v27 = vpop.eup %5211  ;;  %5231 = vpow2.f32 %v2954_v62  ;;  %v3166_v26 = vmul.f32 1.442695, %v2728_v50  ;;  %v3168_v48 = vmul.f32 1.442695, %v2729_v19  ;;  %v3170_v52 = vmul.f32 1.442695, %v2730_v13 }
 0x473   : > { %4060 = vmatprep.subr.bf16.mxu0 %v10070_v20  ;;  %v7970_v63 = vpop.eup %5213  ;;  %5233 = vpow2.f32 %v2956_v56  ;;  %v3172_v15 = vmul.f32 1.442695, %v2731_v28  ;;  %v10075_v23 = vld [vmem:[#allocation92_spill] sm:$0xff]  ;;  %v2281_v17 = vpop.xlane.xlu0 %2280  ;;  %v3860_v38 = vpack.c.bf16 %v7968_v27, %v7915_v61  ;;  %10077 = vst [vmem:[#allocation132_spill] sm:$0xff] %v7979_v5  ;;  %v10079_v19 = vld [vmem:[#allocation141_spill] sm:$0xff]  ;;  %v10093_v43 = vpack.c.bf16 %v10091_v14, %v10092_v9 }
 0x474   : > { %v10076_v20 = vmax.f32 %v10074_v12, %v10075_v23  ;;  %v2284_v6 = vpop.xlane.xlu1 %2283  ;;  %v7981_v62 = vpop.eup %5215  ;;  %5235 = vpow2.f32 %v3166_v26  ;;  %v10078_v56 = vld [vmem:[#allocation140_spill] sm:$0xff]  ;;  %v2625_v13 = vsub.f32 %v10079_v19, %v2281_v17  ;;  %v3861_v28 = vpack.c.bf16 %v7970_v63, %v7925_v11 }
 0x475   : > { %3552 = vadd.xlane.f32.xlu0 %v7683_v31  ;;  %v2624_v50 = vsub.f32 %v10078_v56, %v2281_v17  ;;  %v7990_v23 = vpop.eup %5217  ;;  %5237 = vpow2.f32 %v3168_v48  ;;  %v10080_v12 = vld [vmem:[#allocation144_spill] sm:$0xff]  ;;  %v2627_v2 = vsub.f32 %v10081_v44, %v2284_v6  ;;  %v10088_v44 = vld [vmem:[#allocation18_spill] sm:$0xff]  ;;  %v8035_v9 = vadd.f32 %v7925_v11, %v7915_v61 }
 0x476   : > { %2451 = vmax.xlane.f32.xlu1 %v10076_v20  ;;  %v7988_v20 = vpop.f32.mrb[144].mxu1  ;;  %v2626_v59 = vsub.f32 %v10080_v12, %v2284_v6  ;;  %v7998_v56 = vpop.eup %5219  ;;  %5239 = vpow2.f32 %v3170_v52  ;;  %v2960_v19 = vmul.f32 1.442695, %v2625_v13  ;;  %4009 = vmatprep.subr.bf16.mxu1 %v3861_v28  ;;  %v10087_v6 = vld [vmem:[#allocation19_spill] sm:$0xff]  ;;  %v10099_v13 = vpack.c.bf16 %v7202_v3, %v7172_v29 }
 0x477   : > { %v7996_v31 = vpop.f32.mrb[145].mxu1  ;;  %v2958_v17 = vmul.f32 1.442695, %v2624_v50  ;;  %v8006_v12 = vpop.eup %5221  ;;  %5241 = vpow2.f32 %v3172_v15  ;;  %v10089_v5 = vpack.c.bf16 %v10087_v6, %v10088_v44  ;;  %v2964_v26 = vmul.f32 1.442695, %v2627_v2  ;;  %4010 = vmatpush1.bf16.xpose.msra.mxu1 %v3860_v38  ;;  %v10094_v15 = vld [vmem:[#allocation142_spill] sm:$0xff] }
 0x478   : > { %10084 = vst [vmem:[#allocation134_spill] sm:$0xff] %v7996_v31  ;;  %v8004_v48 = vpop.f32.mrb[146].mxu1  ;;  %v2962_v41 = vmul.f32 1.442695, %v2626_v59  ;;  %v2443_v52 = vpop.xlane.xlu0 %2442  ;;  %v10096_v2 = vld [vmem:[#allocation145_spill] sm:$0xff]  ;;  %v10106_v29 = vpack.c.bf16 %v7268_v24, %v7242_v16  ;;  %v10110_v24 = vld [vmem:[#allocation148_spill] sm:$0xff] }
 0x479   : > { %10086 = vst [vmem:[#allocation138_spill] sm:$0xff] %v8004_v48  ;;  %3987 = vmatmul.mubr.bf16.vlgmr.msra.gmra.mrb[168].mxu0 %v10089_v5  ;;  %v2446_v50 = vpop.xlane.xlu1 %2445  ;;  %v8014_v28 = vpop.eup %5223  ;;  %5243 = vpow2.f32 %v2958_v17  ;;  %v2732_v6 = vsub.f32 %v10094_v15, %v2443_v52  ;;  %v10095_v5 = vld [vmem:[#allocation143_spill] sm:$0xff]  ;;  %v10100_v17 = vld [vmem:[#allocation89_spill] sm:$0xff] }
 0x47a   : > { %3393 = vadd.xlane.f32.xlu1 %v7712_v1  ;;  %10090 = vst [vmem:[#allocation133_spill] sm:$0xff] %v8014_v28  ;;  %3996 = vmatprep.mubr.bf16.mxu0 %v10093_v43  ;;  %v2733_v59 = vsub.f32 %v10095_v5, %v2443_v52  ;;  %v2734_v44 = vsub.f32 %v10096_v2, %v2446_v50  ;;  %v8022_v1 = vpop.f32.mrb[147].mxu1  ;;  %v8024_v25 = vpop.eup %5225  ;;  %5245 = vpow2.f32 %v2960_v19  ;;  %v10103_v43 = vld [vmem:[#allocation147_spill] sm:$0xff]  ;;  %v10104_v52 = vld [vmem:[#allocation84_spill] sm:$0xff]  ;;  %v10105_v15 = vld [vmem:[#allocation85_spill] sm:$0xff] }
 0x47b   : > { %10097 = vst [vmem:[#allocation135_spill] sm:$0xff] %v8022_v1  ;;  %10098 = vst [vmem:[#allocation137_spill] sm:$0xff] %v8024_v25  ;;  %4061 = vmatpush1.bf16.xpose.msra.mxu0 %v10099_v13  ;;  %v10102_v14 = vmax.f32 %v10100_v17, %v10101_v35  ;;  %v2735_v38 = vsub.f32 %v10103_v43, %v2446_v50  ;;  %v8039_v2 = vpop.eup %5227  ;;  %5247 = vpow2.f32 %v2962_v41  ;;  %v3174_v3 = vmul.f32 1.442695, %v2732_v6  ;;  %v10109_v5 = vld [vmem:[#allocation96_spill] sm:$0xff]  ;;  %v10125_v17 = vld [vmem:[#allocation99_spill] sm:$0xff] }
 0x47c   : > { %4062 = vmatprep.subr.bf16.mxu0 %v10106_v29  ;;  %v3176_v19 = vmul.f32 1.442695, %v2733_v59  ;;  %v3178_v13 = vmul.f32 1.442695, %v2734_v44  ;;  %5249 = vpow2.f32 %v2964_v26  ;;  %v2287_v61 = vpop.xlane.xlu0 %2286  ;;  %v3862_v43 = vpack.c.bf16 %v8039_v2, %v7981_v62  ;;  %v10111_v59 = vld [vmem:[#allocation149_spill] sm:$0xff]  ;;  %v8059_v26 = vpop.f32.mrb[148].mxu1 }
 0x47d   : > { %2454 = vmax.xlane.f32.xlu0 %v10102_v14  ;;  %v8044_v14 = vpop.eup %5229  ;;  %v3180_v11 = vmul.f32 1.442695, %v2735_v38  ;;  %v8047_v50 = vpop.xlane.xlu1 %3315  ;;  %5251 = vpow2.f32 %v3174_v3  ;;  %v2628_v6 = vsub.f32 %v10110_v24, %v2287_v61  ;;  %v2629_v44 = vsub.f32 %v10111_v59, %v2287_v61  ;;  %10112 = vst [vmem:[#allocation140_spill] sm:$0xff] %v8059_v26  ;;  %v10120_v3 = vld [vmem:[#allocation22_spill] sm:$0xff] }
 0x47e   : > { %3555 = vadd.xlane.f32.xlu1 %v7733_v53  ;;  %10107 = vst [vmem:[#allocation139_spill] sm:$0xff] %v8047_v50  ;;  %v8053_v16 = vpop.eup %5231  ;;  %v3863_v53 = vpack.c.bf16 %v8044_v14, %v7990_v23  ;;  %5253 = vpow2.f32 %v3176_v19  ;;  %v8066_v29 = vadd.f32 %v7958_v30, %v7947_v7  ;;  %v8072_v61 = vadd.f32 %v7970_v63, %v7968_v27  ;;  %v8074_v24 = vpop.f32.mrb[149].mxu1 }
 0x47f   : > { %v8061_v38 = vpop.eup %5233  ;;  %10115 = vst [vmem:[#allocation146_spill] sm:$0xff] %v8074_v24  ;;  %5255 = vpow2.f32 %v3178_v13  ;;  %v2966_v35 = vmul.f32 1.442695, %v2628_v6  ;;  %v2968_v19 = vmul.f32 1.442695, %v2629_v44  ;;  %v8080_v41 = vpop.f32.mrb[150].mxu1  ;;  %v10122_v63 = vpack.c.bf16 %v10120_v3, %v10121_v37 }
 0x480   : > { %10113 = vst [vmem:[#allocation141_spill] sm:$0xff] %v8066_v29  ;;  %10114 = vst [vmem:[#allocation144_spill] sm:$0xff] %v8072_v61  ;;  %v8076_v59 = vpop.eup %5235  ;;  %4011 = vmatprep.subr.bf16.mxu1 %v3863_v53  ;;  %5257 = vpow2.f32 %v3180_v11  ;;  %v10123_v27 = vmax.f32 %v7659_v58, %v7670_v47  ;;  %v2449_v13 = vpop.xlane.xlu0 %2448  ;;  %v8092_v44 = vadd.f32 %v8006_v12, %v7998_v56  ;;  %v10127_v37 = vld [vmem:[#allocation33_spill] sm:$0xff]  ;;  %v10128_v3 = vld [vmem:[#allocation31_spill] sm:$0xff] }
 0x481   : > { %3396 = vadd.xlane.f32.xlu0 %v7764_v21  ;;  %10116 = vst [vmem:[#allocation19_spill] sm:$0xff] %v8076_v59  ;;  %10119 = vst [vmem:[#allocation18_spill] sm:$0xff] %v8080_v41  ;;  %v8082_v29 = vpop.eup %5237  ;;  %3997 = vmatmul.mubr.bf16.gmra.mrb[172].mxu0 %v10122_v63  ;;  %v2290_v6 = vpop.xlane.xlu1 %2289  ;;  %5259 = vpow2.f32 %v2966_v35  ;;  %v10129_v63 = vpack.c.bf16 %v10127_v37, %v10128_v3  ;;  %v10131_v58 = vld [vmem:[#allocation151_spill] sm:$0xff]  ;;  %v10135_v11 = vpack.c.bf16 %v7261_v46, %v7229_v60  ;;  %v10136_v35 = vld [vmem:[#allocation153_spill] sm:$0xff] }
 0x482   : > { %2457 = vmax.xlane.f32.xlu1 %v10123_v27  ;;  %10124 = vst [vmem:[#allocation23_spill] sm:$0xff] %v8092_v44  ;;  %v8098_v21 = vpop.eup %5239  ;;  %4012 = vmatpush1.bf16.xpose.msra.mxu1 %v3862_v43  ;;  %v10130_v27 = vld [vmem:[#allocation150_spill] sm:$0xff]  ;;  %v2737_v50 = vsub.f32 %v10131_v58, %v2449_v13  ;;  %v2630_v44 = vsub.f32 %v10132_v18, %v2290_v6  ;;  %v8106_v61 = vpop.f32.mrb[151].mxu1  ;;  %5261 = vpow2.f32 %v2968_v19  ;;  %v10173_v41 = vld [vmem:[#allocation112_spill] sm:$0xff] }
 0x483   : > { %10126 = vst [vmem:[#allocation21_spill] sm:$0xff] %v8098_v21  ;;  %4092 = vmatprep.mubr.bf16.mxu0 %v10129_v63  ;;  %v2736_v47 = vsub.f32 %v10130_v27, %v2449_v13  ;;  %10133 = vst [vmem:[#allocation142_spill] sm:$0xff] %v8106_v61  ;;  %v8108_v53 = vpop.eup %5241  ;;  %4063 = vmatpush1.bf16.xpose.msra.mxu0 %v10135_v11  ;;  %v2631_v43 = vsub.f32 %v10136_v35, %v2290_v6  ;;  %v10139_v3 = vld [vmem:[#allocation102_spill] sm:$0xff]  ;;  %v10140_v63 = vld [vmem:[#allocation103_spill] sm:$0xff]  ;;  %v8134_v35 = vpop.f32.mrb[152].mxu1 }
 0x484   : > { %10134 = vst [vmem:[#allocation143_spill] sm:$0xff] %v8108_v53  ;;  %v8117_v37 = vadd.f32 %v7990_v23, %v7981_v62  ;;  %v8121_v58 = vadd.f32 %v8024_v25, %v8014_v28  ;;  %v5244_v18 = vpop.eup %5243  ;;  %v10137_v19 = vpack.c.bf16 %v7315_v39, %v7304_v10  ;;  %v3184_v60 = vmul.f32 1.442695, %v2737_v50  ;;  %v8127_v6 = vpop.xlane.xlu0 %3318  ;;  %v10143_v62 = vld [vmem:[#allocation101_spill] sm:$0xff]  ;;  %v10207_v25 = vld [vmem:[#allocation128_spill] sm:$0xff] }
 0x485   : > { %3558 = vadd.xlane.f32.xlu0 %v7770_v8  ;;  %v3182_v13 = vmul.f32 1.442695, %v2736_v47  ;;  %v2970_v46 = vmul.f32 1.442695, %v2630_v44  ;;  %v5246_v11 = vpop.eup %5245  ;;  %v2972_v8 = vmul.f32 1.442695, %v2631_v43  ;;  %v3864_v23 = vpack.c.bf16 %v5244_v18, %v8053_v16  ;;  %v8139_v47 = vpop.xlane.xlu1 %3321 }
 0x486   : > { %4064 = vmatprep.subr.bf16.mxu0 %v10137_v19  ;;  %3399 = vadd.xlane.f32.xlu1 %v7787_v22  ;;  %10138 = vst [vmem:[#allocation145_spill] sm:$0xff] %v8127_v6  ;;  %v8136_v10 = vpop.eup %5247  ;;  %v3865_v39 = vpack.c.bf16 %v5246_v11, %v8061_v38  ;;  %10141 = vst [vmem:[#allocation147_spill] sm:$0xff] %v8139_v47  ;;  %v8143_v22 = vadd.f32 %v8044_v14, %v8039_v2  ;;  %v8147_v44 = vpop.f32.mrb[153].mxu1  ;;  %v10142_v19 = vld [vmem:[#allocation97_spill] sm:$0xff]  ;;  %v10159_v6 = vld [vmem:[#allocation115_spill] sm:$0xff] }
 0x487   : > { %5263 = vpow2.f32 %v3182_v13  ;;  %v5250_v43 = vpop.eup %5249  ;;  %v10144_v27 = vmax.f32 %v10142_v19, %v10143_v62  ;;  %v8154_v13 = vadd.f32 %v8082_v29, %v8076_v59  ;;  %v8160_v2 = vadd.f32 %v8061_v38, %v8053_v16  ;;  %v8162_v14 = vpop.f32.mrb[154].mxu1  ;;  %v10149_v38 = vld [vmem:[#allocation109_spill] sm:$0xff] }
 0x488   : > { %5265 = vpow2.f32 %v3184_v60  ;;  %v8164_v50 = vpop.eup %5251  ;;  %4013 = vmatprep.subr.bf16.mxu1 %v3865_v39  ;;  %v10146_v60 = vld [vmem:[#allocation110_spill] sm:$0xff]  ;;  %v8172_v62 = vadd.f32 %v8108_v53, %v8098_v21  ;;  %v8174_v47 = vpop.f32.mrb[155].mxu1  ;;  %v8181_v39 = vadd.f32 %v5246_v11, %v5244_v18  ;;  %v10156_v18 = vld [vmem:[#allocation55_spill] sm:$0xff]  ;;  %v10157_v11 = vld [vmem:[#allocation49_spill] sm:$0xff] }
 0x489   : > { %2460 = vmax.xlane.f32.xlu0 %v10144_v27  ;;  %10145 = vst [vmem:[#allocation84_spill] sm:$0xff] %v8164_v50  ;;  %5267 = vpow2.f32 %v2970_v46  ;;  %v8176_v16 = vpop.eup %5253  ;;  %v2293_v19 = vpop.xlane.xlu0 %2292  ;;  %v10158_v46 = vpack.c.bf16 %v10156_v18, %v10157_v11  ;;  %v10166_v11 = vld [vmem:[#allocation104_spill] sm:$0xff]  ;;  %v10181_v53 = vld [vmem:[#allocation61_spill] sm:$0xff] }
 0x48a   : > { %10147 = vst [vmem:[#allocation85_spill] sm:$0xff] %v8172_v62  ;;  %10148 = vst [vmem:[#allocation96_spill] sm:$0xff] %v8176_v16  ;;  %5269 = vpow2.f32 %v2972_v8  ;;  %3561 = vadd.xlane.f32.xlu1 %v10149_v38  ;;  %v8185_v27 = vpop.eup %5255  ;;  %4014 = vmatpush1.bf16.xpose.msra.mxu1 %v3864_v23  ;;  %v10151_v62 = vld [vmem:[#allocation154_spill] sm:$0xff]  ;;  %v2633_v1 = vsub.f32 %v10152_v34, %v2293_v19  ;;  %v8189_v48 = vpop.xlane.xlu1 %3327  ;;  %v8193_v8 = vadd.f32 %v8176_v16, %v8164_v50  ;;  %v10182_v16 = vld [vmem:[#allocation60_spill] sm:$0xff] }
 0x48b   : > { %10150 = vst [vmem:[#allocation148_spill] sm:$0xff] %v8185_v27  ;;  %v2632_v0 = vsub.f32 %v10151_v62, %v2293_v19  ;;  %10153 = vst [vmem:[#allocation149_spill] sm:$0xff] %v8189_v48  ;;  %v8195_v38 = vpop.eup %5257  ;;  %4065 = vmatpush1.bf16.xpose.msra.mxu0 %v10158_v46  ;;  %v8206_v62 = vadd.f32 %v5250_v43, %v8136_v10  ;;  %v10161_v48 = vld [vmem:[#allocation63_spill] sm:$0xff]  ;;  %v10167_v23 = vld [vmem:[#allocation106_spill] sm:$0xff] }
 0x48c   : > { %10154 = vst [vmem:[#allocation22_spill] sm:$0xff] %v8193_v8  ;;  %10155 = vst [vmem:[#allocation20_spill] sm:$0xff] %v8195_v38  ;;  %v5260_v19 = vpop.eup %5259  ;;  %v10162_v8 = vld [vmem:[#allocation57_spill] sm:$0xff]  ;;  %v2976_v24 = vmul.f32 1.442695, %v2633_v1  ;;  %v8213_v46 = vadd.f32 %v8195_v38, %v8185_v27  ;;  %v10168_v34 = vmax.f32 %v10166_v11, %v10167_v23  ;;  %v10184_v21 = vld [vmem:[#allocation108_spill] sm:$0xff] }
 0x48d   : > { %3402 = vadd.xlane.f32.xlu0 %v10159_v6  ;;  %10160 = vst [vmem:[#allocation99_spill] sm:$0xff] %v8206_v62  ;;  %v10163_v55 = vpack.c.bf16 %v10161_v48, %v10162_v8  ;;  %v2974_v57 = vmul.f32 1.442695, %v2632_v0  ;;  %v8215_v6 = vpop.f32.mrb[156].mxu1  ;;  %v5262_v18 = vpop.eup %5261  ;;  %v3866_v61 = vpack.c.bf16 %v5260_v19, %v8136_v10  ;;  %v10176_v10 = vld [vmem:[#allocation156_spill] sm:$0xff]  ;;  %v10179_v48 = vld [vmem:[#allocation117_spill] sm:$0xff] }
 0x48e   : > { %10164 = vst [vmem:[#allocation33_spill] sm:$0xff] %v8213_v46  ;;  %10165 = vst [vmem:[#allocation31_spill] sm:$0xff] %v8215_v6  ;;  %2463 = vmax.xlane.f32.xlu1 %v10168_v34  ;;  %v8227_v1 = vpop.f32.mrb[157].mxu1  ;;  %v8229_v8 = vpop.xlane.xlu0 %3324  ;;  %v3867_v46 = vpack.c.bf16 %v5262_v18, %v5250_v43  ;;  %v8231_v62 = vadd.f32 %v5262_v18, %v5260_v19 }
 0x48f   : > { %4066 = vmatprep.subr.bf16.mxu0 %v10163_v55  ;;  %v10169_v55 = vld [vmem:[#allocation127_spill] sm:$0xff]  ;;  %10170 = vst [vmem:[#allocation150_spill] sm:$0xff] %v8227_v1  ;;  %5271 = vpow2.f32 %v2974_v57  ;;  %10171 = vst [vmem:[#allocation151_spill] sm:$0xff] %v8229_v8  ;;  %v8235_v34 = vpop.f32.mrb[158].mxu1  ;;  %v2296_v0 = vpop.xlane.xlu1 %2295  ;;  %v10191_v57 = vld [vmem:[#allocation121_spill] sm:$0xff] }
 0x490   : > { %10172 = vst [vmem:[#allocation152_spill] sm:$0xff] %v8235_v34  ;;  %5273 = vpow2.f32 %v2976_v24  ;;  %v8244_v19 = vpop.f32.mrb[159].mxu1  ;;  %4015 = vmatprep.subr.bf16.mxu1 %v3867_v46  ;;  %v2634_v8 = vsub.f32 %v10176_v10, %v2296_v0  ;;  %v10177_v24 = vld [vmem:[#allocation157_spill] sm:$0xff]  ;;  %v10183_v46 = vpack.c.bf16 %v10181_v53, %v10182_v16  ;;  %v10199_v34 = vld [vmem:[#allocation107_spill] sm:$0xff]  ;;  %v10205_v1 = vld [vmem:[#allocation160_spill] sm:$0xff] }
 0x491   : > { %3564 = vadd.xlane.f32.xlu0 %v10173_v41  ;;  %10174 = vst [vmem:[#allocation153_spill] sm:$0xff] %v8244_v19  ;;  %v8246_v18 = vpop.eup %5263  ;;  %v2635_v23 = vsub.f32 %v10177_v24, %v2296_v0  ;;  %v10185_v10 = vld [vmem:[#allocation105_spill] sm:$0xff] }
 0x492   : > { %10175 = vst [vmem:[#allocation102_spill] sm:$0xff] %v8246_v18  ;;  %v8252_v11 = vpop.eup %5265  ;;  %3405 = vadd.xlane.f32.xlu1 %v10179_v48  ;;  %4016 = vmatpush1.bf16.xpose.msra.mxu1 %v3866_v61  ;;  %v2978_v24 = vmul.f32 1.442695, %v2634_v8  ;;  %v8263_v19 = vpop.xlane.xlu0 %3330  ;;  %v10186_v27 = vmax.f32 %v10184_v21, %v10185_v10  ;;  %v10187_v61 = vld [vmem:[#allocation71_spill] sm:$0xff] }
 0x493   : > { %10178 = vst [vmem:[#allocation103_spill] sm:$0xff] %v8252_v11  ;;  %v5268_v0 = vpop.eup %5267  ;;  %v2980_v41 = vmul.f32 1.442695, %v2635_v23  ;;  %10180 = vst [vmem:[#allocation110_spill] sm:$0xff] %v8263_v19  ;;  %v8267_v48 = vadd.f32 %v8252_v11, %v8246_v18  ;;  %4067 = vmatpush1.bf16.xpose.msra.mxu0 %v10183_v46  ;;  %v10188_v23 = vld [vmem:[#allocation65_spill] sm:$0xff]  ;;  %v8282_v18 = vpop.f32.mrb[160].mxu1 }
 0x494   : > { %v5270_v43 = vpop.eup %5269  ;;  %5275 = vpow2.f32 %v2978_v24  ;;  %v10189_v8 = vpack.c.bf16 %v10187_v61, %v10188_v23  ;;  %10190 = vst [vmem:[#allocation109_spill] sm:$0xff] %v8282_v18  ;;  %v8285_v38 = vpop.f32.mrb[161].mxu1  ;;  %v10194_v46 = vld [vmem:[#allocation124_spill] sm:$0xff]  ;;  %v10195_v24 = vld [vmem:[#allocation158_spill] sm:$0xff]  ;;  %v10196_v23 = vld [vmem:[#allocation159_spill] sm:$0xff] }
 0x495   : > { %2466 = vmax.xlane.f32.xlu0 %v10186_v27  ;;  %v8280_v19 = vadd.f32 %v5270_v43, %v5268_v0  ;;  %5277 = vpow2.f32 %v2980_v41  ;;  %10192 = vst [vmem:[#allocation154_spill] sm:$0xff] %v8285_v38  ;;  %v8287_v53 = vpop.xlane.xlu1 %3333  ;;  %v8294_v10 = vpop.f32.mrb[162].mxu1 }
 0x496   : > { %4068 = vmatprep.subr.bf16.mxu0 %v10189_v8  ;;  %3567 = vadd.xlane.f32.xlu1 %v10191_v57  ;;  %10193 = vst [vmem:[#allocation155_spill] sm:$0xff] %v8287_v53  ;;  %v2299_v16 = vpop.xlane.xlu0 %2298  ;;  %10197 = vst [vmem:[#allocation55_spill] sm:$0xff] %v8294_v10  ;;  %v8296_v41 = vpop.f32.mrb[163].mxu1  ;;  %v10200_v53 = vld [vmem:[#allocation111_spill] sm:$0xff] }
 0x497   : > { %v2636_v61 = vsub.f32 %v10195_v24, %v2299_v16  ;;  %v2637_v8 = vsub.f32 %v10196_v23, %v2299_v16  ;;  %10198 = vst [vmem:[#allocation49_spill] sm:$0xff] %v8296_v41  ;;  %v10201_v28 = vmax.f32 %v10199_v34, %v10200_v53  ;;  %v10202_v16 = vld [vmem:[#allocation69_spill] sm:$0xff]  ;;  %v10203_v23 = vld [vmem:[#allocation68_spill] sm:$0xff] }
 0x498   : > { %v10204_v18 = vpack.c.bf16 %v10202_v16, %v10203_v23  ;;  %v10228_v41 = vld [vmem:[#allocation132_spill] sm:$0xff] }
 0x499   : > { %3408 = vadd.xlane.f32.xlu0 %v10194_v46  ;;  %v5272_v21 = vpop.eup %5271  ;;  %v2982_v11 = vmul.f32 1.442695, %v2636_v61  ;;  %v2984_v50 = vmul.f32 1.442695, %v2637_v8  ;;  %v2302_v27 = vpop.xlane.xlu1 %2301  ;;  %v10206_v8 = vld [vmem:[#allocation161_spill] sm:$0xff] }
 0x49a   : > { %v5274_v57 = vpop.eup %5273  ;;  %2469 = vmax.xlane.f32.xlu1 %v10201_v28  ;;  %v3868_v59 = vpack.c.bf16 %v5272_v21, %v5268_v0  ;;  %v2638_v61 = vsub.f32 %v10205_v1, %v2302_v27  ;;  %v2639_v6 = vsub.f32 %v10206_v8, %v2302_v27  ;;  %v8311_v28 = vpop.xlane.xlu0 %3336  ;;  %v10209_v0 = vld [vmem:[#allocation79_spill] sm:$0xff]  ;;  %v10210_v46 = vld [vmem:[#allocation73_spill] sm:$0xff] }
 0x49b   : > { %v3869_v24 = vpack.c.bf16 %v5274_v57, %v5270_v43  ;;  %v8303_v38 = vadd.f32 %v5274_v57, %v5272_v21  ;;  %5279 = vpow2.f32 %v2982_v11  ;;  %4069 = vmatpush1.bf16.xpose.msra.mxu0 %v10204_v18  ;;  %10208 = vst [vmem:[#allocation115_spill] sm:$0xff] %v8311_v28  ;;  %v10211_v53 = vpack.c.bf16 %v10209_v0, %v10210_v46  ;;  %v8316_v21 = vpop.f32.mrb[164].mxu1  ;;  %v10213_v57 = vld [vmem:[#allocation129_spill] sm:$0xff]  ;;  %v10221_v8 = vld [vmem:[#allocation163_spill] sm:$0xff] }
 0x49c   : > { %5281 = vpow2.f32 %v2984_v50  ;;  %10212 = vst [vmem:[#allocation63_spill] sm:$0xff] %v8316_v21  ;;  %v2986_v11 = vmul.f32 1.442695, %v2638_v61  ;;  %v2988_v43 = vmul.f32 1.442695, %v2639_v6  ;;  %v8319_v1 = vpop.f32.mrb[165].mxu1 }
 0x49d   : > { %3570 = vadd.xlane.f32.xlu0 %v10207_v25  ;;  %4070 = vmatprep.subr.bf16.mxu0 %v10211_v53  ;;  %10214 = vst [vmem:[#allocation57_spill] sm:$0xff] %v8319_v1  ;;  %v8321_v27 = vpop.xlane.xlu1 %3339  ;;  %v8325_v50 = vpop.f32.mrb[166].mxu1  ;;  %v10216_v53 = vld [vmem:[#allocation113_spill] sm:$0xff]  ;;  %v10226_v1 = vld [vmem:[#allocation164_spill] sm:$0xff] }
 0x49e   : > { %4017 = vmatprep.subr.bf16.mxu1 %v3869_v24  ;;  %3411 = vadd.xlane.f32.xlu1 %v10213_v57  ;;  %v5276_v18 = vpop.eup %5275  ;;  %10215 = vst [vmem:[#allocation127_spill] sm:$0xff] %v8321_v27  ;;  %5283 = vpow2.f32 %v2986_v11  ;;  %v10217_v24 = vld [vmem:[#allocation116_spill] sm:$0xff]  ;;  %v2305_v6 = vpop.xlane.xlu0 %2304  ;;  %v10222_v27 = vld [vmem:[#allocation131_spill] sm:$0xff]  ;;  %v10227_v21 = vld [vmem:[#allocation165_spill] sm:$0xff] }
 0x49f   : > { %4018 = vmatpush1.bf16.xpose.msra.mxu1 %v3868_v59  ;;  %v5278_v46 = vpop.eup %5277  ;;  %v10218_v16 = vmax.f32 %v10216_v53, %v10217_v24  ;;  %v8330_v23 = vpop.f32.mrb[167].mxu1  ;;  %5285 = vpow2.f32 %v2988_v43  ;;  %v10220_v59 = vld [vmem:[#allocation162_spill] sm:$0xff]  ;;  %v2641_v0 = vsub.f32 %v10221_v8, %v2305_v6  ;;  %v10223_v24 = vld [vmem:[#allocation77_spill] sm:$0xff] }
 0x4a0   : > { %10219 = vst [vmem:[#allocation112_spill] sm:$0xff] %v8330_v23  ;;  %v2640_v61 = vsub.f32 %v10220_v59, %v2305_v6  ;;  %v8334_v57 = vadd.f32 %v5278_v46, %v5276_v18  ;;  %v10231_v8 = vld [vmem:[#allocation81_spill] sm:$0xff] }
 0x4a1   : > { %2472 = vmax.xlane.f32.xlu0 %v10218_v16  ;;  %v2992_v28 = vmul.f32 1.442695, %v2641_v0  ;;  %v2308_v34 = vpop.xlane.xlu1 %2307  ;;  %v10224_v16 = vld [vmem:[#allocation76_spill] sm:$0xff] }
 0x4a2   : > { %3573 = vadd.xlane.f32.xlu1 %v10222_v27  ;;  %v2990_v11 = vmul.f32 1.442695, %v2640_v61  ;;  %v10225_v53 = vpack.c.bf16 %v10223_v24, %v10224_v16  ;;  %v2642_v43 = vsub.f32 %v10226_v1, %v2308_v34  ;;  %v2643_v59 = vsub.f32 %v10227_v21, %v2308_v34  ;;  %v8345_v6 = vpop.xlane.xlu0 %3342  ;;  %v10230_v27 = vld [vmem:[#allocation87_spill] sm:$0xff]  ;;  %v8350_v61 = vpop.f32.mrb[168].mxu1 }
 0x4a3   : > { %10229 = vst [vmem:[#allocation156_spill] sm:$0xff] %v8345_v6  ;;  %v10232_v10 = vpack.c.bf16 %v10230_v27, %v10231_v8  ;;  %10233 = vst [vmem:[#allocation157_spill] sm:$0xff] %v8350_v61  ;;  %v10235_v16 = vld [vmem:[#allocation123_spill] sm:$0xff]  ;;  %v8355_v34 = vpop.f32.mrb[169].mxu1  ;;  %v10240_v8 = vld [vmem:[#allocation136_spill] sm:$0xff] }
 0x4a4   : > { %4071 = vmatpush1.bf16.xpose.msra.mxu0 %v10225_v53  ;;  %5287 = vpow2.f32 %v2990_v11  ;;  %v2994_v25 = vmul.f32 1.442695, %v2642_v43  ;;  %v2996_v24 = vmul.f32 1.442695, %v2643_v59  ;;  %v10234_v53 = vld [vmem:[#allocation119_spill] sm:$0xff]  ;;  %10237 = vst [vmem:[#allocation117_spill] sm:$0xff] %v8355_v34 }
 0x4a5   : > { %3414 = vadd.xlane.f32.xlu0 %v10228_v41  ;;  %4072 = vmatprep.subr.bf16.mxu0 %v10232_v10  ;;  %v5280_v0 = vpop.eup %5279  ;;  %5289 = vpow2.f32 %v2992_v28  ;;  %v10236_v1 = vmax.f32 %v10234_v53, %v10235_v16  ;;  %v8357_v21 = vpop.xlane.xlu1 %3345  ;;  %v10243_v53 = vld [vmem:[#allocation167_spill] sm:$0xff] }
 0x4a6   : > { %v5282_v41 = vpop.eup %5281  ;;  %10238 = vst [vmem:[#allocation61_spill] sm:$0xff] %v8357_v21  ;;  %v3870_v11 = vpack.c.bf16 %v5280_v0, %v5276_v18  ;;  %v8361_v10 = vpop.f32.mrb[170].mxu1  ;;  %5291 = vpow2.f32 %v2994_v25 }
 0x4a7   : > { %2475 = vmax.xlane.f32.xlu1 %v10236_v1  ;;  %10239 = vst [vmem:[#allocation60_spill] sm:$0xff] %v8361_v10  ;;  %v2311_v28 = vpop.xlane.xlu0 %2310  ;;  %v3871_v43 = vpack.c.bf16 %v5282_v41, %v5278_v46  ;;  %v8364_v59 = vadd.f32 %v5282_v41, %v5280_v0  ;;  %v8366_v6 = vpop.f32.mrb[171].mxu1  ;;  %5293 = vpow2.f32 %v2996_v24  ;;  %v10242_v1 = vld [vmem:[#allocation166_spill] sm:$0xff]  ;;  %v10245_v0 = vpack.c.bf16 %v10105_v15, %v10104_v52 }
 0x4a8   : > { %10241 = vst [vmem:[#allocation71_spill] sm:$0xff] %v8366_v6  ;;  %v2644_v16 = vsub.f32 %v10242_v1, %v2311_v28  ;;  %v2645_v21 = vsub.f32 %v10243_v53, %v2311_v28  ;;  %v5284_v27 = vpop.eup %5283  ;;  %v10246_v24 = vld [vmem:[#allocation130_spill] sm:$0xff] }
 0x4a9   : > { %3576 = vadd.xlane.f32.xlu0 %v10240_v8  ;;  %4019 = vmatprep.subr.bf16.mxu1 %v3871_v43  ;;  %v5286_v25 = vpop.eup %5285  ;;  %v8373_v46 = vpop.xlane.xlu1 %3507  ;;  %v10247_v53 = vmax.f32 %v7895_v42, %v10246_v24  ;;  %v10258_v6 = vld [vmem:[#allocation90_spill] sm:$0xff] }
 0x4aa   : > { %v2998_v8 = vmul.f32 1.442695, %v2644_v16  ;;  %v3000_v34 = vmul.f32 1.442695, %v2645_v21  ;;  %10244 = vst [vmem:[#allocation65_spill] sm:$0xff] %v8373_v46  ;;  %4020 = vmatpush1.bf16.xpose.msra.mxu1 %v3870_v11  ;;  %v8383_v28 = vadd.f32 %v5286_v25, %v5284_v27  ;;  %v8388_v21 = vpop.f32.mrb[172].mxu1 }
 0x4ab   : > { %3417 = vadd.xlane.f32.xlu1 %v8035_v9  ;;  %v8381_v41 = vpop.xlane.xlu0 %3348  ;;  %v10249_v9 = vld [vmem:[#allocation91_spill] sm:$0xff]  ;;  %10251 = vst [vmem:[#allocation124_spill] sm:$0xff] %v8388_v21  ;;  %v10252_v11 = vld [vmem:[#allocation141_spill] sm:$0xff]  ;;  %v8391_v52 = vpop.f32.mrb[173].mxu1 }
 0x4ac   : > { %4073 = vmatpush1.bf16.xpose.msra.mxu0 %v10245_v0  ;;  %10248 = vst [vmem:[#allocation121_spill] sm:$0xff] %v8381_v41  ;;  %5295 = vpow2.f32 %v2998_v8  ;;  %v10250_v16 = vpack.c.bf16 %v10109_v5, %v10249_v9  ;;  %10253 = vst [vmem:[#allocation158_spill] sm:$0xff] %v8391_v52  ;;  %v8395_v0 = vpop.f32.mrb[174].mxu1  ;;  %v10254_v8 = vld [vmem:[#allocation168_spill] sm:$0xff]  ;;  %v10255_v46 = vld [vmem:[#allocation169_spill] sm:$0xff] }
 0x4ad   : > { %2478 = vmax.xlane.f32.xlu0 %v10247_v53  ;;  %5297 = vpow2.f32 %v3000_v34  ;;  %v2314_v43 = vpop.xlane.xlu1 %2313  ;;  %v10256_v9 = vld [vmem:[#allocation144_spill] sm:$0xff] }
 0x4ae   : > { %4074 = vmatprep.subr.bf16.mxu0 %v10250_v16  ;;  %v5288_v15 = vpop.eup %5287  ;;  %v2646_v18 = vsub.f32 %v10254_v8, %v2314_v43  ;;  %v2647_v5 = vsub.f32 %v10255_v46, %v2314_v43  ;;  %v10259_v8 = vld [vmem:[#allocation125_spill] sm:$0xff] }
 0x4af   : > { %3579 = vadd.xlane.f32.xlu1 %v10252_v11  ;;  %v5290_v53 = vpop.eup %5289  ;;  %v8400_v16 = vpop.xlane.xlu0 %3510  ;;  %v3872_v34 = vpack.c.bf16 %v5288_v15, %v5284_v27  ;;  %v10260_v10 = vmax.f32 %v10258_v6, %v10259_v8  ;;  %v10262_v27 = vld [vmem:[#allocation95_spill] sm:$0xff] }
 0x4b0   : > { %10257 = vst [vmem:[#allocation159_spill] sm:$0xff] %v8400_v16  ;;  %v8402_v11 = vpop.f32.mrb[175].mxu1  ;;  %v3873_v41 = vpack.c.bf16 %v5290_v53, %v5286_v25  ;;  %v8404_v24 = vadd.f32 %v5290_v53, %v5288_v15  ;;  %v5292_v42 = vpop.eup %5291  ;;  %v3002_v52 = vmul.f32 1.442695, %v2646_v18  ;;  %v3004_v21 = vmul.f32 1.442695, %v2647_v5 }
 0x4b1   : > { %3420 = vadd.xlane.f32.xlu0 %v10256_v9  ;;  %v5294_v46 = vpop.eup %5293  ;;  %v8411_v43 = vpop.xlane.xlu1 %3351  ;;  %v10263_v9 = vld [vmem:[#allocation94_spill] sm:$0xff]  ;;  %v10265_v15 = vld [vmem:[#allocation23_spill] sm:$0xff]  ;;  %v10266_v18 = vpack.c.bf16 %v7707_v54, %v10125_v17 }
 0x4b2   : > { %4021 = vmatprep.subr.bf16.mxu1 %v3873_v41  ;;  %10261 = vst [vmem:[#allocation69_spill] sm:$0xff] %v8411_v43  ;;  %5299 = vpow2.f32 %v3002_v52  ;;  %v10264_v25 = vpack.c.bf16 %v10262_v27, %v10263_v9  ;;  %v8417_v1 = vadd.f32 %v5294_v46, %v5292_v42  ;;  %v10268_v5 = vld [vmem:[#allocation171_spill] sm:$0xff]  ;;  %v8424_v52 = vpop.f32.mrb[176].mxu1 }
 0x4b3   : > { %2481 = vmax.xlane.f32.xlu1 %v10260_v10  ;;  %v2317_v53 = vpop.xlane.xlu0 %2316  ;;  %5301 = vpow2.f32 %v3004_v21  ;;  %4022 = vmatpush1.bf16.xpose.msra.mxu1 %v3872_v34  ;;  %v10267_v10 = vld [vmem:[#allocation170_spill] sm:$0xff]  ;;  %v8427_v27 = vpop.f32.mrb[177].mxu1  ;;  %v10270_v34 = vmax.f32 %v7938_v32, %v7956_v36 }
 0x4b4   : > { %4075 = vmatpush1.bf16.xpose.msra.mxu0 %v10264_v25  ;;  %v2648_v41 = vsub.f32 %v10267_v10, %v2317_v53  ;;  %v2649_v16 = vsub.f32 %v10268_v5, %v2317_v53  ;;  %v8433_v54 = vpop.f32.mrb[178].mxu1  ;;  %v10273_v21 = vld [vmem:[#allocation46_spill] sm:$0xff] }
 0x4b5   : > { %3582 = vadd.xlane.f32.xlu0 %v10265_v15  ;;  %4076 = vmatprep.subr.bf16.mxu0 %v10266_v18  ;;  %v8429_v43 = vpop.xlane.xlu1 %3513  ;;  %v8440_v18 = vpop.f32.mrb[179].mxu1 }
 0x4b6   : > { %v5296_v9 = vpop.eup %5295  ;;  %v3006_v25 = vmul.f32 1.442695, %v2648_v41  ;;  %v3008_v15 = vmul.f32 1.442695, %v2649_v16  ;;  %10269 = vst [vmem:[#allocation68_spill] sm:$0xff] %v8429_v43  ;;  %v10274_v43 = vld [vmem:[#allocation47_spill] sm:$0xff] }
 0x4b7   : > { %3423 = vadd.xlane.f32.xlu1 %v8117_v37  ;;  %v5298_v17 = vpop.eup %5297  ;;  %v8438_v53 = vpop.xlane.xlu0 %3354  ;;  %v3874_v37 = vpack.c.bf16 %v5296_v9, %v5292_v42 }
 0x4b8   : > { %10271 = vst [vmem:[#allocation160_spill] sm:$0xff] %v8438_v53  ;;  %5303 = vpow2.f32 %v3006_v25  ;;  %v3875_v10 = vpack.c.bf16 %v5298_v17, %v5294_v46  ;;  %v8442_v16 = vadd.f32 %v5298_v17, %v5296_v9  ;;  %v10276_v9 = vpack.c.bf16 %v7778_v33, %v7760_v45 }
 0x4b9   : > { %2484 = vmax.xlane.f32.xlu0 %v10270_v34  ;;  %5305 = vpow2.f32 %v3008_v15  ;;  %v2320_v5 = vpop.xlane.xlu1 %2319  ;;  %v10272_v34 = vpack.c.bf16 %v10140_v63, %v10139_v3  ;;  %v10277_v3 = vmax.f32 %v7988_v20, %v7996_v31 }
 0x4ba   : > { %4023 = vmatprep.subr.bf16.mxu1 %v3875_v10  ;;  %v2650_v42 = vsub.f32 %v10273_v21, %v2320_v5  ;;  %v2651_v53 = vsub.f32 %v10274_v43, %v2320_v5  ;;  %v10282_v10 = vld [vmem:[#allocation48_spill] sm:$0xff] }
 0x4bb   : > { %3585 = vadd.xlane.f32.xlu1 %v8121_v58  ;;  %v8453_v46 = vpop.xlane.xlu0 %3516  ;;  %4024 = vmatpush1.bf16.xpose.msra.mxu1 %v3874_v37  ;;  %v8458_v58 = vpop.f32.mrb[180].mxu1 }
 0x4bc   : > { %4077 = vmatpush1.bf16.xpose.msra.mxu0 %v10272_v34  ;;  %10275 = vst [vmem:[#allocation161_spill] sm:$0xff] %v8453_v46  ;;  %v5300_v25 = vpop.eup %5299  ;;  %v3010_v15 = vmul.f32 1.442695, %v2650_v42  ;;  %v3012_v17 = vmul.f32 1.442695, %v2651_v53  ;;  %v8463_v63 = vpop.f32.mrb[181].mxu1  ;;  %v10285_v46 = vpack.c.bf16 %v7772_v49, %v10146_v60 }
 0x4bd   : > { %3426 = vadd.xlane.f32.xlu0 %v8143_v22  ;;  %4078 = vmatprep.subr.bf16.mxu0 %v10276_v9  ;;  %10278 = vst [vmem:[#allocation128_spill] sm:$0xff] %v8463_v63  ;;  %v5302_v43 = vpop.eup %5301  ;;  %v8465_v22 = vpop.xlane.xlu1 %3357  ;;  %v10283_v34 = vld [vmem:[#allocation50_spill] sm:$0xff]  ;;  %v10294_v60 = vld [vmem:[#allocation52_spill] sm:$0xff] }
 0x4be   : > { %10279 = vst [vmem:[#allocation79_spill] sm:$0xff] %v8465_v22  ;;  %v8469_v37 = vpop.f32.mrb[182].mxu1  ;;  %5307 = vpow2.f32 %v3010_v15  ;;  %v8472_v33 = vadd.f32 %v5302_v43, %v5300_v25  ;;  %v10287_v22 = vld [vmem:[#allocation135_spill] sm:$0xff]  ;;  %v10290_v9 = vld [vmem:[#allocation122_spill] sm:$0xff] }
 0x4bf   : > { %2487 = vmax.xlane.f32.xlu1 %v10277_v3  ;;  %10280 = vst [vmem:[#allocation73_spill] sm:$0xff] %v8469_v37  ;;  %v2323_v45 = vpop.xlane.xlu0 %2322  ;;  %v8474_v53 = vpop.f32.mrb[183].mxu1  ;;  %5309 = vpow2.f32 %v3012_v17  ;;  %v10286_v17 = vld [vmem:[#allocation138_spill] sm:$0xff] }
 0x4c0   : > { %10281 = vst [vmem:[#allocation129_spill] sm:$0xff] %v8474_v53  ;;  %v2652_v5 = vsub.f32 %v10282_v10, %v2323_v45  ;;  %v2653_v42 = vsub.f32 %v10283_v34, %v2323_v45  ;;  %v10288_v10 = vmax.f32 %v10286_v17, %v10287_v22  ;;  %v10295_v22 = vld [vmem:[#allocation54_spill] sm:$0xff] }
 0x4c1   : > { %3588 = vadd.xlane.f32.xlu0 %v8154_v13  ;;  %v8481_v41 = vpop.xlane.xlu1 %3519 }
 0x4c2   : > { %v5304_v3 = vpop.eup %5303  ;;  %v3014_v21 = vmul.f32 1.442695, %v2652_v5  ;;  %v3016_v15 = vmul.f32 1.442695, %v2653_v42  ;;  %10284 = vst [vmem:[#allocation162_spill] sm:$0xff] %v8481_v41  ;;  %v10293_v41 = vld [vmem:[#allocation85_spill] sm:$0xff] }
 0x4c3   : > { %3429 = vadd.xlane.f32.xlu1 %v8160_v2  ;;  %v5306_v13 = vpop.eup %5305  ;;  %v8489_v45 = vpop.xlane.xlu0 %3360  ;;  %v3876_v34 = vpack.c.bf16 %v5304_v3, %v5300_v25  ;;  %v10291_v2 = vld [vmem:[#allocation118_spill] sm:$0xff] }
 0x4c4   : > { %4079 = vmatpush1.bf16.xpose.msra.mxu0 %v10285_v46  ;;  %10289 = vst [vmem:[#allocation163_spill] sm:$0xff] %v8489_v45  ;;  %5311 = vpow2.f32 %v3014_v21  ;;  %v10292_v31 = vpack.c.bf16 %v10290_v9, %v10291_v2  ;;  %v3877_v5 = vpack.c.bf16 %v5306_v13, %v5302_v43  ;;  %v8494_v42 = vadd.f32 %v5306_v13, %v5304_v3  ;;  %v10297_v43 = vld [vmem:[#allocation146_spill] sm:$0xff]  ;;  %v10299_v13 = vld [vmem:[#allocation120_spill] sm:$0xff] }
 0x4c5   : > { %2490 = vmax.xlane.f32.xlu0 %v10288_v10  ;;  %5313 = vpow2.f32 %v3016_v15  ;;  %v2326_v49 = vpop.xlane.xlu1 %2325  ;;  %v10298_v3 = vmax.f32 %v8059_v26, %v10297_v43  ;;  %v10300_v2 = vld [vmem:[#allocation114_spill] sm:$0xff] }
 0x4c6   : > { %4080 = vmatprep.subr.bf16.mxu0 %v10292_v31  ;;  %4025 = vmatprep.subr.bf16.mxu1 %v3877_v5  ;;  %v2654_v46 = vsub.f32 %v10294_v60, %v2326_v49  ;;  %v2655_v10 = vsub.f32 %v10295_v22, %v2326_v49  ;;  %v10301_v5 = vpack.c.bf16 %v10299_v13, %v10300_v2  ;;  %v10302_v22 = vld [vmem:[#allocation22_spill] sm:$0xff]  ;;  %v10304_v60 = vld [vmem:[#allocation51_spill] sm:$0xff] }
 0x4c7   : > { %3591 = vadd.xlane.f32.xlu1 %v10293_v41  ;;  %4026 = vmatpush1.bf16.xpose.msra.mxu1 %v3876_v34  ;;  %v8500_v25 = vpop.xlane.xlu0 %3522  ;;  %v10303_v49 = vpack.c.bf16 %v7940_v4, %v7866_v40  ;;  %v10309_v43 = vld [vmem:[#allocation142_spill] sm:$0xff] }
 0x4c8   : > { %10296 = vst [vmem:[#allocation131_spill] sm:$0xff] %v8500_v25  ;;  %v5308_v21 = vpop.eup %5307  ;;  %v3018_v9 = vmul.f32 1.442695, %v2654_v46  ;;  %v3020_v31 = vmul.f32 1.442695, %v2655_v10  ;;  %v10305_v10 = vld [vmem:[#allocation53_spill] sm:$0xff] }
 0x4c9   : > { %3432 = vadd.xlane.f32.xlu0 %v8181_v39  ;;  %v5310_v15 = vpop.eup %5309  ;;  %v8505_v41 = vpop.xlane.xlu1 %3363  ;;  %v10306_v25 = vld [vmem:[#allocation99_spill] sm:$0xff] }
 0x4ca   : > { %5315 = vpow2.f32 %v3018_v9  ;;  %v8511_v34 = vadd.f32 %v5310_v15, %v5308_v21 }
 0x4cb   : > { %2493 = vmax.xlane.f32.xlu1 %v10298_v3  ;;  %v2329_v39 = vpop.xlane.xlu0 %2328  ;;  %5317 = vpow2.f32 %v3020_v31 }
 0x4cc   : > { %4081 = vmatpush1.bf16.xpose.msra.mxu0 %v10301_v5  ;;  %v2656_v46 = vsub.f32 %v10304_v60, %v2329_v39  ;;  %v2657_v3 = vsub.f32 %v10305_v10, %v2329_v39  ;;  %v10311_v39 = vld [vmem:[#allocation33_spill] sm:$0xff]  ;;  %v10312_v60 = vpack.c.bf16 %v10169_v55, %v7858_v51  ;;  %v10317_v51 = vmax.f32 %v8134_v35, %v8147_v44 }
 0x4cd   : > { %3594 = vadd.xlane.f32.xlu0 %v10302_v22  ;;  %4082 = vmatprep.subr.bf16.mxu0 %v10303_v49  ;;  %v8519_v2 = vpop.xlane.xlu1 %3525  ;;  %v10308_v22 = vld [vmem:[#allocation18_spill] sm:$0xff] }
 0x4ce   : > { %v5312_v9 = vpop.eup %5311  ;;  %v3022_v45 = vmul.f32 1.442695, %v2656_v46  ;;  %v3024_v13 = vmul.f32 1.442695, %v2657_v3  ;;  %10307 = vst [vmem:[#allocation77_spill] sm:$0xff] %v8519_v2  ;;  %v10310_v26 = vmax.f32 %v10308_v22, %v10309_v43  ;;  %v10313_v46 = vld [vmem:[#allocation56_spill] sm:$0xff] }
 0x4cf   : > { %3435 = vadd.xlane.f32.xlu1 %v10306_v25  ;;  %v5314_v5 = vpop.eup %5313  ;;  %v8524_v31 = vpop.xlane.xlu0 %3366  ;;  %v3878_v40 = vpack.c.bf16 %v5312_v9, %v5308_v21  ;;  %v10314_v3 = vld [vmem:[#allocation58_spill] sm:$0xff] }
 0x4d0   : > { %5319 = vpow2.f32 %v3022_v45  ;;  %v3879_v4 = vpack.c.bf16 %v5314_v5, %v5310_v15  ;;  %v8526_v49 = vadd.f32 %v5314_v5, %v5312_v9  ;;  %v10316_v45 = vpack.c.bf16 %v8006_v12, %v7958_v30  ;;  %v10319_v12 = vld [vmem:[#allocation59_spill] sm:$0xff] }
 0x4d1   : > { %2496 = vmax.xlane.f32.xlu0 %v10310_v26  ;;  %5321 = vpow2.f32 %v3024_v13  ;;  %v2332_v25 = vpop.xlane.xlu1 %2331 }
 0x4d2   : > { %4027 = vmatprep.subr.bf16.mxu1 %v3879_v4  ;;  %v2658_v10 = vsub.f32 %v10313_v46, %v2332_v25  ;;  %v2659_v26 = vsub.f32 %v10314_v3, %v2332_v25 }
 0x4d3   : > { %3597 = vadd.xlane.f32.xlu1 %v10311_v39  ;;  %v8535_v21 = vpop.xlane.xlu0 %3528  ;;  %4028 = vmatpush1.bf16.xpose.msra.mxu1 %v3878_v40  ;;  %v10318_v40 = vld [vmem:[#allocation62_spill] sm:$0xff] }
 0x4d4   : > { %4083 = vmatpush1.bf16.xpose.msra.mxu0 %v10312_v60  ;;  %10315 = vst [vmem:[#allocation76_spill] sm:$0xff] %v8535_v21  ;;  %v5316_v15 = vpop.eup %5315  ;;  %v3026_v9 = vmul.f32 1.442695, %v2658_v10  ;;  %v3028_v13 = vmul.f32 1.442695, %v2659_v26  ;;  %v10321_v26 = vpack.c.bf16 %v7998_v56, %v7947_v7  ;;  %v10344_v21 = vld [vmem:[#allocation154_spill] sm:$0xff] }
 0x4d5   : > { %3438 = vadd.xlane.f32.xlu0 %v8231_v62  ;;  %4084 = vmatprep.subr.bf16.mxu0 %v10316_v45  ;;  %v5318_v55 = vpop.eup %5317  ;;  %v8543_v5 = vpop.xlane.xlu1 %3369 }
 0x4d6   : > { %5323 = vpow2.f32 %v3026_v9  ;;  %v8546_v4 = vadd.f32 %v5318_v55, %v5316_v15 }
 0x4d7   : > { %2499 = vmax.xlane.f32.xlu1 %v10317_v51  ;;  %v2335_v62 = vpop.xlane.xlu0 %2334  ;;  %5325 = vpow2.f32 %v3028_v13 }
 0x4d8   : > { %v2660_v30 = vsub.f32 %v10318_v40, %v2335_v62  ;;  %v2661_v39 = vsub.f32 %v10319_v12, %v2335_v62  ;;  %v10325_v40 = vld [vmem:[#allocation31_spill] sm:$0xff]  ;;  %v10328_v12 = vld [vmem:[#allocation64_spill] sm:$0xff] }
 0x4d9   : > { %3600 = vadd.xlane.f32.xlu0 %v8267_v48  ;;  %v8551_v10 = vpop.xlane.xlu1 %3531  ;;  %v10322_v48 = vmax.f32 %v8162_v14, %v8174_v47 }
 0x4da   : > { %v5320_v25 = vpop.eup %5319  ;;  %v3030_v60 = vmul.f32 1.442695, %v2660_v30  ;;  %v3032_v46 = vmul.f32 1.442695, %v2661_v39  ;;  %10320 = vst [vmem:[#allocation164_spill] sm:$0xff] %v8551_v10  ;;  %v10326_v30 = vld [vmem:[#allocation150_spill] sm:$0xff] }
 0x4db   : > { %3441 = vadd.xlane.f32.xlu1 %v8280_v19  ;;  %v5322_v3 = vpop.eup %5321  ;;  %v8559_v45 = vpop.xlane.xlu0 %3372  ;;  %v3880_v9 = vpack.c.bf16 %v5320_v25, %v5316_v15  ;;  %v10323_v19 = vld [vmem:[#allocation137_spill] sm:$0xff]  ;;  %v10327_v7 = vmax.f32 %v10325_v40, %v10326_v30 }
 0x4dc   : > { %4085 = vmatpush1.bf16.xpose.msra.mxu0 %v10321_v26  ;;  %5327 = vpow2.f32 %v3030_v60  ;;  %v10324_v13 = vpack.c.bf16 %v8082_v29, %v10323_v19  ;;  %v3881_v51 = vpack.c.bf16 %v5322_v3, %v5318_v55  ;;  %v8564_v62 = vadd.f32 %v5322_v3, %v5320_v25  ;;  %v10329_v26 = vld [vmem:[#allocation66_spill] sm:$0xff]  ;;  %v10331_v3 = vld [vmem:[#allocation19_spill] sm:$0xff]  ;;  %v10332_v19 = vld [vmem:[#allocation133_spill] sm:$0xff] }
 0x4dd   : > { %2502 = vmax.xlane.f32.xlu0 %v10322_v48  ;;  %5329 = vpow2.f32 %v3032_v46  ;;  %v2338_v56 = vpop.xlane.xlu1 %2337  ;;  %v10343_v10 = vld [vmem:[#allocation109_spill] sm:$0xff] }
 0x4de   : > { %4086 = vmatprep.subr.bf16.mxu0 %v10324_v13  ;;  %4029 = vmatprep.subr.bf16.mxu1 %v3881_v51  ;;  %v2662_v39 = vsub.f32 %v10328_v12, %v2338_v56  ;;  %v2663_v48 = vsub.f32 %v10329_v26, %v2338_v56  ;;  %v10333_v13 = vpack.c.bf16 %v10331_v3, %v10332_v19  ;;  %v10334_v51 = vld [vmem:[#allocation152_spill] sm:$0xff] }
 0x4df   : > { %2505 = vmax.xlane.f32.xlu1 %v10327_v7  ;;  %4030 = vmatpush1.bf16.xpose.msra.mxu1 %v3880_v9  ;;  %v8572_v15 = vpop.xlane.xlu0 %3534  ;;  %v10335_v7 = vld [vmem:[#allocation153_spill] sm:$0xff]  ;;  %v10338_v12 = vld [vmem:[#allocation96_spill] sm:$0xff]  ;;  %v10345_v3 = vmax.f32 %v10343_v10, %v10344_v21 }
 0x4e0   : > { %10330 = vst [vmem:[#allocation165_spill] sm:$0xff] %v8572_v15  ;;  %v5324_v29 = vpop.eup %5323  ;;  %v3034_v55 = vmul.f32 1.442695, %v2662_v39  ;;  %v3036_v25 = vmul.f32 1.442695, %v2663_v48  ;;  %v10336_v56 = vmax.f32 %v10334_v51, %v10335_v7  ;;  %v10339_v39 = vld [vmem:[#allocation143_spill] sm:$0xff] }
 0x4e1   : > { %3444 = vadd.xlane.f32.xlu0 %v8303_v38  ;;  %v5326_v60 = vpop.eup %5325  ;;  %v8575_v46 = vpop.xlane.xlu1 %3375  ;;  %v10340_v26 = vpack.c.bf16 %v10338_v12, %v10339_v39  ;;  %v10342_v15 = vld [vmem:[#allocation67_spill] sm:$0xff]  ;;  %v10353_v21 = vld [vmem:[#allocation49_spill] sm:$0xff] }
 0x4e2   : > { %5331 = vpow2.f32 %v3034_v55  ;;  %v8583_v9 = vadd.f32 %v5326_v60, %v5324_v29 }
 0x4e3   : > { %3447 = vadd.xlane.f32.xlu1 %v8334_v57  ;;  %v2341_v38 = vpop.xlane.xlu0 %2340  ;;  %5333 = vpow2.f32 %v3036_v25  ;;  %v10341_v57 = vld [vmem:[#allocation70_spill] sm:$0xff] }
 0x4e4   : > { %4087 = vmatpush1.bf16.xpose.msra.mxu0 %v10333_v13  ;;  %10337 = vst [vmem:[#allocation132_spill] sm:$0xff] %v8583_v9  ;;  %v2664_v48 = vsub.f32 %v10341_v57, %v2341_v38  ;;  %v2665_v55 = vsub.f32 %v10342_v15, %v2341_v38  ;;  %v10347_v38 = vld [vmem:[#allocation84_spill] sm:$0xff]  ;;  %v10348_v57 = vld [vmem:[#allocation21_spill] sm:$0xff]  ;;  %v10352_v9 = vld [vmem:[#allocation55_spill] sm:$0xff] }
 0x4e5   : > { %2508 = vmax.xlane.f32.xlu0 %v10336_v56  ;;  %4088 = vmatprep.subr.bf16.mxu0 %v10340_v26  ;;  %v8593_v56 = vpop.xlane.xlu1 %3537 }
 0x4e6   : > { %v5328_v19 = vpop.eup %5327  ;;  %v3038_v13 = vmul.f32 1.442695, %v2664_v48  ;;  %v3040_v2 = vmul.f32 1.442695, %v2665_v55  ;;  %10346 = vst [vmem:[#allocation87_spill] sm:$0xff] %v8593_v56  ;;  %v10349_v48 = vpack.c.bf16 %v10347_v38, %v10348_v57  ;;  %v10350_v55 = vld [vmem:[#allocation72_spill] sm:$0xff] }
 0x4e7   : > { %2511 = vmax.xlane.f32.xlu1 %v10345_v3  ;;  %v5330_v7 = vpop.eup %5329  ;;  %v8596_v25 = vpop.xlane.xlu0 %3378  ;;  %v3882_v12 = vpack.c.bf16 %v5328_v19, %v5324_v29  ;;  %v10351_v56 = vld [vmem:[#allocation74_spill] sm:$0xff]  ;;  %v10354_v29 = vmax.f32 %v10352_v9, %v10353_v21  ;;  %v10359_v38 = vld [vmem:[#allocation63_spill] sm:$0xff]  ;;  %v10360_v57 = vld [vmem:[#allocation57_spill] sm:$0xff] }
 0x4e8   : > { %5335 = vpow2.f32 %v3038_v13  ;;  %v3883_v39 = vpack.c.bf16 %v5330_v7, %v5326_v60  ;;  %v8598_v26 = vadd.f32 %v5330_v7, %v5328_v19  ;;  %v10357_v7 = vld [vmem:[#allocation20_spill] sm:$0xff] }
 0x4e9   : > { %3450 = vadd.xlane.f32.xlu0 %v8364_v59  ;;  %5337 = vpow2.f32 %v3040_v2  ;;  %v2344_v15 = vpop.xlane.xlu1 %2343  ;;  %v10356_v2 = vld [vmem:[#allocation103_spill] sm:$0xff] }
 0x4ea   : > { %4031 = vmatprep.subr.bf16.mxu1 %v3883_v39  ;;  %v2666_v3 = vsub.f32 %v10350_v55, %v2344_v15  ;;  %v2667_v59 = vsub.f32 %v10351_v56, %v2344_v15 }
 0x4eb   : > { %3453 = vadd.xlane.f32.xlu1 %v8383_v28  ;;  %v8609_v60 = vpop.xlane.xlu0 %3540  ;;  %4032 = vmatpush1.bf16.xpose.msra.mxu1 %v3882_v12  ;;  %v10358_v28 = vpack.c.bf16 %v10356_v2, %v10357_v7  ;;  %v10363_v12 = vld [vmem:[#allocation78_spill] sm:$0xff]  ;;  %v10364_v7 = vld [vmem:[#allocation75_spill] sm:$0xff] }
 0x4ec   : > { %4089 = vmatpush1.bf16.xpose.msra.mxu0 %v10349_v48  ;;  %10355 = vst [vmem:[#allocation81_spill] sm:$0xff] %v8609_v60  ;;  %v5332_v19 = vpop.eup %5331  ;;  %v3042_v13 = vmul.f32 1.442695, %v2666_v3  ;;  %v3044_v39 = vmul.f32 1.442695, %v2667_v59  ;;  %v10361_v48 = vmax.f32 %v10359_v38, %v10360_v57  ;;  %v10366_v38 = vld [vmem:[#allocation102_spill] sm:$0xff] }
 0x4ed   : > { %2514 = vmax.xlane.f32.xlu0 %v10354_v29  ;;  %4090 = vmatprep.subr.bf16.mxu0 %v10358_v28  ;;  %v5334_v55 = vpop.eup %5333  ;;  %v8617_v56 = vpop.xlane.xlu1 %3381 }
 0x4ee   : > { %5339 = vpow2.f32 %v3042_v13  ;;  %v8620_v29 = vadd.f32 %v5334_v55, %v5332_v19  ;;  %v10367_v13 = vld [vmem:[#allocation148_spill] sm:$0xff] }
 0x4ef   : > { %2517 = vmax.xlane.f32.xlu1 %v10361_v48  ;;  %v2347_v15 = vpop.xlane.xlu0 %2346  ;;  %5341 = vpow2.f32 %v3044_v39  ;;  %v10368_v21 = vpack.c.bf16 %v10366_v38, %v10367_v13  ;;  %v10372_v38 = vld [vmem:[#allocation80_spill] sm:$0xff]  ;;  %v10373_v13 = vld [vmem:[#allocation82_spill] sm:$0xff] }
 0x4f0   : > { %10362 = vst [vmem:[#allocation136_spill] sm:$0xff] %v8620_v29  ;;  %v2668_v2 = vsub.f32 %v10363_v12, %v2347_v15  ;;  %v2669_v28 = vsub.f32 %v10364_v7, %v2347_v15 }
 0x4f1   : > { %3456 = vadd.xlane.f32.xlu0 %v8404_v24  ;;  %v8625_v48 = vpop.xlane.xlu1 %3543  ;;  %v10369_v24 = vmax.f32 %v8325_v50, %v8330_v23 }
 0x4f2   : > { %v5336_v3 = vpop.eup %5335  ;;  %v3046_v59 = vmul.f32 1.442695, %v2668_v2  ;;  %v3048_v60 = vmul.f32 1.442695, %v2669_v28  ;;  %10365 = vst [vmem:[#allocation166_spill] sm:$0xff] %v8625_v48  ;;  %v10370_v2 = vld [vmem:[#allocation117_spill] sm:$0xff] }
 0x4f3   : > { %3459 = vadd.xlane.f32.xlu1 %v8417_v1  ;;  %v5338_v57 = vpop.eup %5337  ;;  %v8633_v39 = vpop.xlane.xlu0 %3384  ;;  %v3884_v12 = vpack.c.bf16 %v5336_v3, %v5332_v19  ;;  %v10371_v7 = vmax.f32 %v8350_v61, %v10370_v2  ;;  %v10386_v2 = vld [vmem:[#allocation83_spill] sm:$0xff] }
 0x4f4   : > { %4091 = vmatpush1.bf16.xpose.msra.mxu0 %v10368_v21  ;;  %5343 = vpow2.f32 %v3046_v59  ;;  %v3885_v15 = vpack.c.bf16 %v5338_v57, %v5334_v55  ;;  %v8635_v1 = vadd.f32 %v5338_v57, %v5336_v3  ;;  %v10375_v3 = vld [vmem:[#allocation32_spill] sm:$0xff]  ;;  %v10376_v59 = vld [vmem:[#allocation30_spill] sm:$0xff] }
 0x4f5   : > { %2520 = vmax.xlane.f32.xlu0 %v10369_v24  ;;  %5345 = vpow2.f32 %v3048_v60  ;;  %v2350_v28 = vpop.xlane.xlu1 %2349 }
 0x4f6   : > { %4033 = vmatprep.subr.bf16.mxu1 %v3885_v15  ;;  %v2670_v21 = vsub.f32 %v10372_v38, %v2350_v28  ;;  %v2671_v48 = vsub.f32 %v10373_v13, %v2350_v28  ;;  %v10378_v38 = vld [vmem:[#allocation37_spill] sm:$0xff]  ;;  %v10379_v28 = vld [vmem:[#allocation35_spill] sm:$0xff] }
 0x4f7   : > { %2523 = vmax.xlane.f32.xlu1 %v10371_v7  ;;  %4034 = vmatpush1.bf16.xpose.msra.mxu1 %v3884_v12  ;;  %v8643_v24 = vpop.xlane.xlu0 %3546  ;;  %v10377_v7 = vpack.c.bf16 %v10375_v3, %v10376_v59  ;;  %v10380_v13 = vpack.c.bf16 %v10378_v38, %v10379_v28  ;;  %v10382_v12 = vld [vmem:[#allocation71_spill] sm:$0xff]  ;;  %v10387_v59 = vld [vmem:[#allocation124_spill] sm:$0xff] }
 0x4f8   : > { %10374 = vst [vmem:[#allocation167_spill] sm:$0xff] %v8643_v24  ;;  %v5340_v19 = vpop.eup %5339  ;;  %v3050_v55 = vmul.f32 1.442695, %v2670_v21  ;;  %v3052_v57 = vmul.f32 1.442695, %v2671_v48 }
 0x4f9   : > { %3462 = vadd.xlane.f32.xlu0 %v8442_v16  ;;  %v5342_v60 = vpop.eup %5341  ;;  %v8649_v15 = vpop.xlane.xlu1 %3387  ;;  %v10381_v16 = vld [vmem:[#allocation60_spill] sm:$0xff] }
 0x4fa   : > { %5347 = vpow2.f32 %v3050_v55  ;;  %v10383_v24 = vmax.f32 %v10381_v16, %v10382_v12  ;;  %v8657_v48 = vadd.f32 %v5342_v60, %v5340_v19 }
 0x4fb   : > { %3465 = vadd.xlane.f32.xlu1 %v8472_v33  ;;  %4093 = vmatmul.mubr.bf16.vlgmr.msra.gmra.mrb[176].mxu0 %v10377_v7  ;;  %v2353_v21 = vpop.xlane.xlu0 %2352  ;;  %5349 = vpow2.f32 %v3052_v57  ;;  %v10385_v33 = vld [vmem:[#allocation86_spill] sm:$0xff] }
 0x4fc   : > { %4102 = vmatprep.mubr.bf16.mxu0 %v10380_v13  ;;  %10384 = vst [vmem:[#allocation91_spill] sm:$0xff] %v8657_v48  ;;  %v2672_v29 = vsub.f32 %v10385_v33, %v2353_v21  ;;  %v2673_v3 = vsub.f32 %v10386_v2, %v2353_v21  ;;  %v10388_v7 = vld [vmem:[#allocation158_spill] sm:$0xff] }
 0x4fd   : > { %2526 = vmax.xlane.f32.xlu0 %v10383_v24  ;;  %v10389_v61 = vmax.f32 %v10387_v59, %v10388_v7  ;;  %v8664_v28 = vpop.xlane.xlu1 %3549  ;;  %v10392_v2 = vld [vmem:[#allocation34_spill] sm:$0xff]  ;;  %v10395_v7 = vld [vmem:[#allocation92_spill] sm:$0xff] }
 0x4fe   : > { %v5344_v55 = vpop.eup %5343  ;;  %v3054_v23 = vmul.f32 1.442695, %v2672_v29  ;;  %v3056_v38 = vmul.f32 1.442695, %v2673_v3  ;;  %10390 = vst [vmem:[#allocation141_spill] sm:$0xff] %v8664_v28  ;;  %v10394_v3 = vld [vmem:[#allocation88_spill] sm:$0xff] }
 0x4ff   : > { %2529 = vmax.xlane.f32.xlu1 %v10389_v61  ;;  %v5346_v13 = vpop.eup %5345  ;;  %v8667_v24 = vpop.xlane.xlu0 %3390  ;;  %v3886_v48 = vpack.c.bf16 %v5344_v55, %v5340_v19  ;;  %v10391_v61 = vld [vmem:[#allocation36_spill] sm:$0xff]  ;;  %v10396_v19 = vmax.f32 %v8395_v0, %v8402_v11 }
 0x500   : > { %5351 = vpow2.f32 %v3054_v23  ;;  %v3887_v57 = vpack.c.bf16 %v5346_v13, %v5342_v60  ;;  %v8669_v33 = vadd.f32 %v5346_v13, %v5344_v55  ;;  %v10393_v29 = vpack.c.bf16 %v10391_v61, %v10392_v2  ;;  %v10401_v2 = vld [vmem:[#allocation89_spill] sm:$0xff] }
 0x501   : > { %3468 = vadd.xlane.f32.xlu0 %v8494_v42  ;;  %5353 = vpow2.f32 %v3056_v38  ;;  %v10398_v60 = vmov 0   ;;  %v10399_v13 = vmax.f32 %v8424_v52, %v8427_v27 }
 0x502   : > { %4035 = vmatprep.subr.bf16.mxu1 %v3887_v57 }
 0x503   : > { %3471 = vadd.xlane.f32.xlu1 %v8511_v34  ;;  %4103 = vmatmul.mubr.bf16.gmra.mrb[180].mxu0 %v10393_v29  ;;  %v2452_v21 = vpop.xlane.xlu1 %2451  ;;  %v8680_v23 = vpop.xlane.xlu0 %3552 }
 0x504   : > { %v2738_v28 = vsub.f32 %v10394_v3, %v2452_v21  ;;  %v2739_v42 = vsub.f32 %v10395_v7, %v2452_v21  ;;  %4036 = vmatpush1.bf16.xpose.msra.mxu1 %v3886_v48  ;;  %10397 = vst [vmem:[#allocation168_spill] sm:$0xff] %v8680_v23  ;;  %4541 = vmatprep.mubr.bf16.mxu0 %v10398_v60  ;;  %v5348_v34 = vpop.eup %5347  ;;  %v10402_v21 = vld [vmem:[#allocation93_spill] sm:$0xff] }
 0x505   : > { %2532 = vmax.xlane.f32.xlu0 %v10396_v19  ;;  %v5350_v57 = vpop.eup %5349 }
 0x506   : > { %v3186_v55 = vmul.f32 1.442695, %v2738_v28  ;;  %v3188_v38 = vmul.f32 1.442695, %v2739_v42  ;;  %v8689_v7 = vadd.f32 %v5350_v57, %v5348_v34 }
 0x507   : > { %2535 = vmax.xlane.f32.xlu1 %v10399_v13  ;;  %v8686_v61 = vpop.xlane.xlu1 %3393 }
 0x508   : > { %5355 = vpow2.f32 %v3186_v55  ;;  %10400 = vst [vmem:[#allocation169_spill] sm:$0xff] %v8689_v7  ;;  %v10404_v55 = vmax.f32 %v8433_v54, %v8440_v18 }
 0x509   : > { %3474 = vadd.xlane.f32.xlu0 %v8526_v49  ;;  %5357 = vpow2.f32 %v3188_v38 }
 0x50a   : > { %v2455_v48 = vpop.xlane.xlu0 %2454  ;;  %v5352_v28 = vpop.eup %5351 }
 0x50b   : > { %v2740_v29 = vsub.f32 %v10401_v2, %v2455_v48  ;;  %v2741_v3 = vsub.f32 %v10402_v21, %v2455_v48  ;;  %3477 = vadd.xlane.f32.xlu1 %v8546_v4  ;;  %v8694_v42 = vpop.xlane.xlu1 %3555  ;;  %v5354_v19 = vpop.eup %5353  ;;  %v3888_v49 = vpack.c.bf16 %v5352_v28, %v5348_v34  ;;  %v10405_v48 = vmax.f32 %v8458_v58, %v8463_v63  ;;  %v10406_v2 = vld [vmem:[#allocation98_spill] sm:$0xff]  ;;  %v10407_v21 = vld [vmem:[#allocation100_spill] sm:$0xff] }
 0x50c   : > { %10403 = vst [vmem:[#allocation144_spill] sm:$0xff] %v8694_v42  ;;  %v3889_v38 = vpack.c.bf16 %v5354_v19, %v5350_v57  ;;  %v3503_v7 = vadd.f32 %v5354_v19, %v5352_v28 }
 0x50d   : > { %v3190_v60 = vmul.f32 1.442695, %v2740_v29  ;;  %v3192_v13 = vmul.f32 1.442695, %v2741_v3  ;;  %2538 = vmax.xlane.f32.xlu0 %v10404_v55 }
 0x50e   : > { %v8699_v23 = vpop.xlane.xlu0 %3396  ;;  %4037 = vmatprep.subr.bf16.mxu1 %v3889_v38 }
 0x50f   : > { %5359 = vpow2.f32 %v3190_v60  ;;  %2541 = vmax.xlane.f32.xlu1 %v10405_v48  ;;  %v2458_v4 = vpop.xlane.xlu1 %2457  ;;  %4038 = vmatpush1.bf16.xpose.msra.mxu1 %v3888_v49  ;;  %v10412_v49 = vld [vmem:[#allocation101_spill] sm:$0xff] }
 0x510   : > { %5361 = vpow2.f32 %v3192_v13  ;;  %v2742_v29 = vsub.f32 %v10406_v2, %v2458_v4  ;;  %v2743_v3 = vsub.f32 %v10407_v21, %v2458_v4  ;;  %v10409_v13 = vmax.f32 %v8469_v37, %v8474_v53  ;;  %v10411_v4 = vld [vmem:[#allocation97_spill] sm:$0xff]  ;;  %v10418_v53 = vld [vmem:[#allocation27_spill] sm:$0xff] }
 0x511   : > { %3480 = vadd.xlane.f32.xlu0 %v8564_v62  ;;  %v10413_v21 = vld [vmem:[#allocation25_spill] sm:$0xff] }
 0x512   : > { %v8707_v34 = vpop.xlane.xlu0 %3558  ;;  %v5356_v55 = vpop.eup %5355  ;;  %v3194_v57 = vmul.f32 1.442695, %v2742_v29  ;;  %v3196_v28 = vmul.f32 1.442695, %v2743_v3 }
 0x513   : > { %10408 = vst [vmem:[#allocation90_spill] sm:$0xff] %v8707_v34  ;;  %v5358_v19 = vpop.eup %5357  ;;  %v8709_v60 = vpop.xlane.xlu1 %3399  ;;  %v10414_v34 = vld [vmem:[#allocation24_spill] sm:$0xff] }
 0x514   : > { %5363 = vpow2.f32 %v3194_v57  ;;  %v8714_v38 = vadd.f32 %v5358_v19, %v5356_v55  ;;  %v10415_v29 = vpack.c.bf16 %v10413_v21, %v10414_v34  ;;  %v10421_v21 = vld [vmem:[#allocation104_spill] sm:$0xff] }
 0x515   : > { %2544 = vmax.xlane.f32.xlu0 %v10409_v13  ;;  %5365 = vpow2.f32 %v3196_v28  ;;  %v10417_v13 = vld [vmem:[#allocation29_spill] sm:$0xff] }
 0x516   : > { %10410 = vst [vmem:[#allocation125_spill] sm:$0xff] %v8714_v38  ;;  %v2461_v48 = vpop.xlane.xlu0 %2460  ;;  %4040 = vmatmul.mubr.bf16.vlgmr.msra.gmra.mrb[184].mxu1 %v10415_v29  ;;  %v10419_v38 = vpack.c.bf16 %v10417_v13, %v10418_v53 }
 0x517   : > { %v2744_v62 = vsub.f32 %v10411_v4, %v2461_v48  ;;  %v2745_v2 = vsub.f32 %v10412_v49, %v2461_v48  ;;  %v8721_v3 = vpop.xlane.xlu1 %3561 }
 0x518   : > { %10416 = vst [vmem:[#allocation95_spill] sm:$0xff] %v8721_v3  ;;  %4049 = vmatprep.mubr.bf16.mxu1 %v10419_v38 }
 0x519   : > { %v5360_v42 = vpop.eup %5359  ;;  %v3198_v57 = vmul.f32 1.442695, %v2744_v62  ;;  %v3200_v63 = vmul.f32 1.442695, %v2745_v2  ;;  %3486 = vadd.xlane.f32.xlu0 %v8598_v26  ;;  %v10422_v2 = vld [vmem:[#allocation106_spill] sm:$0xff] }
 0x51a   : > { %v5362_v28 = vpop.eup %5361  ;;  %v8727_v37 = vpop.xlane.xlu0 %3402  ;;  %v3922_v4 = vpack.c.bf16 %v5360_v42, %v5356_v55 }
 0x51b   : > { %5367 = vpow2.f32 %v3198_v57  ;;  %v3923_v48 = vpack.c.bf16 %v5362_v28, %v5358_v19  ;;  %v8729_v49 = vadd.f32 %v5362_v28, %v5360_v42  ;;  %v2464_v34 = vpop.xlane.xlu1 %2463  ;;  %v10424_v57 = vld [vmem:[#allocation28_spill] sm:$0xff]  ;;  %v10425_v19 = vld [vmem:[#allocation26_spill] sm:$0xff]  ;;  %v10427_v28 = vld [vmem:[#allocation41_spill] sm:$0xff] }
 0x51c   : > { %5369 = vpow2.f32 %v3200_v63  ;;  %v2746_v62 = vsub.f32 %v10421_v21, %v2464_v34  ;;  %v2747_v29 = vsub.f32 %v10422_v2, %v2464_v34  ;;  %v10426_v42 = vpack.c.bf16 %v10424_v57, %v10425_v19  ;;  %v10431_v21 = vld [vmem:[#allocation108_spill] sm:$0xff]  ;;  %v10432_v2 = vld [vmem:[#allocation105_spill] sm:$0xff] }
 0x51d   : > { %10420 = vst [vmem:[#allocation94_spill] sm:$0xff] %v8729_v49  ;;  %4113 = vmatprep.subr.bf16.mxu1 %v3923_v48  ;;  %3492 = vadd.xlane.f32.xlu0 %v8635_v1  ;;  %v10428_v48 = vld [vmem:[#allocation39_spill] sm:$0xff] }
 0x51e   : > { %4114 = vmatpush1.bf16.xpose.msra.mxu1 %v3922_v4  ;;  %v8734_v53 = vpop.xlane.xlu0 %3564  ;;  %v5364_v26 = vpop.eup %5363  ;;  %v3202_v38 = vmul.f32 1.442695, %v2746_v62  ;;  %v3204_v13 = vmul.f32 1.442695, %v2747_v29  ;;  %v10429_v34 = vpack.c.bf16 %v10427_v28, %v10428_v48 }
 0x51f   : > { %10423 = vst [vmem:[#allocation23_spill] sm:$0xff] %v8734_v53  ;;  %v5366_v55 = vpop.eup %5365  ;;  %4050 = vmatmul.mubr.bf16.gmra.mrb[188].mxu1 %v10426_v42  ;;  %v8739_v63 = vpop.xlane.xlu1 %3405 }
 0x520   : > { %5371 = vpow2.f32 %v3202_v38  ;;  %4145 = vmatprep.mubr.bf16.mxu1 %v10429_v34  ;;  %v8745_v1 = vadd.f32 %v5366_v55, %v5364_v26  ;;  %v10434_v34 = vld [vmem:[#allocation107_spill] sm:$0xff] }
 0x521   : > { %3498 = vadd.xlane.f32.xlu0 %v8669_v33  ;;  %5373 = vpow2.f32 %v3204_v13 }
 0x522   : > { %10430 = vst [vmem:[#allocation170_spill] sm:$0xff] %v8745_v1  ;;  %v2467_v4 = vpop.xlane.xlu0 %2466  ;;  %v10435_v1 = vld [vmem:[#allocation111_spill] sm:$0xff] }
 0x523   : > { %v2748_v62 = vsub.f32 %v10431_v21, %v2467_v4  ;;  %v2749_v29 = vsub.f32 %v10432_v2, %v2467_v4  ;;  %v8749_v49 = vpop.xlane.xlu1 %3567 }
 0x524   : > { %10433 = vst [vmem:[#allocation171_spill] sm:$0xff] %v8749_v49 }
 0x525   : > { %v5368_v57 = vpop.eup %5367  ;;  %v3206_v19 = vmul.f32 1.442695, %v2748_v62  ;;  %v3208_v42 = vmul.f32 1.442695, %v2749_v29  ;;  %3504 = vadd.xlane.f32.xlu0 %v3503_v7 }
 0x526   : > { %v5370_v38 = vpop.eup %5369  ;;  %v8751_v33 = vpop.xlane.xlu0 %3408  ;;  %v3924_v53 = vpack.c.bf16 %v5368_v57, %v5364_v26 }
 0x527   : > { %5375 = vpow2.f32 %v3206_v19  ;;  %v3925_v28 = vpack.c.bf16 %v5370_v38, %v5366_v55  ;;  %v3611_v48 = vadd.f32 %v5370_v38, %v5368_v57  ;;  %v2470_v13 = vpop.xlane.xlu1 %2469  ;;  %v10438_v57 = vld [vmem:[#allocation113_spill] sm:$0xff] }
 0x528   : > { %5377 = vpow2.f32 %v3208_v42  ;;  %v2750_v21 = vsub.f32 %v10434_v34, %v2470_v13  ;;  %v2751_v4 = vsub.f32 %v10435_v1, %v2470_v13  ;;  %v10439_v42 = vld [vmem:[#allocation116_spill] sm:$0xff] }
 0x529   : > { %4115 = vmatprep.subr.bf16.mxu1 %v3925_v28  ;;  %3612 = vadd.xlane.f32.xlu0 %v3611_v48 }
 0x52a   : > { %4116 = vmatpush1.bf16.xpose.msra.mxu1 %v3924_v53  ;;  %v8755_v2 = vpop.xlane.xlu0 %3570  ;;  %v5372_v62 = vpop.eup %5371  ;;  %v3210_v7 = vmul.f32 1.442695, %v2750_v21  ;;  %v3212_v29 = vmul.f32 1.442695, %v2751_v4 }
 0x52b   : > { %v5374_v49 = vpop.eup %5373  ;;  %v8757_v3 = vpop.xlane.xlu1 %3411 }
 0x52c   : > { %10436 = vst [vmem:[#allocation46_spill] sm:$0xff] %v8757_v3  ;;  %5379 = vpow2.f32 %v3210_v7  ;;  %v8759_v26 = vadd.f32 %v5374_v49, %v5372_v62 }
 0x52d   : > { %5381 = vpow2.f32 %v3212_v29  ;;  %v10442_v29 = vld [vmem:[#allocation119_spill] sm:$0xff] }
 0x52e   : > { %10437 = vst [vmem:[#allocation47_spill] sm:$0xff] %v8759_v26  ;;  %v2473_v55 = vpop.xlane.xlu0 %2472  ;;  %v10443_v26 = vld [vmem:[#allocation123_spill] sm:$0xff] }
 0x52f   : > { %v2752_v19 = vsub.f32 %v10438_v57, %v2473_v55  ;;  %v2753_v38 = vsub.f32 %v10439_v42, %v2473_v55  ;;  %v8763_v1 = vpop.xlane.xlu1 %3573 }
 0x530   : > { %10440 = vst [vmem:[#allocation48_spill] sm:$0xff] %v8763_v1 }
 0x531   : > { %v5376_v53 = vpop.eup %5375  ;;  %v3214_v28 = vmul.f32 1.442695, %v2752_v19  ;;  %v3216_v48 = vmul.f32 1.442695, %v2753_v38  ;;  %v10445_v38 = vld [vmem:[#allocation139_spill] sm:$0xff] }
 0x532   : > { %v5378_v13 = vpop.eup %5377  ;;  %v8765_v34 = vpop.xlane.xlu0 %3414  ;;  %v3926_v21 = vpack.c.bf16 %v5376_v53, %v5372_v62 }
 0x533   : > { %10441 = vst [vmem:[#allocation50_spill] sm:$0xff] %v8765_v34  ;;  %5383 = vpow2.f32 %v3214_v28  ;;  %v3927_v4 = vpack.c.bf16 %v5378_v13, %v5374_v49  ;;  %v3617_v7 = vadd.f32 %v5378_v13, %v5376_v53  ;;  %v10449_v13 = vld [vmem:[#allocation126_spill] sm:$0xff] }
 0x534   : > { %5385 = vpow2.f32 %v3216_v48  ;;  %v2476_v3 = vpop.xlane.xlu1 %2475  ;;  %v10448_v48 = vld [vmem:[#allocation145_spill] sm:$0xff] }
 0x535   : > { %4117 = vmatprep.subr.bf16.mxu1 %v3927_v4  ;;  %3618 = vadd.xlane.f32.xlu0 %v3617_v7  ;;  %v2754_v57 = vsub.f32 %v10442_v29, %v2476_v3  ;;  %v2755_v55 = vsub.f32 %v10443_v26, %v2476_v3  ;;  %5387 = vrcp.f32 %v10445_v38  ;;  %v10450_v26 = vld [vmem:[#allocation130_spill] sm:$0xff]  ;;  %v10452_v38 = vld [vmem:[#allocation147_spill] sm:$0xff] }
 0x536   : > { %4118 = vmatpush1.bf16.xpose.msra.mxu1 %v3926_v21  ;;  %v8769_v42 = vpop.xlane.xlu0 %3576  ;;  %v5380_v19 = vpop.eup %5379 }
 0x537   : > { %10444 = vst [vmem:[#allocation138_spill] sm:$0xff] %v8769_v42  ;;  %v3218_v1 = vmul.f32 1.442695, %v2754_v57  ;;  %v3220_v34 = vmul.f32 1.442695, %v2755_v55  ;;  %v5382_v62 = vpop.eup %5381 }
 0x538   : > { %v8772_v28 = vpop.xlane.xlu1 %3417  ;;  %v8774_v49 = vadd.f32 %v5382_v62, %v5380_v19 }
 0x539   : > { %10446 = vst [vmem:[#allocation122_spill] sm:$0xff] %v8772_v28  ;;  %5389 = vpow2.f32 %v3218_v1 }
 0x53a   : > { %10447 = vst [vmem:[#allocation118_spill] sm:$0xff] %v8774_v49  ;;  %5391 = vpow2.f32 %v3220_v34  ;;  %v2479_v53 = vpop.xlane.xlu0 %2478 }
 0x53b   : > { %5393 = vrcp.f32 %v10448_v48  ;;  %v2756_v3 = vsub.f32 %v10449_v13, %v2479_v53  ;;  %v2757_v21 = vsub.f32 %v10450_v26, %v2479_v53 }
 0x53c   : > { %v8779_v4 = vpop.xlane.xlu1 %3579  ;;  %5395 = vrcp.f32 %v10452_v38  ;;  %v10455_v38 = vld [vmem:[#allocation151_spill] sm:$0xff] }
 0x53d   : > { %10451 = vst [vmem:[#allocation85_spill] sm:$0xff] %v8779_v4  ;;  %v5384_v7 = vpop.eup %5383  ;;  %v3222_v29 = vmul.f32 1.442695, %v2756_v3  ;;  %v3224_v57 = vmul.f32 1.442695, %v2757_v21 }
 0x53e   : > { %v5386_v55 = vpop.eup %5385  ;;  %v8782_v28 = vpop.xlane.xlu0 %3420  ;;  %v3928_v1 = vpack.c.bf16 %v5384_v7, %v5380_v19 }
 0x53f   : > { %10453 = vst [vmem:[#allocation52_spill] sm:$0xff] %v8782_v28  ;;  %5397 = vpow2.f32 %v3222_v29  ;;  %v3929_v34 = vpack.c.bf16 %v5386_v55, %v5382_v62  ;;  %v8784_v49 = vadd.f32 %v5386_v55, %v5384_v7  ;;  %v5388_v13 = vpop.eup %5387  ;;  %v10460_v28 = vld [vmem:[#allocation110_spill] sm:$0xff] }
 0x540   : > { %5399 = vpow2.f32 %v3224_v57  ;;  %v2482_v48 = vpop.xlane.xlu1 %2481 }
 0x541   : > { %4119 = vmatprep.subr.bf16.mxu1 %v3929_v34  ;;  %v2758_v53 = vsub.f32 %v10258_v6, %v2482_v48  ;;  %v2759_v26 = vsub.f32 %v10259_v8, %v2482_v48  ;;  %5401 = vrcp.f32 %v10455_v38  ;;  %v10458_v8 = vld [vmem:[#allocation149_spill] sm:$0xff] }
 0x542   : > { %4120 = vmatpush1.bf16.xpose.msra.mxu1 %v3928_v1  ;;  %v8788_v3 = vpop.xlane.xlu0 %3582  ;;  %4166 = vxpose.xlu1.b32.start [1/16] (narrow) %v5388_v13, 8 }
 0x543   : > { %10454 = vst [vmem:[#allocation54_spill] sm:$0xff] %v8788_v3  ;;  %v5390_v21 = vpop.eup %5389  ;;  %v3226_v19 = vmul.f32 1.442695, %v2758_v53  ;;  %v3228_v29 = vmul.f32 1.442695, %v2759_v26 }
 0x544   : > { %v5392_v62 = vpop.eup %5391  ;;  %v8791_v7 = vpop.xlane.xlu1 %3423 }
 0x545   : > { %10456 = vst [vmem:[#allocation120_spill] sm:$0xff] %v8791_v7  ;;  %v5394_v57 = vpop.eup %5393  ;;  %5403 = vpow2.f32 %v3226_v19  ;;  %v8793_v55 = vadd.f32 %v5392_v62, %v5390_v21 }
 0x546   : > { %5405 = vpow2.f32 %v3228_v29  ;;  %v2485_v6 = vpop.xlane.xlu0 %2484  ;;  %4167 = vxpose.xlu1.b32.cont [2/16] (narrow) %v5394_v57, 8  ;;  %v5396_v48 = vpop.eup %5395 }
 0x547   : > { %10457 = vst [vmem:[#allocation114_spill] sm:$0xff] %v8793_v55  ;;  %5407 = vrcp.f32 %v10458_v8  ;;  %v2760_v1 = vsub.f32 %v7938_v32, %v2485_v6  ;;  %v2761_v34 = vsub.f32 %v7956_v36, %v2485_v6  ;;  %v10462_v55 = vld [vmem:[#allocation134_spill] sm:$0xff] }
 0x548   : > { %v8798_v13 = vpop.xlane.xlu1 %3585  ;;  %5409 = vrcp.f32 %v10460_v28 }
 0x549   : > { %10459 = vst [vmem:[#allocation22_spill] sm:$0xff] %v8798_v13  ;;  %v5398_v53 = vpop.eup %5397  ;;  %v3230_v26 = vmul.f32 1.442695, %v2760_v1  ;;  %v3232_v38 = vmul.f32 1.442695, %v2761_v34  ;;  %v10470_v13 = vld [vmem:[#allocation127_spill] sm:$0xff] }
 0x54a   : > { %v5400_v7 = vpop.eup %5399  ;;  %v8801_v19 = vpop.xlane.xlu0 %3426  ;;  %4168 = vxpose.xlu1.b32.cont [3/16] (narrow) %v5396_v48, 8  ;;  %v3930_v29 = vpack.c.bf16 %v5398_v53, %v5390_v21  ;;  %v10464_v21 = vld [vmem:[#allocation155_spill] sm:$0xff] }
 0x54b   : > { %10461 = vst [vmem:[#allocation51_spill] sm:$0xff] %v8801_v19  ;;  %5411 = vpow2.f32 %v3230_v26  ;;  %v3931_v57 = vpack.c.bf16 %v5400_v7, %v5392_v62  ;;  %v8803_v8 = vadd.f32 %v5400_v7, %v5398_v53  ;;  %v5402_v36 = vpop.eup %5401 }
 0x54c   : > { %5413 = vpow2.f32 %v3232_v38  ;;  %v2488_v32 = vpop.xlane.xlu1 %2487  ;;  %v8809_v28 = vpop.f32.mrb[168].mxu0 }
 0x54d   : > { %4121 = vmatprep.subr.bf16.mxu1 %v3931_v57  ;;  %v2762_v6 = vsub.f32 %v7988_v20, %v2488_v32  ;;  %v2763_v1 = vsub.f32 %v10462_v55, %v2488_v32  ;;  %5415 = vrcp.f32 %v10464_v21  ;;  %v8812_v53 = vpop.f32.mrb[169].mxu0 }
 0x54e   : > { %4122 = vmatpush1.bf16.xpose.msra.mxu1 %v3930_v29  ;;  %v8807_v34 = vpop.xlane.xlu0 %3588  ;;  %4169 = vxpose.xlu1.b32.cont [4/16] (narrow) %v5402_v36, 8  ;;  %v8816_v57 = vpop.f32.mrb[170].mxu0  ;;  %v10467_v36 = vld [vmem:[#allocation115_spill] sm:$0xff] }
 0x54f   : > { %10463 = vst [vmem:[#allocation53_spill] sm:$0xff] %v8807_v34  ;;  %v5404_v48 = vpop.eup %5403  ;;  %v3234_v62 = vmul.f32 1.442695, %v2762_v6  ;;  %v3236_v7 = vmul.f32 1.442695, %v2763_v1  ;;  %v8818_v55 = vpop.f32.mrb[171].mxu0 }
 0x550   : > { %v5406_v26 = vpop.eup %5405  ;;  %v8814_v38 = vpop.xlane.xlu1 %3429  ;;  %v10468_v1 = vld [vmem:[#allocation135_spill] sm:$0xff] }
 0x551   : > { %10465 = vst [vmem:[#allocation99_spill] sm:$0xff] %v8814_v38  ;;  %v5408_v20 = vpop.eup %5407  ;;  %5417 = vpow2.f32 %v3234_v62  ;;  %v8820_v29 = vadd.f32 %v5406_v26, %v5404_v48 }
 0x552   : > { %5419 = vpow2.f32 %v3236_v7  ;;  %v2491_v32 = vpop.xlane.xlu0 %2490  ;;  %4170 = vxpose.xlu1.b32.cont [5/16] (narrow) %v5408_v20, 8  ;;  %v5410_v19 = vpop.eup %5409 }
 0x553   : > { %10466 = vst [vmem:[#allocation18_spill] sm:$0xff] %v8820_v29  ;;  %5421 = vrcp.f32 %v10467_v36  ;;  %v2764_v6 = vsub.f32 %v10286_v17, %v2491_v32  ;;  %v2765_v21 = vsub.f32 %v10468_v1, %v2491_v32 }
 0x554   : > { %v8825_v34 = vpop.xlane.xlu1 %3591  ;;  %5423 = vrcp.f32 %v10470_v13  ;;  %v8831_v20 = vpop.f32.mrb[172].mxu0 }
 0x555   : > { %10469 = vst [vmem:[#allocation142_spill] sm:$0xff] %v8825_v34  ;;  %v5412_v38 = vpop.eup %5411  ;;  %v3238_v62 = vmul.f32 1.442695, %v2764_v6  ;;  %v3240_v3 = vmul.f32 1.442695, %v2765_v21  ;;  %5425 = vrcp.f32 %v8505_v41  ;;  %v8833_v17 = vpop.f32.mrb[173].mxu0 }
 0x556   : > { %v5414_v4 = vpop.eup %5413  ;;  %v8829_v7 = vpop.xlane.xlu0 %3432  ;;  %4171 = vxpose.xlu1.b32.cont [6/16] (narrow) %v5410_v19, 8  ;;  %v3932_v36 = vpack.c.bf16 %v5412_v38, %v5404_v48  ;;  %v10472_v21 = vld [vmem:[#allocation140_spill] sm:$0xff]  ;;  %v10473_v34 = vld [vmem:[#allocation146_spill] sm:$0xff] }
 0x557   : > { %10471 = vst [vmem:[#allocation33_spill] sm:$0xff] %v8829_v7  ;;  %5427 = vpow2.f32 %v3238_v62  ;;  %v3933_v32 = vpack.c.bf16 %v5414_v4, %v5406_v26  ;;  %v8835_v1 = vadd.f32 %v5414_v4, %v5412_v38  ;;  %v8837_v13 = vpop.f32.mrb[174].mxu0  ;;  %v5416_v6 = vpop.eup %5415  ;;  %v10475_v38 = vld [vmem:[#allocation156_spill] sm:$0xff] }
 0x558   : > { %5429 = vpow2.f32 %v3240_v3  ;;  %v2494_v29 = vpop.xlane.xlu1 %2493  ;;  %v8841_v42 = vpop.f32.mrb[175].mxu0 }
 0x559   : > { %4123 = vmatprep.subr.bf16.mxu1 %v3933_v32  ;;  %v2766_v41 = vsub.f32 %v10472_v21, %v2494_v29  ;;  %v2767_v7 = vsub.f32 %v10473_v34, %v2494_v29  ;;  %5431 = vrcp.f32 %v8524_v31 }
 0x55a   : > { %4124 = vmatpush1.bf16.xpose.msra.mxu1 %v3932_v36  ;;  %v8843_v19 = vpop.xlane.xlu0 %3594  ;;  %4172 = vxpose.xlu1.b32.cont [7/16] (narrow) %v5416_v6, 8  ;;  %5433 = vrcp.f32 %v10475_v38  ;;  %v10477_v6 = vld [vmem:[#allocation61_spill] sm:$0xff] }
 0x55b   : > { %10474 = vst [vmem:[#allocation56_spill] sm:$0xff] %v8843_v19  ;;  %v5418_v48 = vpop.eup %5417  ;;  %v3242_v4 = vmul.f32 1.442695, %v2766_v41  ;;  %v3244_v3 = vmul.f32 1.442695, %v2767_v7 }
 0x55c   : > { %v5420_v26 = vpop.eup %5419  ;;  %v8847_v62 = vpop.xlane.xlu1 %3435 }
 0x55d   : > { %10476 = vst [vmem:[#allocation58_spill] sm:$0xff] %v8847_v62  ;;  %v5422_v32 = vpop.eup %5421  ;;  %5435 = vpow2.f32 %v3242_v4  ;;  %v8849_v21 = vadd.f32 %v5420_v26, %v5418_v48  ;;  %v10479_v62 = vld [vmem:[#allocation121_spill] sm:$0xff] }
 0x55e   : > { %5437 = vpow2.f32 %v3244_v3  ;;  %v2497_v34 = vpop.xlane.xlu0 %2496  ;;  %4173 = vxpose.xlu1.b32.cont [8/16] (narrow) %v5422_v32, 8  ;;  %v5424_v29 = vpop.eup %5423 }
 0x55f   : > { %5439 = vrcp.f32 %v8543_v5  ;;  %v2768_v36 = vsub.f32 %v10308_v22, %v2497_v34  ;;  %v2769_v31 = vsub.f32 %v10309_v43, %v2497_v34  ;;  %v5426_v7 = vpop.eup %5425 }
 0x560   : > { %5441 = vrcp.f32 %v10477_v6  ;;  %v8855_v41 = vpop.xlane.xlu1 %3597 }
 0x561   : > { %10478 = vst [vmem:[#allocation62_spill] sm:$0xff] %v8855_v41  ;;  %v5428_v38 = vpop.eup %5427  ;;  %5443 = vrcp.f32 %v10479_v62  ;;  %v3246_v4 = vmul.f32 1.442695, %v2768_v36  ;;  %v3248_v19 = vmul.f32 1.442695, %v2769_v31  ;;  %v10480_v41 = vld [vmem:[#allocation69_spill] sm:$0xff] }
 0x562   : > { %v5430_v3 = vpop.eup %5429  ;;  %5445 = vrcp.f32 %v8559_v45  ;;  %4198 = vxpose.xlu0.b32.start [1/16] (narrow) %v5426_v7, 8  ;;  %v8859_v32 = vpop.xlane.xlu0 %3438  ;;  %4174 = vxpose.xlu1.b32.cont [9/16] (narrow) %v5424_v29, 8  ;;  %v3934_v22 = vpack.c.bf16 %v5428_v38, %v5418_v48  ;;  %v10481_v7 = vld [vmem:[#allocation160_spill] sm:$0xff] }
 0x563   : > { %5447 = vpow2.f32 %v3246_v4  ;;  %v3935_v43 = vpack.c.bf16 %v5430_v3, %v5420_v26  ;;  %v8861_v5 = vadd.f32 %v5430_v3, %v5428_v38  ;;  %v5432_v6 = vpop.eup %5431 }
 0x564   : > { %5449 = vpow2.f32 %v3248_v19  ;;  %v2500_v34 = vpop.xlane.xlu1 %2499  ;;  %v5434_v31 = vpop.eup %5433 }
 0x565   : > { %4125 = vmatprep.subr.bf16.mxu1 %v3935_v43  ;;  %v2770_v62 = vsub.f32 %v8134_v35, %v2500_v34  ;;  %v2771_v36 = vsub.f32 %v8147_v44, %v2500_v34  ;;  %5451 = vrcp.f32 %v10480_v41  ;;  %v10482_v34 = vld [vmem:[#allocation79_spill] sm:$0xff] }
 0x566   : > { %4199 = vxpose.xlu0.b32.cont [2/16] (narrow) %v5432_v6, 8  ;;  %4126 = vmatpush1.bf16.xpose.msra.mxu1 %v3934_v22  ;;  %v8866_v45 = vpop.xlane.xlu0 %3600  ;;  %5453 = vrcp.f32 %v8575_v46 }
 0x567   : > { %v5436_v48 = vpop.eup %5435  ;;  %v3250_v26 = vmul.f32 1.442695, %v2770_v62  ;;  %v3252_v29 = vmul.f32 1.442695, %v2771_v36  ;;  %4175 = vxpose.xlu1.b32.cont [10/16] (narrow) %v5434_v31, 8  ;;  %5455 = vrcp.f32 %v10481_v7 }
 0x568   : > { %v5438_v19 = vpop.eup %5437  ;;  %v8870_v38 = vpop.xlane.xlu1 %3441 }
 0x569   : > { %v5440_v35 = vpop.eup %5439  ;;  %5457 = vpow2.f32 %v3250_v26  ;;  %v8872_v44 = vadd.f32 %v5438_v19, %v5436_v48 }
 0x56a   : > { %v5442_v41 = vpop.eup %5441  ;;  %5459 = vpow2.f32 %v3252_v29  ;;  %4200 = vxpose.xlu0.b32.cont [3/16] (narrow) %v5440_v35, 8  ;;  %v2503_v4 = vpop.xlane.xlu0 %2502 }
 0x56b   : > { %v5444_v3 = vpop.eup %5443  ;;  %5461 = vrcp.f32 %v8596_v25  ;;  %v2772_v46 = vsub.f32 %v8162_v14, %v2503_v4  ;;  %v2773_v22 = vsub.f32 %v8174_v47, %v2503_v4  ;;  %4176 = vxpose.xlu1.b32.cont [11/16] (narrow) %v5442_v41, 8 }
 0x56c   : > { %v5446_v43 = vpop.eup %5445  ;;  %5463 = vrcp.f32 %v10482_v34  ;;  %v2506_v6 = vpop.xlane.xlu1 %2505 }
 0x56d   : > { %v5448_v62 = vpop.eup %5447  ;;  %v3254_v36 = vmul.f32 1.442695, %v2772_v46  ;;  %v3256_v31 = vmul.f32 1.442695, %v2773_v22  ;;  %v2774_v26 = vsub.f32 %v10325_v40, %v2506_v6  ;;  %v2775_v29 = vsub.f32 %v10326_v30, %v2506_v6  ;;  %v10484_v6 = vld [vmem:[#allocation163_spill] sm:$0xff] }
 0x56e   : > { %v5450_v7 = vpop.eup %5449  ;;  %5465 = vrcp.f32 %v8617_v56  ;;  %4201 = vxpose.xlu0.b32.cont [4/16] (narrow) %v5446_v43, 8  ;;  %v8881_v25 = vpop.xlane.xlu0 %3444  ;;  %v3936_v14 = vpack.c.bf16 %v5448_v62, %v5436_v48 }
 0x56f   : > { %5467 = vpow2.f32 %v3254_v36  ;;  %v3258_v47 = vmul.f32 1.442695, %v2774_v26  ;;  %v3260_v35 = vmul.f32 1.442695, %v2775_v29  ;;  %4177 = vxpose.xlu1.b32.cont [12/16] (narrow) %v5444_v3, 8  ;;  %v3937_v41 = vpack.c.bf16 %v5450_v7, %v5438_v19  ;;  %v5452_v4 = vpop.eup %5451  ;;  %v10483_v19 = vld [vmem:[#allocation153_spill] sm:$0xff] }
 0x570   : > { %5469 = vpow2.f32 %v3256_v31  ;;  %v8883_v46 = vpop.xlane.xlu1 %3447  ;;  %v8885_v22 = vadd.f32 %v5450_v7, %v5448_v62  ;;  %v5454_v40 = vpop.eup %5453  ;;  %v10485_v7 = vld [vmem:[#allocation154_spill] sm:$0xff] }
 0x571   : > { %5471 = vpow2.f32 %v3258_v47  ;;  %4127 = vmatprep.subr.bf16.mxu1 %v3937_v41  ;;  %v5456_v30 = vpop.eup %5455 }
 0x572   : > { %5473 = vpow2.f32 %v3260_v35  ;;  %4202 = vxpose.xlu0.b32.cont [5/16] (narrow) %v5454_v40, 8  ;;  %4128 = vmatpush1.bf16.xpose.msra.mxu1 %v3936_v14  ;;  %v2509_v56 = vpop.xlane.xlu0 %2508 }
 0x573   : > { %v5458_v48 = vpop.eup %5457  ;;  %5475 = vrcp.f32 %v8633_v39  ;;  %v2776_v3 = vsub.f32 %v10334_v51, %v2509_v56  ;;  %v2777_v43 = vsub.f32 %v10483_v19, %v2509_v56  ;;  %4178 = vxpose.xlu1.b32.cont [13/16] (narrow) %v5452_v4, 8 }
 0x574   : > { %v5460_v34 = vpop.eup %5459  ;;  %5477 = vrcp.f32 %v10484_v6  ;;  %v2512_v62 = vpop.xlane.xlu1 %2511  ;;  %v10487_v6 = vld [vmem:[#allocation49_spill] sm:$0xff] }
 0x575   : > { %v5462_v36 = vpop.eup %5461  ;;  %v3262_v31 = vmul.f32 1.442695, %v2776_v3  ;;  %v3264_v26 = vmul.f32 1.442695, %v2777_v43  ;;  %v2778_v29 = vsub.f32 %v10343_v10, %v2512_v62  ;;  %v2779_v14 = vsub.f32 %v10485_v7, %v2512_v62 }
 0x576   : > { %v5464_v47 = vpop.eup %5463  ;;  %5479 = vrcp.f32 %v8649_v15  ;;  %4203 = vxpose.xlu0.b32.cont [6/16] (narrow) %v5462_v36, 8  ;;  %v8894_v39 = vpop.xlane.xlu0 %3450  ;;  %v8896_v51 = vadd.f32 %v5460_v34, %v5458_v48 }
 0x577   : > { %5481 = vpow2.f32 %v3262_v31  ;;  %v3266_v35 = vmul.f32 1.442695, %v2778_v29  ;;  %v3268_v41 = vmul.f32 1.442695, %v2779_v14  ;;  %4179 = vxpose.xlu1.b32.cont [14/16] (narrow) %v5456_v30, 8 }
 0x578   : > { %v5466_v4 = vpop.eup %5465  ;;  %5483 = vpow2.f32 %v3264_v26  ;;  %v8898_v40 = vpop.xlane.xlu1 %3453 }
 0x579   : > { %10486 = vst [vmem:[#allocation59_spill] sm:$0xff] %v8898_v40  ;;  %v5468_v56 = vpop.eup %5467  ;;  %5485 = vpow2.f32 %v3266_v35  ;;  %v10488_v35 = vld [vmem:[#allocation63_spill] sm:$0xff] }
 0x57a   : > { %v5470_v10 = vpop.eup %5469  ;;  %5487 = vpow2.f32 %v3268_v41  ;;  %4204 = vxpose.xlu0.b32.cont [7/16] (narrow) %v5466_v4, 8  ;;  %v2515_v3 = vpop.xlane.xlu0 %2514  ;;  %v3938_v15 = vpack.c.bf16 %v5468_v56, %v5458_v48  ;;  %v10489_v48 = vld [vmem:[#allocation57_spill] sm:$0xff] }
 0x57b   : > { %v5472_v19 = vpop.eup %5471  ;;  %5489 = vrcp.f32 %v8667_v24  ;;  %v2780_v43 = vsub.f32 %v10352_v9, %v2515_v3  ;;  %v2781_v62 = vsub.f32 %v10487_v6, %v2515_v3  ;;  %4180 = vxpose.xlu1.b32.cont [15/16] (narrow) %v5464_v47, 8  ;;  %v3939_v30 = vpack.c.bf16 %v5470_v10, %v5460_v34 }
 0x57c   : > { %v5474_v36 = vpop.eup %5473  ;;  %v2518_v31 = vpop.xlane.xlu1 %2517  ;;  %v8903_v26 = vadd.f32 %v5470_v10, %v5468_v56  ;;  %5491 = vrcp.f32 %v8686_v61 }
 0x57d   : > { %v5476_v29 = vpop.eup %5475  ;;  %v3270_v7 = vmul.f32 1.442695, %v2780_v43  ;;  %v3272_v14 = vmul.f32 1.442695, %v2781_v62  ;;  %4129 = vmatprep.subr.bf16.mxu1 %v3939_v30  ;;  %v2782_v41 = vsub.f32 %v10488_v35, %v2518_v31  ;;  %v2783_v4 = vsub.f32 %v10489_v48, %v2518_v31  ;;  %v10490_v30 = vld [vmem:[#allocation112_spill] sm:$0xff] }
 0x57e   : > { %v5478_v40 = vpop.eup %5477  ;;  %4205 = vxpose.xlu0.b32.cont [8/16] (narrow) %v5476_v29, 8  ;;  %4130 = vmatpush1.bf16.xpose.msra.mxu1 %v3938_v15  ;;  %v8908_v9 = vpop.xlane.xlu0 %3456  ;;  %v8910_v24 = vadd.f32 %v5474_v36, %v5472_v19 }
 0x57f   : > { %5493 = vpow2.f32 %v3270_v7  ;;  %v3274_v34 = vmul.f32 1.442695, %v2782_v41  ;;  %v3276_v47 = vmul.f32 1.442695, %v2783_v4  ;;  %4181 = vxpose.xlu1.b32.end [16/16] (narrow) %v5478_v40, 8  ;;  %v10491_v4 = vld [vmem:[#allocation157_spill] sm:$0xff] }
 0x580   : > { %v5480_v56 = vpop.eup %5479  ;;  %5495 = vpow2.f32 %v3272_v14  ;;  %v8912_v10 = vpop.xlane.xlu1 %3459 }
 0x581   : > { %v5482_v3 = vpop.eup %5481  ;;  %5497 = vpow2.f32 %v3274_v34 }
 0x582   : > { %v5484_v43 = vpop.eup %5483  ;;  %5499 = vpow2.f32 %v3276_v47  ;;  %4206 = vxpose.xlu0.b32.cont [9/16] (narrow) %v5480_v56, 8  ;;  %v2521_v61 = vpop.xlane.xlu0 %2520  ;;  %v3940_v6 = vpack.c.bf16 %v5482_v3, %v5472_v19  ;;  %v10492_v47 = vld [vmem:[#allocation117_spill] sm:$0xff] }
 0x583   : > { %v5486_v15 = vpop.eup %5485  ;;  %5501 = vrcp.f32 %v8699_v23  ;;  %v2784_v62 = vsub.f32 %v8325_v50, %v2521_v61  ;;  %v2785_v31 = vsub.f32 %v10490_v30, %v2521_v61  ;;  %v3941_v29 = vpack.c.bf16 %v5484_v43, %v5474_v36 }
 0x584   : > { %v5488_v40 = vpop.eup %5487  ;;  %v2524_v7 = vpop.xlane.xlu1 %2523  ;;  %v8917_v14 = vadd.f32 %v5484_v43, %v5482_v3  ;;  %5503 = vrcp.f32 %v8709_v60 }
 0x585   : > { %v5490_v35 = vpop.eup %5489  ;;  %v3278_v41 = vmul.f32 1.442695, %v2784_v62  ;;  %v3280_v48 = vmul.f32 1.442695, %v2785_v31  ;;  %4131 = vmatprep.subr.bf16.mxu1 %v3941_v29  ;;  %v2786_v34 = vsub.f32 %v10491_v4, %v2524_v7  ;;  %v2787_v19 = vsub.f32 %v10492_v47, %v2524_v7 }
 0x586   : > { %4207 = vxpose.xlu0.b32.cont [10/16] (narrow) %v5490_v35, 8  ;;  %4132 = vmatpush1.bf16.xpose.msra.mxu1 %v3940_v6  ;;  %v8922_v50 = vpop.xlane.xlu0 %3462  ;;  %v8924_v23 = vadd.f32 %v5488_v40, %v5486_v15  ;;  %v5492_v3 = vpop.eup %5491 }
 0x587   : > { %5505 = vpow2.f32 %v3278_v41  ;;  %v3282_v36 = vmul.f32 1.442695, %v2786_v34  ;;  %v3284_v56 = vmul.f32 1.442695, %v2787_v19 }
 0x588   : > { %5507 = vpow2.f32 %v3280_v48  ;;  %v8926_v43 = vpop.xlane.xlu1 %3465 }
 0x589   : > { %v5494_v61 = vpop.eup %5493  ;;  %5509 = vpow2.f32 %v3282_v36  ;;  %v10493_v36 = vld [vmem:[#allocation158_spill] sm:$0xff] }
 0x58a   : > { %v5496_v62 = vpop.eup %5495  ;;  %5511 = vpow2.f32 %v3284_v56  ;;  %4208 = vxpose.xlu0.b32.cont [11/16] (narrow) %v5492_v3, 8  ;;  %v2527_v30 = vpop.xlane.xlu0 %2526  ;;  %v3942_v60 = vpack.c.bf16 %v5494_v61, %v5486_v15 }
 0x58b   : > { %v5498_v31 = vpop.eup %5497  ;;  %5513 = vrcp.f32 %v8727_v37  ;;  %v2788_v6 = vsub.f32 %v10381_v16, %v2527_v30  ;;  %v2789_v29 = vsub.f32 %v10382_v12, %v2527_v30  ;;  %v3943_v7 = vpack.c.bf16 %v5496_v62, %v5488_v40 }
 0x58c   : > { %v5500_v35 = vpop.eup %5499  ;;  %v2530_v41 = vpop.xlane.xlu1 %2529  ;;  %v8931_v48 = vadd.f32 %v5496_v62, %v5494_v61  ;;  %5515 = vrcp.f32 %v8739_v63 }
 0x58d   : > { %v5502_v4 = vpop.eup %5501  ;;  %v3286_v34 = vmul.f32 1.442695, %v2788_v6  ;;  %v3288_v47 = vmul.f32 1.442695, %v2789_v29  ;;  %4133 = vmatprep.subr.bf16.mxu1 %v3943_v7  ;;  %v2790_v19 = vsub.f32 %v10387_v59, %v2530_v41  ;;  %v2791_v15 = vsub.f32 %v10493_v36, %v2530_v41 }
 0x58e   : > { %4209 = vxpose.xlu0.b32.cont [12/16] (narrow) %v5502_v4, 8  ;;  %4134 = vmatpush1.bf16.xpose.msra.mxu1 %v3942_v60  ;;  %v8936_v37 = vpop.xlane.xlu0 %3468  ;;  %v8938_v16 = vadd.f32 %v5500_v35, %v5498_v31  ;;  %v5504_v56 = vpop.eup %5503 }
 0x58f   : > { %5517 = vpow2.f32 %v3286_v34  ;;  %v3290_v12 = vmul.f32 1.442695, %v2790_v19  ;;  %v3292_v40 = vmul.f32 1.442695, %v2791_v15 }
 0x590   : > { %5519 = vpow2.f32 %v3288_v47  ;;  %v8940_v3 = vpop.xlane.xlu1 %3471 }
 0x591   : > { %v5506_v61 = vpop.eup %5505  ;;  %5521 = vpow2.f32 %v3290_v12 }
 0x592   : > { %v5508_v59 = vpop.eup %5507  ;;  %5523 = vpow2.f32 %v3292_v40  ;;  %4210 = vxpose.xlu0.b32.cont [13/16] (narrow) %v5504_v56, 8  ;;  %v2533_v62 = vpop.xlane.xlu0 %2532  ;;  %v3944_v63 = vpack.c.bf16 %v5506_v61, %v5498_v31 }
 0x593   : > { %v5510_v30 = vpop.eup %5509  ;;  %5525 = vrcp.f32 %v8751_v33  ;;  %v2792_v60 = vsub.f32 %v8395_v0, %v2533_v62  ;;  %v2793_v6 = vsub.f32 %v8402_v11, %v2533_v62  ;;  %v3945_v29 = vpack.c.bf16 %v5508_v59, %v5500_v35 }
 0x594   : > { %v5512_v7 = vpop.eup %5511  ;;  %v2536_v41 = vpop.xlane.xlu1 %2535  ;;  %v8945_v4 = vadd.f32 %v5508_v59, %v5506_v61 }
 0x595   : > { %v5514_v34 = vpop.eup %5513  ;;  %v3294_v47 = vmul.f32 1.442695, %v2792_v60  ;;  %v3296_v19 = vmul.f32 1.442695, %v2793_v6  ;;  %4135 = vmatprep.subr.bf16.mxu1 %v3945_v29  ;;  %v2794_v36 = vsub.f32 %v8424_v52, %v2536_v41  ;;  %v2795_v31 = vsub.f32 %v8427_v27, %v2536_v41 }
 0x596   : > { %4211 = vxpose.xlu0.b32.cont [14/16] (narrow) %v5514_v34, 8  ;;  %4136 = vmatpush1.bf16.xpose.msra.mxu1 %v3944_v63  ;;  %v8949_v33 = vpop.xlane.xlu0 %3474  ;;  %v8951_v0 = vadd.f32 %v5512_v7, %v5510_v30  ;;  %v5516_v15 = vpop.eup %5515 }
 0x597   : > { %5527 = vpow2.f32 %v3294_v47  ;;  %v3298_v11 = vmul.f32 1.442695, %v2794_v36  ;;  %v3300_v35 = vmul.f32 1.442695, %v2795_v31  ;;  %v10494_v36 = vld [vmem:[#allocation128_spill] sm:$0xff] }
 0x598   : > { %5529 = vpow2.f32 %v3296_v19  ;;  %v8953_v12 = vpop.xlane.xlu1 %3477 }
 0x599   : > { %v5518_v40 = vpop.eup %5517  ;;  %5531 = vpow2.f32 %v3298_v11 }
 0x59a   : > { %v5520_v56 = vpop.eup %5519  ;;  %5533 = vpow2.f32 %v3300_v35  ;;  %4212 = vxpose.xlu0.b32.cont [15/16] (narrow) %v5516_v15, 8  ;;  %v2539_v52 = vpop.xlane.xlu0 %2538  ;;  %v3946_v27 = vpack.c.bf16 %v5518_v40, %v5510_v30 }
 0x59b   : > { %v5522_v61 = vpop.eup %5521  ;;  %v2796_v59 = vsub.f32 %v8433_v54, %v2539_v52  ;;  %v2797_v62 = vsub.f32 %v8440_v18, %v2539_v52  ;;  %v3947_v63 = vpack.c.bf16 %v5520_v56, %v5512_v7  ;;  %v8957_v29 = vadd.f32 %v5520_v56, %v5518_v40 }
 0x59c   : > { %v5524_v60 = vpop.eup %5523  ;;  %v2542_v6 = vpop.xlane.xlu1 %2541 }
 0x59d   : > { %v5526_v41 = vpop.eup %5525  ;;  %v3302_v34 = vmul.f32 1.442695, %v2796_v59  ;;  %v3304_v47 = vmul.f32 1.442695, %v2797_v62  ;;  %4137 = vmatprep.subr.bf16.mxu1 %v3947_v63  ;;  %v2798_v19 = vsub.f32 %v8458_v58, %v2542_v6  ;;  %v2799_v31 = vsub.f32 %v10494_v36, %v2542_v6  ;;  %v10495_v58 = vld [vmem:[#allocation73_spill] sm:$0xff] }
 0x59e   : > { %4213 = vxpose.xlu0.b32.end [16/16] (narrow) %v5526_v41, 8  ;;  %4138 = vmatpush1.bf16.xpose.msra.mxu1 %v3946_v27  ;;  %v8961_v30 = vpop.xlane.xlu0 %3480  ;;  %v8963_v54 = vadd.f32 %v5524_v60, %v5522_v61  ;;  %v10496_v59 = vld [vmem:[#allocation129_spill] sm:$0xff] }
 0x59f   : > { %5535 = vpow2.f32 %v3302_v34  ;;  %v3306_v18 = vmul.f32 1.442695, %v2798_v19  ;;  %v3308_v7 = vmul.f32 1.442695, %v2799_v31  ;;  %v10498_v31 = vld [vmem:[#allocation136_spill] sm:$0xff] }
 0x5a0   : > { %5537 = vpow2.f32 %v3304_v47  ;;  %v10497_v47 = vld [vmem:[#allocation132_spill] sm:$0xff] }
 0x5a1   : > { %v5528_v11 = vpop.eup %5527  ;;  %5539 = vpow2.f32 %v3306_v18 }
 0x5a2   : > { %v5530_v35 = vpop.eup %5529  ;;  %5541 = vpow2.f32 %v3308_v7  ;;  %v2545_v15 = vpop.xlane.xlu0 %2544  ;;  %v3948_v40 = vpack.c.bf16 %v5528_v11, %v5522_v61 }
 0x5a3   : > { %v5532_v56 = vpop.eup %5531  ;;  %v2800_v52 = vsub.f32 %v10495_v58, %v2545_v15  ;;  %v2801_v62 = vsub.f32 %v10496_v59, %v2545_v15  ;;  %v3949_v27 = vpack.c.bf16 %v5530_v35, %v5524_v60  ;;  %v8967_v6 = vadd.f32 %v5530_v35, %v5528_v11  ;;  %v10499_v58 = vld [vmem:[#allocation91_spill] sm:$0xff]  ;;  %v10500_v59 = vld [vmem:[#allocation169_spill] sm:$0xff] }
 0x5a4   : > { %v5534_v63 = vpop.eup %5533 }
 0x5a5   : > { %v3310_v41 = vmul.f32 1.442695, %v2800_v52  ;;  %v3312_v34 = vmul.f32 1.442695, %v2801_v62  ;;  %4139 = vmatprep.subr.bf16.mxu1 %v3949_v27  ;;  %v8969_v19 = vadd.f32 %v5534_v63, %v5532_v56 }
 0x5a6   : > { %4140 = vmatpush1.bf16.xpose.msra.mxu1 %v3948_v40  ;;  %3483 = vadd.xlane.f32.xlu1 %v10497_v47  ;;  %v10504_v47 = vld [vmem:[#allocation45_spill] sm:$0xff] }
 0x5a7   : > { %5543 = vpow2.f32 %v3310_v41 }
 0x5a8   : > { %5545 = vpow2.f32 %v3312_v34 }
 0x5a9   : > { %v5536_v61 = vpop.eup %5535 }
 0x5aa   : > { %v5538_v36 = vpop.eup %5537  ;;  %3489 = vadd.xlane.f32.xlu1 %v10498_v31  ;;  %v3950_v18 = vpack.c.bf16 %v5536_v61, %v5532_v56  ;;  %v10501_v56 = vld [vmem:[#allocation40_spill] sm:$0xff]  ;;  %v10507_v31 = vld [vmem:[#allocation17_spill] sm:$0xff] }
 0x5ab   : > { %v5540_v7 = vpop.eup %5539  ;;  %v3951_v60 = vpack.c.bf16 %v5538_v36, %v5534_v63  ;;  %v8973_v15 = vadd.f32 %v5538_v36, %v5536_v61  ;;  %v10502_v63 = vld [vmem:[#allocation38_spill] sm:$0xff]  ;;  %v10505_v61 = vld [vmem:[#allocation43_spill] sm:$0xff] }
 0x5ac   : > { %v5542_v11 = vpop.eup %5541  ;;  %v10503_v34 = vpack.c.bf16 %v10501_v56, %v10502_v63  ;;  %v10506_v36 = vpack.c.bf16 %v10504_v47, %v10505_v61 }
 0x5ad   : > { %4141 = vmatprep.subr.bf16.mxu1 %v3951_v60  ;;  %v8975_v35 = vadd.f32 %v5542_v11, %v5540_v7  ;;  %v8990_v60 = vpop.xlane.xlu0 %3486 }
 0x5ae   : > { %4142 = vmatpush1.bf16.xpose.msra.mxu1 %v3950_v18  ;;  %3495 = vadd.xlane.f32.xlu1 %v10499_v58  ;;  %v8988_v18 = vsub.s32 0, %v10507_v31 }
 0x5b1   : > { %v5544_v40 = vpop.eup %5543  ;;  %v9000_v63 = vpop.xlane.xlu0 %3492 }
 0x5b2   : > { %v5546_v52 = vpop.eup %5545  ;;  %3501 = vadd.xlane.f32.xlu1 %v10500_v59  ;;  %v3952_v62 = vpack.c.bf16 %v5544_v40, %v5540_v7 }
 0x5b3   : > { %v3953_v27 = vpack.c.bf16 %v5546_v52, %v5542_v11  ;;  %v8979_v41 = vadd.f32 %v5546_v52, %v5544_v40  ;;  %v10508_v11 = vld [vmem:[#allocation44_spill] sm:$0xff]  ;;  %v10509_v40 = vld [vmem:[#allocation42_spill] sm:$0xff] }
 0x5b4   : > { %v10510_v52 = vpack.c.bf16 %v10508_v11, %v10509_v40  ;;  %v10513_v40 = vld [vmem:[#allocation159_spill] sm:$0xff] }
 0x5b5   : > { %4143 = vmatprep.subr.bf16.mxu1 %v3953_v27  ;;  %v9003_v61 = vpop.xlane.xlu0 %3498 }
 0x5b6   : > { %4144 = vmatpush1.bf16.xpose.msra.mxu1 %v3952_v62 }
 0x5bd   : > { %4146 = vmatmul.mubr.bf16.vlgmr.msra.gmra.mrb[192].mxu1 %v10503_v34 }
 0x5be   : > { %4155 = vmatprep.mubr.bf16.mxu1 %v10506_v36 }
 0x5c3   : > { %v4182_v58 = vpop.trf.xlu1 }
 0x5c4   : > { %v4425_v7 = vrot.slane %v4182_v58, %v8988_v18 }
 0x5c5   : > { %4156 = vmatmul.mubr.bf16.gmra.mrb[196].mxu1 %v10510_v52 }
 0x5c6   : > { %v4454_v59 = vmul.f32 %v4425_v7, %v8809_v28  ;;  %v4456_v62 = vmul.f32 %v4425_v7, %v8816_v57  ;;  %v4458_v27 = vmul.f32 %v4425_v7, %v8831_v20  ;;  %v4460_v56 = vmul.f32 %v4425_v7, %v8837_v13  ;;  %v9015_v20 = vpop.xlane.xlu0 %3504 }
 0x5c8   : > { %v4486_v34 = vpack.c.bf16 %v4456_v62, %v4454_v59  ;;  %v4488_v47 = vpack.c.bf16 %v4460_v56, %v4458_v27 }
 0x5ca   : > { %v9025_v7 = vpop.xlane.xlu0 %3612 }
 0x5cb   : > { %3624 = vadd.xlane.f32.xlu0 %v8784_v49  ;;  %10512 = vst [vmem:[#allocation137_spill] sm:$0xff] %v9025_v7  ;;  %v10527_v7 = vld [vmem:[#allocation90_spill] sm:$0xff] }
 0x5ce   : > { %v9006_v36 = vpop.f32.mrb[176].mxu0 }
 0x5cf   : > { %3630 = vadd.xlane.f32.xlu0 %v8803_v8  ;;  %v9008_v31 = vpop.f32.mrb[177].mxu0  ;;  %v10511_v8 = vld [vmem:[#allocation65_spill] sm:$0xff] }
 0x5d0   : > { %v9010_v28 = vpop.f32.mrb[178].mxu0  ;;  %5547 = vrcp.f32 %v10511_v8 }
 0x5d1   : > { %v9012_v57 = vpop.f32.mrb[179].mxu0  ;;  %5549 = vrcp.f32 %v10513_v40  ;;  %v10516_v40 = vld [vmem:[#allocation161_spill] sm:$0xff] }
 0x5d3   : > { %3636 = vadd.xlane.f32.xlu0 %v8835_v1  ;;  %v9031_v1 = vpop.xlane.xlu0 %3618 }
 0x5d4   : > { %10514 = vst [vmem:[#allocation31_spill] sm:$0xff] %v9031_v1 }
 0x5d6   : > { %v9018_v13 = vpop.f32.mrb[180].mxu0 }
 0x5d7   : > { %3639 = vadd.xlane.f32.xlu0 %v8849_v21  ;;  %v9020_v49 = vpop.f32.mrb[181].mxu0  ;;  %v10515_v21 = vld [vmem:[#allocation68_spill] sm:$0xff] }
 0x5d8   : > { %v9022_v58 = vpop.f32.mrb[182].mxu0  ;;  %5551 = vrcp.f32 %v10515_v21 }
 0x5d9   : > { %v9027_v11 = vpop.f32.mrb[183].mxu0  ;;  %5553 = vrcp.f32 %v10516_v40 }
 0x5da   : > { %v5548_v62 = vpop.eup %5547 }
 0x5db   : > { %3642 = vadd.xlane.f32.xlu0 %v8861_v5  ;;  %v5550_v21 = vpop.eup %5549 }
 0x5df   : > { %3645 = vadd.xlane.f32.xlu0 %v8872_v44 }
 0x5e2   : > { %v4214_v52 = vpop.trf.xlu0 }
 0x5e3   : > { %v4429_v59 = vrot.slane %v4214_v52, %v8988_v18  ;;  %3648 = vadd.xlane.f32.xlu0 %v8885_v22  ;;  %v10517_v52 = vld [vmem:[#allocation162_spill] sm:$0xff] }
 0x5e4   : > { %5555 = vrcp.f32 %v10517_v52  ;;  %v10523_v52 = vld [vmem:[#allocation165_spill] sm:$0xff] }
 0x5e5   : > { %4294 = vxpose.xlu1.b32.start [1/16] (narrow) %v5548_v62, 8  ;;  %v4455_v27 = vmul.f32 %v4429_v59, %v8812_v53  ;;  %v4457_v56 = vmul.f32 %v4429_v59, %v8818_v55  ;;  %v4459_v5 = vmul.f32 %v4429_v59, %v8833_v17  ;;  %v4461_v8 = vmul.f32 %v4429_v59, %v8841_v42  ;;  %v5552_v53 = vpop.eup %5551  ;;  %v10518_v42 = vld [vmem:[#allocation131_spill] sm:$0xff] }
 0x5e6   : > { %5557 = vrcp.f32 %v10518_v42  ;;  %v5554_v59 = vpop.eup %5553  ;;  %v10524_v42 = vld [vmem:[#allocation87_spill] sm:$0xff] }
 0x5e7   : > { %v4487_v44 = vpack.c.bf16 %v4457_v56, %v4455_v27  ;;  %v4489_v1 = vpack.c.bf16 %v4461_v8, %v4459_v5  ;;  %v10519_v27 = vld [vmem:[#allocation77_spill] sm:$0xff]  ;;  %v10520_v8 = vld [vmem:[#allocation76_spill] sm:$0xff] }
 0x5e8   : > { %5559 = vrcp.f32 %v10519_v27  ;;  %v10525_v27 = vld [vmem:[#allocation144_spill] sm:$0xff] }
 0x5e9   : > { %4509 = vmatprep.subr.bf16.mxu0 %v4487_v44  ;;  %4295 = vxpose.xlu1.b32.cont [2/16] (narrow) %v5550_v21, 8  ;;  %v9043_v22 = vpop.f32.mrb[184].mxu1  ;;  %5561 = vrcp.f32 %v10520_v8 }
 0x5ea   : > { %4510 = vmatpush1.bf16.msra.mxu0 %v4486_v34  ;;  %v9045_v62 = vpop.f32.mrb[185].mxu1 }
 0x5eb   : > { %4511 = vmatprep.subr.bf16.mxu0 %v4489_v1  ;;  %v9047_v55 = vpop.f32.mrb[186].mxu1 }
 0x5ec   : > { %v9050_v17 = vpop.f32.mrb[187].mxu1 }
 0x5ed   : > { %4296 = vxpose.xlu1.b32.cont [3/16] (narrow) %v5552_v53, 8 }
 0x5ee   : > { %4512 = vmatpush1.bf16.msra.mxu0 %v4488_v47  ;;  %v5556_v34 = vpop.eup %5555  ;;  %v10522_v47 = vld [vmem:[#allocation164_spill] sm:$0xff] }
 0x5ef   : > { %5563 = vrcp.f32 %v10522_v47 }
 0x5f0   : > { %v5558_v44 = vpop.eup %5557  ;;  %5565 = vrcp.f32 %v10523_v52  ;;  %v10530_v52 = vld [vmem:[#allocation167_spill] sm:$0xff] }
 0x5f1   : > { %4297 = vxpose.xlu1.b32.cont [4/16] (narrow) %v5554_v59, 8  ;;  %5567 = vrcp.f32 %v10524_v42 }
 0x5f2   : > { %v9053_v56 = vpop.f32.mrb[188].mxu1  ;;  %v5560_v21 = vpop.eup %5559  ;;  %5569 = vrcp.f32 %v10525_v27 }
 0x5f3   : > { %v9055_v1 = vpop.f32.mrb[189].mxu1  ;;  %v5562_v53 = vpop.eup %5561 }
 0x5f4   : > { %v9057_v5 = vpop.f32.mrb[190].mxu1 }
 0x5f5   : > { %4298 = vxpose.xlu1.b32.cont [5/16] (narrow) %v5556_v34, 8  ;;  %v9060_v40 = vpop.f32.mrb[191].mxu1  ;;  %v10526_v34 = vld [vmem:[#allocation81_spill] sm:$0xff] }
 0x5f6   : > { %10521 = vst [vmem:[#allocation150_spill] sm:$0xff] %v9060_v40  ;;  %5571 = vrcp.f32 %v10526_v34  ;;  %v10531_v40 = vld [vmem:[#allocation23_spill] sm:$0xff] }
 0x5f7   : > { %5573 = vrcp.f32 %v10527_v7  ;;  %v10533_v7 = vld [vmem:[#allocation171_spill] sm:$0xff] }
 0x5f9   : > { %4299 = vxpose.xlu1.b32.cont [6/16] (narrow) %v5558_v44, 8  ;;  %v5564_v59 = vpop.eup %5563  ;;  %v10528_v44 = vld [vmem:[#allocation166_spill] sm:$0xff] }
 0x5fa   : > { %v5566_v8 = vpop.eup %5565  ;;  %5575 = vrcp.f32 %v10528_v44 }
 0x5fb   : > { %v5568_v47 = vpop.eup %5567 }
 0x5fd   : > { %4300 = vxpose.xlu1.b32.cont [7/16] (narrow) %v5560_v21, 8  ;;  %v10529_v21 = vld [vmem:[#allocation95_spill] sm:$0xff] }
 0x5fe   : > { %5577 = vrcp.f32 %v10529_v21 }
 0x5ff   : > { %5579 = vrcp.f32 %v10530_v52 }
 0x600   : > { %5581 = vrcp.f32 %v10531_v40  ;;  %v10535_v40 = vld [vmem:[#allocation48_spill] sm:$0xff] }
 0x601   : > { %4301 = vxpose.xlu1.b32.cont [8/16] (narrow) %v5562_v53, 8  ;;  %v5570_v53 = vpop.eup %5569 }
 0x602   : > { %v5572_v42 = vpop.eup %5571 }
 0x603   : > { %v5574_v27 = vpop.eup %5573 }
 0x604   : > { %v5576_v34 = vpop.eup %5575 }
 0x605   : > { %4302 = vxpose.xlu1.b32.cont [9/16] (narrow) %v5564_v59, 8  ;;  %v10532_v59 = vld [vmem:[#allocation141_spill] sm:$0xff] }
 0x606   : > { %5583 = vrcp.f32 %v10532_v59  ;;  %v10536_v59 = vld [vmem:[#allocation138_spill] sm:$0xff] }
 0x607   : > { %5585 = vrcp.f32 %v10533_v7 }
 0x608   : > { %v5578_v44 = vpop.eup %5577 }
 0x609   : > { %4303 = vxpose.xlu1.b32.cont [10/16] (narrow) %v5566_v8, 8  ;;  %v10534_v8 = vld [vmem:[#allocation168_spill] sm:$0xff] }
 0x60a   : > { %5587 = vrcp.f32 %v10534_v8 }
 0x60b   : > { %5589 = vrcp.f32 %v8755_v2  ;;  %v10538_v2 = vld [vmem:[#allocation54_spill] sm:$0xff] }
 0x60c   : > { %5591 = vrcp.f32 %v10535_v40  ;;  %v10541_v40 = vld [vmem:[#allocation142_spill] sm:$0xff] }
 0x60d   : > { %4304 = vxpose.xlu1.b32.cont [11/16] (narrow) %v5568_v47, 8  ;;  %v5580_v47 = vpop.eup %5579  ;;  %5593 = vrcp.f32 %v10536_v59 }
 0x60e   : > { %v5582_v21 = vpop.eup %5581 }
 0x610   : > { %4326 = vxpose.xlu0.b32.start [1/16] (narrow) %v5570_v53, 8  ;;  %v5584_v52 = vpop.eup %5583 }
 0x611   : > { %4305 = vxpose.xlu1.b32.cont [12/16] (narrow) %v5572_v42, 8  ;;  %v5586_v53 = vpop.eup %5585 }
 0x614   : > { %4327 = vxpose.xlu0.b32.cont [2/16] (narrow) %v5574_v27, 8  ;;  %v5588_v42 = vpop.eup %5587 }
 0x615   : > { %4306 = vxpose.xlu1.b32.cont [13/16] (narrow) %v5576_v34, 8  ;;  %v5590_v27 = vpop.eup %5589  ;;  %v10537_v34 = vld [vmem:[#allocation85_spill] sm:$0xff] }
 0x616   : > { %5595 = vrcp.f32 %v10537_v34  ;;  %v5592_v7 = vpop.eup %5591 }
 0x617   : > { %5597 = vrcp.f32 %v10538_v2  ;;  %v5594_v8 = vpop.eup %5593 }
 0x618   : > { %4328 = vxpose.xlu0.b32.cont [3/16] (narrow) %v5578_v44, 8  ;;  %v10539_v44 = vld [vmem:[#allocation22_spill] sm:$0xff] }
 0x619   : > { %4307 = vxpose.xlu1.b32.cont [14/16] (narrow) %v5580_v47, 8  ;;  %5599 = vrcp.f32 %v10539_v44 }
 0x61c   : > { %4329 = vxpose.xlu0.b32.cont [4/16] (narrow) %v5582_v21, 8  ;;  %v10540_v21 = vld [vmem:[#allocation53_spill] sm:$0xff] }
 0x61d   : > { %4308 = vxpose.xlu1.b32.cont [15/16] (narrow) %v5584_v52, 8  ;;  %5601 = vrcp.f32 %v10540_v21 }
 0x61e   : > { %5603 = vrcp.f32 %v10541_v40  ;;  %v10547_v40 = vld [vmem:[#allocation47_spill] sm:$0xff] }
 0x620   : > { %4330 = vxpose.xlu0.b32.cont [5/16] (narrow) %v5586_v53, 8  ;;  %v5596_v47 = vpop.eup %5595 }
 0x621   : > { %4309 = vxpose.xlu1.b32.end [16/16] (narrow) %v5588_v42, 8  ;;  %v5598_v52 = vpop.eup %5597  ;;  %v10542_v42 = vld [vmem:[#allocation56_spill] sm:$0xff] }
 0x622   : > { %5605 = vrcp.f32 %v10542_v42  ;;  %v10548_v42 = vld [vmem:[#allocation118_spill] sm:$0xff] }
 0x623   : > { %v5600_v53 = vpop.eup %5599 }
 0x624   : > { %4331 = vxpose.xlu0.b32.cont [6/16] (narrow) %v5590_v27, 8  ;;  %v10543_v27 = vld [vmem:[#allocation62_spill] sm:$0xff] }
 0x625   : > { %5607 = vrcp.f32 %v10543_v27  ;;  %v10550_v27 = vld [vmem:[#allocation18_spill] sm:$0xff] }
 0x626   : > { %5609 = vrcp.f32 %v8866_v45 }
 0x627   : > { %v5602_v59 = vpop.eup %5601 }
 0x628   : > { %4332 = vxpose.xlu0.b32.cont [7/16] (narrow) %v5592_v7, 8  ;;  %v5604_v34 = vpop.eup %5603 }
 0x62c   : > { %4333 = vxpose.xlu0.b32.cont [8/16] (narrow) %v5594_v8, 8  ;;  %v5606_v7 = vpop.eup %5605  ;;  %v10544_v8 = vld [vmem:[#allocation125_spill] sm:$0xff] }
 0x62f   : > { %v5608_v2 = vpop.eup %5607 }
 0x630   : > { %4334 = vxpose.xlu0.b32.cont [9/16] (narrow) %v5596_v47, 8  ;;  %v5610_v44 = vpop.eup %5609  ;;  %v10545_v47 = vld [vmem:[#allocation94_spill] sm:$0xff] }
 0x633   : > { %v9088_v21 = vpop.xlane.xlu1 %3483 }
 0x634   : > { %4335 = vxpose.xlu0.b32.cont [10/16] (narrow) %v5598_v52, 8  ;;  %v10546_v52 = vld [vmem:[#allocation170_spill] sm:$0xff] }
 0x638   : > { %4336 = vxpose.xlu0.b32.cont [11/16] (narrow) %v5600_v53, 8  ;;  %v9092_v53 = vpop.xlane.xlu1 %3489 }
 0x63c   : > { %4337 = vxpose.xlu0.b32.cont [12/16] (narrow) %v5602_v59, 8  ;;  %v9095_v45 = vpop.xlane.xlu1 %3495  ;;  %v10549_v59 = vld [vmem:[#allocation114_spill] sm:$0xff] }
 0x640   : > { %4338 = vxpose.xlu0.b32.cont [13/16] (narrow) %v5604_v34, 8  ;;  %v9099_v34 = vpop.xlane.xlu1 %3501 }
 0x644   : > { %4339 = vxpose.xlu0.b32.cont [14/16] (narrow) %v5606_v7, 8 }
 0x648   : > { %4340 = vxpose.xlu0.b32.cont [15/16] (narrow) %v5608_v2, 8  ;;  %3603 = vadd.xlane.f32.xlu1 %v10544_v8 }
 0x64c   : > { %4341 = vxpose.xlu0.b32.end [16/16] (narrow) %v5610_v44, 8  ;;  %3606 = vadd.xlane.f32.xlu1 %v10545_v47 }
 0x650   : > { %3609 = vadd.xlane.f32.xlu1 %v10546_v52 }
 0x654   : > { %3615 = vadd.xlane.f32.xlu1 %v10547_v40 }
 0x658   : > { %3621 = vadd.xlane.f32.xlu1 %v10548_v42  ;;  %v9103_v8 = vpop.xlane.xlu0 %3624 }
 0x65c   : > { %3627 = vadd.xlane.f32.xlu1 %v10549_v59  ;;  %v9122_v59 = vpop.xlane.xlu0 %3630 }
 0x660   : > { %3633 = vadd.xlane.f32.xlu1 %v10550_v27  ;;  %v10551_v27 = vld [vmem:[#allocation46_spill] sm:$0xff] }
 0x661   : > { %5611 = vrcp.f32 %v10551_v27 }
 0x664   : > { %3660 = vadd.xlane.f32.xlu1 %v8917_v14  ;;  %v10563_v14 = vld [vmem:[#allocation51_spill] sm:$0xff] }
 0x665   : > { %v4310_v7 = vpop.trf.xlu1 }
 0x666   : > { %v4441_v2 = vrot.slane %v4310_v7, %v8988_v18 }
 0x668   : > { %v9106_v44 = vmul.f32 %v4441_v2, %v9006_v36  ;;  %v9109_v47 = vmul.f32 %v4441_v2, %v9010_v28  ;;  %v9112_v52 = vmul.f32 %v4441_v2, %v9018_v13  ;;  %v9115_v40 = vmul.f32 %v4441_v2, %v9022_v58  ;;  %3666 = vadd.xlane.f32.xlu1 %v8931_v48  ;;  %v9124_v36 = vpop.xlane.xlu0 %3636 }
 0x66c   : > { %v9127_v28 = vpop.xlane.xlu0 %3639 }
 0x670   : > { %v9130_v13 = vpop.xlane.xlu0 %3642 }
 0x674   : > { %v9134_v48 = vpop.xlane.xlu0 %3645 }
 0x678   : > { %v9137_v58 = vpop.xlane.xlu0 %3648 }
 0x679   : > { %3651 = vadd.xlane.f32.xlu0 %v8896_v51 }
 0x67d   : > { %3654 = vadd.xlane.f32.xlu0 %v8903_v26 }
 0x681   : > { %3657 = vadd.xlane.f32.xlu0 %v8910_v24 }
 0x685   : > { %3663 = vadd.xlane.f32.xlu0 %v8924_v23 }
 0x689   : > { %3669 = vadd.xlane.f32.xlu0 %v8938_v16 }
 0x68d   : > { %3675 = vadd.xlane.f32.xlu0 %v8951_v0 }
 0x690   : > { %v9141_v51 = vpop.f32.mrb[192].mxu1  ;;  %v4342_v7 = vpop.trf.xlu0 }
 0x691   : > { %v4445_v26 = vrot.slane %v4342_v7, %v8988_v18  ;;  %3681 = vadd.xlane.f32.xlu0 %v8963_v54  ;;  %v9145_v24 = vpop.f32.mrb[193].mxu1  ;;  %v10555_v7 = vld [vmem:[#allocation50_spill] sm:$0xff] }
 0x692   : > { %10552 = vst [vmem:[#allocation64_spill] sm:$0xff] %v9145_v24  ;;  %v9147_v23 = vpop.f32.mrb[194].mxu1  ;;  %5613 = vrcp.f32 %v10555_v7  ;;  %v5612_v24 = vpop.eup %5611  ;;  %v10562_v7 = vld [vmem:[#allocation120_spill] sm:$0xff] }
 0x693   : > { %10553 = vst [vmem:[#allocation66_spill] sm:$0xff] %v9147_v23  ;;  %v9149_v2 = vpop.f32.mrb[195].mxu1  ;;  %v9152_v16 = vmul.f32 %v4445_v26, %v9008_v31  ;;  %v9155_v0 = vmul.f32 %v4445_v26, %v9012_v57  ;;  %v9158_v27 = vmul.f32 %v4445_v26, %v9020_v49  ;;  %v9161_v42 = vmul.f32 %v4445_v26, %v9027_v11  ;;  %v10561_v11 = vld [vmem:[#allocation52_spill] sm:$0xff] }
 0x694   : > { %10554 = vst [vmem:[#allocation19_spill] sm:$0xff] %v9149_v2  ;;  %v10556_v2 = vld [vmem:[#allocation122_spill] sm:$0xff] }
 0x695   : > { %5615 = vrcp.f32 %v10556_v2 }
 0x696   : > { %5617 = vrcp.f32 %v10561_v11 }
 0x697   : > { %5619 = vrcp.f32 %v10562_v7 }
 0x698   : > { %v9169_v31 = vpop.f32.mrb[196].mxu1  ;;  %5621 = vrcp.f32 %v10563_v14 }
 0x699   : > { %10557 = vst [vmem:[#allocation133_spill] sm:$0xff] %v9169_v31  ;;  %v9171_v57 = vpop.f32.mrb[197].mxu1  ;;  %v10564_v31 = vld [vmem:[#allocation99_spill] sm:$0xff] }
 0x69a   : > { %10558 = vst [vmem:[#allocation152_spill] sm:$0xff] %v9171_v57  ;;  %v9173_v49 = vpop.f32.mrb[198].mxu1  ;;  %5623 = vrcp.f32 %v10564_v31 }
 0x69b   : > { %10559 = vst [vmem:[#allocation96_spill] sm:$0xff] %v9173_v49  ;;  %v9175_v23 = vpop.f32.mrb[199].mxu1  ;;  %4230 = vxpose.xlu1.b32.start [1/16] (narrow) %v5612_v24, 8  ;;  %v10565_v49 = vld [vmem:[#allocation33_spill] sm:$0xff]  ;;  %v10566_v24 = vld [vmem:[#allocation58_spill] sm:$0xff] }
 0x69c   : > { %10560 = vst [vmem:[#allocation143_spill] sm:$0xff] %v9175_v23  ;;  %v5614_v26 = vpop.eup %5613  ;;  %5625 = vrcp.f32 %v10565_v49 }
 0x69d   : > { %5627 = vrcp.f32 %v10566_v24 }
 0x69e   : > { %5629 = vrcp.f32 %v8912_v10 }
 0x69f   : > { %4231 = vxpose.xlu1.b32.cont [2/16] (narrow) %v5614_v26, 8  ;;  %v5616_v54 = vpop.eup %5615  ;;  %5631 = vrcp.f32 %v8859_v32 }
 0x6a0   : > { %v5618_v2 = vpop.eup %5617  ;;  %5633 = vrcp.f32 %v8922_v50 }
 0x6a1   : > { %v5620_v57 = vpop.eup %5619  ;;  %5635 = vrcp.f32 %v8870_v38 }
 0x6a2   : > { %v5622_v23 = vpop.eup %5621  ;;  %5637 = vrcp.f32 %v8926_v43 }
 0x6a3   : > { %4232 = vxpose.xlu1.b32.cont [3/16] (narrow) %v5616_v54, 8  ;;  %5639 = vrcp.f32 %v8881_v25  ;;  %v10567_v25 = vld [vmem:[#allocation59_spill] sm:$0xff] }
 0x6a4   : > { %v5624_v11 = vpop.eup %5623  ;;  %5641 = vrcp.f32 %v8936_v37 }
 0x6a5   : > { %5643 = vrcp.f32 %v8883_v46 }
 0x6a6   : > { %v5626_v54 = vpop.eup %5625  ;;  %5645 = vrcp.f32 %v8940_v3 }
 0x6a7   : > { %4233 = vxpose.xlu1.b32.cont [4/16] (narrow) %v5618_v2, 8  ;;  %v5628_v14 = vpop.eup %5627  ;;  %5647 = vrcp.f32 %v8894_v39 }
 0x6a8   : > { %5649 = vrcp.f32 %v8949_v33 }
 0x6a9   : > { %5651 = vrcp.f32 %v10567_v25 }
 0x6aa   : > { %5653 = vrcp.f32 %v8953_v12 }
 0x6ab   : > { %4234 = vxpose.xlu1.b32.cont [5/16] (narrow) %v5620_v57, 8  ;;  %5655 = vrcp.f32 %v8908_v9 }
 0x6ac   : > { %5657 = vrcp.f32 %v8961_v30 }
 0x6ad   : > { %5659 = vrcp.f32 %v9088_v21 }
 0x6af   : > { %4235 = vxpose.xlu1.b32.cont [6/16] (narrow) %v5622_v23, 8  ;;  %v5630_v23 = vpop.eup %5629  ;;  %5661 = vrcp.f32 %v8990_v60 }
 0x6b0   : > { %v5632_v31 = vpop.eup %5631  ;;  %5663 = vrcp.f32 %v9092_v53 }
 0x6b1   : > { %v5634_v32 = vpop.eup %5633  ;;  %5665 = vrcp.f32 %v9000_v63 }
 0x6b2   : > { %v5636_v10 = vpop.eup %5635  ;;  %5667 = vrcp.f32 %v9095_v45 }
 0x6b3   : > { %4236 = vxpose.xlu1.b32.cont [7/16] (narrow) %v5624_v11, 8  ;;  %v5638_v38 = vpop.eup %5637  ;;  %5669 = vrcp.f32 %v9003_v61 }
 0x6b4   : > { %v5640_v50 = vpop.eup %5639  ;;  %5671 = vrcp.f32 %v9099_v34 }
 0x6b5   : > { %v5642_v43 = vpop.eup %5641  ;;  %5673 = vrcp.f32 %v9015_v20 }
 0x6b6   : > { %v5644_v37 = vpop.eup %5643 }
 0x6b7   : > { %4237 = vxpose.xlu1.b32.cont [8/16] (narrow) %v5626_v54, 8  ;;  %v5646_v46 = vpop.eup %5645 }
 0x6b8   : > { %v5648_v3 = vpop.eup %5647 }
 0x6b9   : > { %v5650_v39 = vpop.eup %5649 }
 0x6ba   : > { %v5652_v57 = vpop.eup %5651 }
 0x6bb   : > { %4238 = vxpose.xlu1.b32.cont [9/16] (narrow) %v5628_v14, 8  ;;  %v5654_v33 = vpop.eup %5653 }
 0x6bc   : > { %v5656_v49 = vpop.eup %5655 }
 0x6bd   : > { %v5658_v12 = vpop.eup %5657 }
 0x6be   : > { %4262 = vxpose.xlu0.b32.start [1/16] (narrow) %v5630_v23, 8  ;;  %v5660_v9 = vpop.eup %5659 }
 0x6bf   : > { %4239 = vxpose.xlu1.b32.cont [10/16] (narrow) %v5632_v31, 8  ;;  %v5662_v30 = vpop.eup %5661 }
 0x6c0   : > { %v5664_v21 = vpop.eup %5663 }
 0x6c1   : > { %v5666_v60 = vpop.eup %5665 }
 0x6c2   : > { %4263 = vxpose.xlu0.b32.cont [2/16] (narrow) %v5634_v32, 8  ;;  %v5668_v53 = vpop.eup %5667 }
 0x6c3   : > { %4240 = vxpose.xlu1.b32.cont [11/16] (narrow) %v5636_v10, 8  ;;  %v5670_v63 = vpop.eup %5669 }
 0x6c4   : > { %v5672_v45 = vpop.eup %5671 }
 0x6c5   : > { %v5674_v11 = vpop.eup %5673 }
 0x6c6   : > { %4264 = vxpose.xlu0.b32.cont [3/16] (narrow) %v5638_v38, 8 }
 0x6c7   : > { %4241 = vxpose.xlu1.b32.cont [12/16] (narrow) %v5640_v50, 8 }
 0x6ca   : > { %4265 = vxpose.xlu0.b32.cont [4/16] (narrow) %v5642_v43, 8 }
 0x6cb   : > { %4242 = vxpose.xlu1.b32.cont [13/16] (narrow) %v5644_v37, 8 }
 0x6ce   : > { %4266 = vxpose.xlu0.b32.cont [5/16] (narrow) %v5646_v46, 8 }
 0x6cf   : > { %4243 = vxpose.xlu1.b32.cont [14/16] (narrow) %v5648_v3, 8 }
 0x6d2   : > { %4267 = vxpose.xlu0.b32.cont [6/16] (narrow) %v5650_v39, 8 }
 0x6d3   : > { %4244 = vxpose.xlu1.b32.cont [15/16] (narrow) %v5652_v57, 8 }
 0x6d5   : > { %v9203_v26 = vpop.xlane.xlu1 %3603 }
 0x6d6   : > { %4268 = vxpose.xlu0.b32.cont [7/16] (narrow) %v5654_v33, 8 }
 0x6d7   : > { %4245 = vxpose.xlu1.b32.end [16/16] (narrow) %v5656_v49, 8 }
 0x6d9   : > { %v9207_v7 = vpop.xlane.xlu1 %3606 }
 0x6da   : > { %4269 = vxpose.xlu0.b32.cont [8/16] (narrow) %v5658_v12, 8 }
 0x6dd   : > { %v9210_v2 = vpop.xlane.xlu1 %3609 }
 0x6de   : > { %4270 = vxpose.xlu0.b32.cont [9/16] (narrow) %v5660_v9, 8  ;;  %v10568_v9 = vld [vmem:[#allocation150_spill] sm:$0xff] }
 0x6e1   : > { %v9212_v24 = vpop.xlane.xlu1 %3615 }
 0x6e2   : > { %4271 = vxpose.xlu0.b32.cont [10/16] (narrow) %v5662_v30, 8 }
 0x6e5   : > { %v9214_v61 = vpop.xlane.xlu1 %3621 }
 0x6e6   : > { %4272 = vxpose.xlu0.b32.cont [11/16] (narrow) %v5664_v21, 8 }
 0x6e9   : > { %v9218_v34 = vpop.xlane.xlu1 %3627 }
 0x6ea   : > { %4273 = vxpose.xlu0.b32.cont [12/16] (narrow) %v5666_v60, 8 }
 0x6ed   : > { %v9221_v20 = vpop.xlane.xlu1 %3633 }
 0x6ee   : > { %4274 = vxpose.xlu0.b32.cont [13/16] (narrow) %v5668_v53, 8  ;;  %v10569_v53 = vld [vmem:[#allocation137_spill] sm:$0xff] }
 0x6f1   : > { %v3661_v31 = vpop.xlane.xlu1 %3660 }
 0x6f2   : > { %4275 = vxpose.xlu0.b32.cont [14/16] (narrow) %v5670_v63, 8 }
 0x6f6   : > { %4276 = vxpose.xlu0.b32.cont [15/16] (narrow) %v5672_v45, 8 }
 0x6fa   : > { %4277 = vxpose.xlu0.b32.end [16/16] (narrow) %v5674_v11, 8 }
 0x6fe   : > { %3672 = vadd.xlane.f32.xlu1 %v8945_v4 }
 0x702   : > { %3678 = vadd.xlane.f32.xlu1 %v8957_v29 }
 0x706   : > { %v3652_v54 = vpop.xlane.xlu0 %3651  ;;  %3684 = vadd.xlane.f32.xlu1 %v8967_v6  ;;  %v3667_v6 = vpop.xlane.xlu1 %3666 }
 0x707   : > { %5675 = vrcp.f32 %v3652_v54 }
 0x70a   : > { %v3655_v14 = vpop.xlane.xlu0 %3654  ;;  %3687 = vadd.xlane.f32.xlu1 %v8969_v19 }
 0x70b   : > { %5677 = vrcp.f32 %v3655_v14 }
 0x70e   : > { %v3658_v23 = vpop.xlane.xlu0 %3657  ;;  %3690 = vadd.xlane.f32.xlu1 %v8973_v15 }
 0x70f   : > { %5679 = vrcp.f32 %v3658_v23 }
 0x710   : > { %5681 = vrcp.f32 %v3661_v31 }
 0x711   : > { %v5676_v4 = vpop.eup %5675 }
 0x712   : > { %4390 = vxpose.xlu0.b32.start [1/16] (narrow) %v5676_v4, 8  ;;  %3693 = vadd.xlane.f32.xlu1 %v8975_v35  ;;  %v3664_v29 = vpop.xlane.xlu0 %3663 }
 0x713   : > { %5683 = vrcp.f32 %v3664_v29 }
 0x714   : > { %5685 = vrcp.f32 %v3667_v6 }
 0x715   : > { %v5678_v32 = vpop.eup %5677 }
 0x716   : > { %4391 = vxpose.xlu0.b32.cont [2/16] (narrow) %v5678_v32, 8  ;;  %3696 = vadd.xlane.f32.xlu1 %v8979_v41  ;;  %v3670_v38 = vpop.xlane.xlu0 %3669 }
 0x717   : > { %5687 = vrcp.f32 %v3670_v38 }
 0x718   : > { %5689 = vrcp.f32 %v9203_v26 }
 0x719   : > { %v5680_v10 = vpop.eup %5679  ;;  %5691 = vrcp.f32 %v9207_v7  ;;  %v10572_v7 = vpack.c.bf16 %v9161_v42, %v9158_v27 }
 0x71a   : > { %4392 = vxpose.xlu0.b32.cont [3/16] (narrow) %v5680_v10, 8  ;;  %v5682_v50 = vpop.eup %5681  ;;  %v9232_v33 = vpop.xlane.xlu0 %3675  ;;  %5693 = vrcp.f32 %v9210_v2  ;;  %v10573_v2 = vld [vmem:[#allocation31_spill] sm:$0xff] }
 0x71b   : > { %v4246_v19 = vpop.trf.xlu1  ;;  %5695 = vrcp.f32 %v10569_v53 }
 0x71c   : > { %v4433_v15 = vrot.slane %v4246_v19, %v8988_v18  ;;  %5697 = vrcp.f32 %v9212_v24 }
 0x71d   : > { %v5684_v3 = vpop.eup %5683  ;;  %5699 = vrcp.f32 %v10573_v2 }
 0x71e   : > { %v4462_v25 = vmul.f32 %v4433_v15, %v9043_v22  ;;  %v4464_v35 = vmul.f32 %v4433_v15, %v9047_v55  ;;  %v4466_v43 = vmul.f32 %v4433_v15, %v9053_v56  ;;  %v4468_v37 = vmul.f32 %v4433_v15, %v9057_v5  ;;  %4393 = vxpose.xlu0.b32.cont [4/16] (narrow) %v5682_v50, 8  ;;  %v5686_v39 = vpop.eup %5685  ;;  %v9234_v49 = vpop.xlane.xlu0 %3681  ;;  %v10575_v50 = vld [vmem:[#allocation66_spill] sm:$0xff] }
 0x71f   : > { %5701 = vrcp.f32 %v9214_v61 }
 0x720   : > { %v4490_v41 = vpack.c.bf16 %v4464_v35, %v4462_v25  ;;  %v4492_v46 = vpack.c.bf16 %v4468_v37, %v4466_v43  ;;  %5703 = vrcp.f32 %v9103_v8  ;;  %v10576_v35 = vld [vmem:[#allocation133_spill] sm:$0xff]  ;;  %v10577_v37 = vld [vmem:[#allocation96_spill] sm:$0xff] }
 0x721   : > { %v5688_v57 = vpop.eup %5687  ;;  %5705 = vrcp.f32 %v9218_v34 }
 0x722   : > { %4394 = vxpose.xlu0.b32.cont [5/16] (narrow) %v5684_v3, 8  ;;  %v5690_v26 = vpop.eup %5689  ;;  %5707 = vrcp.f32 %v9122_v59 }
 0x723   : > { %5709 = vrcp.f32 %v9221_v20 }
 0x724   : > { %5711 = vrcp.f32 %v9124_v36 }
 0x725   : > { %5713 = vrcp.f32 %v9127_v28 }
 0x726   : > { %4395 = vxpose.xlu0.b32.cont [6/16] (narrow) %v5686_v39, 8  ;;  %5715 = vrcp.f32 %v9130_v13  ;;  %v4503_v39 = vld [vmem:[#allocation11] sm:$0xf] }
 0x727   : > { %5717 = vrcp.f32 %v9134_v48 }
 0x728   : > { %5719 = vrcp.f32 %v9137_v58 }
 0x72a   : > { %4396 = vxpose.xlu0.b32.cont [7/16] (narrow) %v5688_v57, 8 }
 0x73e   : > { %v4278_v22 = vpop.trf.xlu0 }
 0x73f   : > { %v4437_v55 = vrot.slane %v4278_v22, %v8988_v18 }
 0x741   : > { %v4463_v56 = vmul.f32 %v4437_v55, %v9045_v62  ;;  %v4465_v5 = vmul.f32 %v4437_v55, %v9050_v17  ;;  %v4467_v12 = vmul.f32 %v4437_v55, %v9055_v1  ;;  %v4469_v30 = vmul.f32 %v4437_v55, %v10568_v9  ;;  %v5692_v17 = vpop.eup %5691  ;;  %v10579_v55 = vld [vmem:[#allocation19_spill] sm:$0xff] }
 0x742   : > { %v10570_v62 = vpack.c.bf16 %v9155_v0, %v9152_v16  ;;  %v10571_v1 = vpack.c.bf16 %v9109_v47, %v9106_v44  ;;  %v5694_v63 = vpop.eup %5693  ;;  %v10574_v16 = vpack.c.bf16 %v9115_v40, %v9112_v52 }
 0x743   : > { %v4491_v21 = vpack.c.bf16 %v4465_v5, %v4463_v56  ;;  %v4493_v60 = vpack.c.bf16 %v4469_v30, %v4467_v12  ;;  %v5696_v0 = vpop.eup %5695  ;;  %v10580_v5 = vld [vmem:[#allocation152_spill] sm:$0xff]  ;;  %v10581_v12 = vld [vmem:[#allocation143_spill] sm:$0xff] }
 0x744   : > { %v5698_v45 = vpop.eup %5697 }
 0x745   : > { %4513 = vmatprep.subr.bf16.mxu0 %v4491_v21  ;;  %v5700_v44 = vpop.eup %5699 }
 0x746   : > { %4514 = vmatpush1.bf16.msra.mxu0 %v4490_v41  ;;  %v5702_v47 = vpop.eup %5701 }
 0x747   : > { %4515 = vmatprep.subr.bf16.mxu0 %v4493_v60  ;;  %v5704_v42 = vpop.eup %5703  ;;  %v4502_v60 = vld [vmem:[#allocation9] sm:$0x3] }
 0x748   : > { %v5706_v52 = vpop.eup %5705 }
 0x749   : > { %4358 = vxpose.xlu1.b32.start [1/16] (narrow) %v5690_v26, 8  ;;  %v5708_v40 = vpop.eup %5707 }
 0x74a   : > { %4516 = vmatpush1.bf16.msra.mxu0 %v4492_v46  ;;  %v5710_v8 = vpop.eup %5709 }
 0x74b   : > { %4517 = vmatprep.subr.bf16.mxu0 %v10570_v62  ;;  %v5712_v27 = vpop.eup %5711 }
 0x74c   : > { %v5714_v59 = vpop.eup %5713 }
 0x74d   : > { %4359 = vxpose.xlu1.b32.cont [2/16] (narrow) %v5692_v17, 8  ;;  %v5716_v24 = vpop.eup %5715 }
 0x74e   : > { %4518 = vmatpush1.bf16.msra.mxu0 %v10571_v1  ;;  %v5718_v11 = vpop.eup %5717 }
 0x74f   : > { %4519 = vmatprep.subr.bf16.mxu0 %v10572_v7  ;;  %v5720_v36 = vpop.eup %5719 }
 0x751   : > { %4360 = vxpose.xlu1.b32.cont [3/16] (narrow) %v5694_v63, 8 }
 0x752   : > { %4520 = vmatpush1.bf16.msra.mxu0 %v10574_v16 }
 0x755   : > { %4361 = vxpose.xlu1.b32.cont [4/16] (narrow) %v5696_v0, 8 }
 0x759   : > { %4362 = vxpose.xlu1.b32.cont [5/16] (narrow) %v5698_v45, 8 }
 0x75d   : > { %4363 = vxpose.xlu1.b32.cont [6/16] (narrow) %v5700_v44, 8 }
 0x761   : > { %4364 = vxpose.xlu1.b32.cont [7/16] (narrow) %v5702_v47, 8 }
 0x765   : > { %4365 = vxpose.xlu1.b32.cont [8/16] (narrow) %v5704_v42, 8 }
 0x769   : > { %4366 = vxpose.xlu1.b32.cont [9/16] (narrow) %v5706_v52, 8 }
 0x76d   : > { %4367 = vxpose.xlu1.b32.cont [10/16] (narrow) %v5708_v40, 8 }
 0x771   : > { %4368 = vxpose.xlu1.b32.cont [11/16] (narrow) %v5710_v8, 8 }
 0x775   : > { %4369 = vxpose.xlu1.b32.cont [12/16] (narrow) %v5712_v27, 8 }
 0x779   : > { %4370 = vxpose.xlu1.b32.cont [13/16] (narrow) %v5714_v59, 8 }
 0x77d   : > { %4371 = vxpose.xlu1.b32.cont [14/16] (narrow) %v5716_v24, 8 }
 0x781   : > { %4372 = vxpose.xlu1.b32.cont [15/16] (narrow) %v5718_v11, 8 }
 0x785   : > { %4373 = vxpose.xlu1.b32.end [16/16] (narrow) %v5720_v36, 8 }
 0x78b   : > { %v3673_v61 = vpop.xlane.xlu1 %3672 }
 0x78c   : > { %5721 = vrcp.f32 %v3673_v61 }
 0x78d   : > { %5723 = vrcp.f32 %v9232_v33 }
 0x78f   : > { %v3679_v28 = vpop.xlane.xlu1 %3678 }
 0x790   : > { %5725 = vrcp.f32 %v3679_v28 }
 0x791   : > { %5727 = vrcp.f32 %v9234_v49  ;;  %v10578_v49 = vld [vmem:[#allocation64_spill] sm:$0xff] }
 0x793   : > { %v3685_v13 = vpop.xlane.xlu1 %3684 }
 0x794   : > { %5729 = vrcp.f32 %v3685_v13 }
 0x796   : > { %v5722_v34 = vpop.eup %5721 }
 0x797   : > { %v3688_v54 = vpop.xlane.xlu1 %3687  ;;  %4397 = vxpose.xlu0.b32.cont [8/16] (narrow) %v5722_v34, 8  ;;  %v5724_v48 = vpop.eup %5723 }
 0x798   : > { %5731 = vrcp.f32 %v3688_v54 }
 0x79a   : > { %v5726_v20 = vpop.eup %5725 }
 0x79b   : > { %4398 = vxpose.xlu0.b32.cont [9/16] (narrow) %v5724_v48, 8  ;;  %v3691_v58 = vpop.xlane.xlu1 %3690  ;;  %v5728_v14 = vpop.eup %5727 }
 0x79c   : > { %5733 = vrcp.f32 %v3691_v58 }
 0x79e   : > { %v5730_v31 = vpop.eup %5729 }
 0x79f   : > { %4399 = vxpose.xlu0.b32.cont [10/16] (narrow) %v5726_v20, 8  ;;  %v3694_v23 = vpop.xlane.xlu1 %3693 }
 0x7a0   : > { %5735 = vrcp.f32 %v3694_v23 }
 0x7a2   : > { %v5732_v29 = vpop.eup %5731 }
 0x7a3   : > { %4400 = vxpose.xlu0.b32.cont [11/16] (narrow) %v5728_v14, 8  ;;  %v3697_v4 = vpop.xlane.xlu1 %3696 }
 0x7a4   : > { %5737 = vrcp.f32 %v3697_v4 }
 0x7a6   : > { %v5734_v32 = vpop.eup %5733 }
 0x7a7   : > { %4401 = vxpose.xlu0.b32.cont [12/16] (narrow) %v5730_v31, 8 }
 0x7aa   : > { %v5736_v6 = vpop.eup %5735 }
 0x7ab   : > { %4402 = vxpose.xlu0.b32.cont [13/16] (narrow) %v5732_v29, 8 }
 0x7ae   : > { %v5738_v10 = vpop.eup %5737 }
 0x7af   : > { %4403 = vxpose.xlu0.b32.cont [14/16] (narrow) %v5734_v32, 8 }
 0x7b3   : > { %4404 = vxpose.xlu0.b32.cont [15/16] (narrow) %v5736_v6, 8 }
 0x7b7   : > { %4405 = vxpose.xlu0.b32.end [16/16] (narrow) %v5738_v10, 8 }
 0x7c9   : > { %v4374_v19 = vpop.trf.xlu1 }
 0x7ca   : > { %v4449_v38 = vrot.slane %v4374_v19, %v8988_v18 }
 0x7cc   : > { %v4478_v15 = vmul.f32 %v4449_v38, %v9141_v51  ;;  %v4480_v25 = vmul.f32 %v4449_v38, %v10575_v50  ;;  %v4482_v43 = vmul.f32 %v4449_v38, %v10576_v35  ;;  %v4484_v41 = vmul.f32 %v4449_v38, %v10577_v37 }
 0x7ce   : > { %v4498_v46 = vpack.c.bf16 %v4480_v25, %v4478_v15  ;;  %v4500_v3 = vpack.c.bf16 %v4484_v41, %v4482_v43 }
 0x7e0   : > { %4506 = vperm.xlu0 %4942, %v4503_v39  }
 0x7fb   : > { %v4406_v57 = vpop.trf.xlu0 }
 0x7fc   : > { %v4453_v33 = vrot.slane %v4406_v57, %v8988_v18 }
 0x7fe   : > { %v4479_v22 = vmul.f32 %v4453_v33, %v10578_v49  ;;  %v4481_v56 = vmul.f32 %v4453_v33, %v10579_v55  ;;  %v4483_v51 = vmul.f32 %v4453_v33, %v10580_v5  ;;  %v4485_v9 = vmul.f32 %v4453_v33, %v10581_v12 }
 0x800   : > { %v4499_v30 = vpack.c.bf16 %v4481_v56, %v4479_v22  ;;  %v4501_v21 = vpack.c.bf16 %v4485_v9, %v4483_v51 }
 0x802   : > { %4521 = vmatprep.subr.bf16.mxu0 %v4499_v30 }
 0x803   : > { %4522 = vmatpush1.bf16.msra.mxu0 %v4498_v46 }
 0x804   : > { %4523 = vmatprep.subr.bf16.mxu0 %v4501_v21 }
 0x807   : > { %4524 = vmatpush1.bf16.msra.mxu0 %v4500_v3 }
 0x80a   : > { %4542 = vmatmul.mubr.bf16.vlgmr.msra.gmra.mrb[184].mxu0 %v4502_v60 }
 0x85f   : > { %v4507_v18 = vpop.permute.xlu0 %4506 }
 0x8dd   : > { %v4543_v26 = vpop.f32.mrb[184].mxu0 }
 0x8de   : > { %v4544_v53 = vadd.f32 %v4543_v26, %v4507_v18  ;;  %v4545_v62 = vpop.f32.mrb[185].mxu0 }
 0x8df   : > { %v4546_v17 = vadd.f32 %v4545_v62, %v4507_v18  ;;  %v4547_v1 = vpop.f32.mrb[186].mxu0 }
 0x8e0   : > { %v4548_v7 = vpop.f32.mrb[187].mxu0 }
 0x8e1   : > { %v4552_v63 = vcombine.low %v4544_v53, %v4546_v17 }
 0x8e3   : > { %4554 = vst [vmem:[%s306_s27] sm:$0xff] %v4552_v63 }
 0x8e4   : > { %5894 = shalt.err (!%p5891_p8)
}
 0x8e5   : > { %s5895_s17 = scalar_lea.hbm %s9286_s6, 128  ;;  %s5899_s30 = scalar_lea.hbm %s9340_s5, 256 }
 0x8e6   : > { %p5896_p9 = scmp.ne.s32.totalorder %s9286_s6, %s5895_s17  ;;  %p5900_p3 = scmp.lt.u32.totalorder %s9286_s6, %s9340_s5 }
 0x8e7   : > { %p5901_p1 = scmp.lt.u32.totalorder %s5899_s30, %s5895_s17  ;;  %p5903_p11 = scmp.lt.u32.totalorder %s5895_s17, %s9286_s6 }
 0x8e8   : > { %p5897_p4 = pnand %p5896_p9, %p10582_p0 }
 0x8e9   : > { %p5902_p12 = por %p5901_p1, %p5900_p3 }
 0x8ea   : > { %p5898_p6 = pneg %p5897_p4 }
 0x8eb   : > { %p5904_p5 = por %p5903_p11, %p5902_p12 }
 0x8ed   : > { %p5905_p7 = pnand %p5904_p5, %p5898_p6 }
 0x8ef   : > { %5908 = shalt.err (!%p5905_p7)
}
 0x8f0   : > { %4853 = dma.vmem_to_hbm [thread:$0]  (%p10582_p0), %s9288_s8, 128, %s9286_s6, %s4556_s10  }
 0x8f1 PF: > { %s4584_s27 = sand.u32 1, %s5951_s18   ;;  %p10583_p10 = scmp.ne.s32.totalorder %s9691_s9, 0 }
 0x8f2   : > { %p10584_p13 = scmp.ge.s32.totalorder %s5971_s23, 2  ;;  %s4585_s15 = scalar_lea.sflag [#allocation5], %s4584_s27 }
 0x8f4   : > { %p4873_p2 = pnand %p10584_p13, %p10583_p10 }
 0x8f6   : > { %5946 = dma.done.wait (!%p4873_p2), %s4585_s15, 128  }
 0x8f7   : > { %5948 = vsyncadd (!%p4873_p2), %s4585_s15, 4294967168  ;;  %s23_s23 = sadd.s32 1, %s5971_s23   ;;  %s10585_s18 = smov %s5955_s19 }
 0x8f8   : > { %p20_p8 = scmp.ge.s32.totalorder %s23_s23, 4   ;;  %s10586_s19 = smov %s5959_s20 }
 0x8f9   : > { %s10587_s20 = smov %s6186_s7  ;;  %s10588_s21 = smov %s5967_s22 }
 0x8fa   : > { %s10589_s22 = smov %s10591_s28  ;;  %22 = sbr.rel (!%p20_p8) target bundleno = 8 (0x8), region = 110 }
 0x901   :  { %4590 = vsyncpa [#allocation4], 1 }
 0x902   :  { %4592 = vsyncpa [#allocation4 + $0x1], 1 }
 0x903   :  { %4593 = vsyncpa [#allocation7], 1 }
 0x904   :  { %4594 = vsyncpa [#allocation10], 1 }
 0x905   :  { %4595 = vsyncpa [#allocation5], 1 }
 0x906   :  { %4597 = vsyncpa [#allocation5 + $0x1], 1 }

</bundles_post_ra>
